<compile_context>
chip_gen: v7x
topology: tpu7x:2x2x1
jax: 0.10.0
libtpu: 0.0.40
codegen_flags: <defaults>
</compile_context>

<pallas_src>
import functools

import jax
import jax.numpy as jnp
from jax.experimental import pallas as pl
from jax.experimental.pallas import tpu as pltpu


def _round_up(x, m):
    return (x + m - 1) // m * m


# ---------------------------------------------------------------------------
# Fused forward kernel (single pallas_call; everything resident in VMEM)
# ---------------------------------------------------------------------------

def _discriminator_kernel(adj_ref, nodes_ref, sel_ref, *refs,
                          gc_dims, linear_dims, aux_dim, n_rel):
    """Whole Discriminator forward in one kernel, using only 2-D matmuls.

    adj_ref  : (n_rel, BN, BN) f32  block-diagonal adjacency per edge type
               (BN = B_pad * N_pad; "no edge" channel already dropped)
    nodes_ref: (BN, node_dim)  f32  node features, flattened, zero padded
    sel_ref  : (B_pad, BN)     f32  per-graph node-sum selector (also masks
                                    padded node rows / padded graphs)
    refs     : packed parameters (see pack_discriminator_params) followed by
               the outputs: logit_ref (B_pad, 1), pen_ref (B_pad, linear[-1]).
    """
    f32 = jnp.float32
    n_params = 2 + 3 * (len(gc_dims) - 1) + 3 + 2 * len(linear_dims) + 2
    param_refs = refs[:n_params]
    logit_ref, pen_ref = refs[n_params], refs[n_params + 1]
    it = iter(param_refs)

    nodes2d = nodes_ref[...]                                 # (BN, node_dim)

    # ---- Multi graph-convolution stack -------------------------------------
    # annotations = cat(h, nodes) is folded into split weights, so the kernel
    # never concatenates: ann @ W == h @ W_h + nodes @ W_n.
    h = None
    for li, out_f in enumerate(gc_dims):
        if li == 0:
            w_n = next(it)[...]
            b = next(it)[...]
            full = jnp.dot(nodes2d, w_n, preferred_element_type=f32) + b
        else:
            w_h = next(it)[...]
            w_n = next(it)[...]
            b = next(it)[...]
            full = (jnp.dot(h, w_h, preferred_element_type=f32)
                    + jnp.dot(nodes2d, w_n, preferred_element_type=f32) + b)
        # full = [edge_0 | edge_1 | ... | edge_{n_rel-1} | self]   (BN, (n_rel+1)*out)
        msg = None
        for e in range(n_rel):
            h_e = full[:, e * out_f:(e + 1) * out_f]
            term = jnp.dot(adj_ref[e], h_e, preferred_element_type=f32)
            msg = term if msg is None else msg + term
        h = jnp.tanh(msg + full[:, n_rel * out_f:])   # dropout: eval -> identity

    # ---- Graph aggregation: tanh( sum_nodes sigmoid(i) * tanh(j) ) ---------
    w_h = next(it)[...]
    w_n = next(it)[...]
    b = next(it)[...]
    ij = (jnp.dot(h, w_h, preferred_element_type=f32)
          + jnp.dot(nodes2d, w_n, preferred_element_type=f32) + b)   # (BN, 2*aux)
    gate = 1.0 / (1.0 + jnp.exp(-ij[:, :aux_dim]))            # sigmoid head
    val = jnp.tanh(ij[:, aux_dim:])                           # tanh head
    # Masked per-graph node sum expressed as a single MXU matmul.
    hg = jnp.tanh(jnp.dot(sel_ref[...], gate * val,
                          preferred_element_type=f32))         # (B_pad, aux)

    # ---- MultiDenseLayer: Linear -> Tanh (dropout eval -> identity) --------
    for _ in linear_dims:
        w = next(it)[...]
        b = next(it)[...]
        hg = jnp.tanh(jnp.dot(hg, w, preferred_element_type=f32) + b)
    pen_ref[...] = hg.astype(pen_ref.dtype)

    # ---- Output linear ------------------------------------------------------
    w_out = next(it)[...]
    b_out = next(it)[...]
    logit_ref[...] = (jnp.dot(hg, w_out, preferred_element_type=f32)
                      + b_out).astype(logit_ref.dtype)


# ---------------------------------------------------------------------------
# Parameters
# ---------------------------------------------------------------------------

def _init_linear(key, fan_in, fan_out, dtype=jnp.float32):
    """Matches torch.nn.Linear default init: U(-1/sqrt(fan_in), 1/sqrt(fan_in))."""
    kw, kb = jax.random.split(key)
    bound = 1.0 / float(fan_in) ** 0.5
    w = jax.random.uniform(kw, (fan_in, fan_out), dtype, -bound, bound)
    b = jax.random.uniform(kb, (fan_out,), dtype, -bound, bound)
    return w, b


def init_discriminator_params(key, *, gc_dims, aux_dim, linear_dims,
                              node_dim, edge_dim):
    n_rel = edge_dim - 1          # adjacency channel 0 ("no edge") is dropped
    keys = iter(jax.random.split(key, 64))
    gcn = []
    in_f = node_dim
    for out_f in gc_dims:
        rel = [_init_linear(next(keys), in_f, out_f) for _ in range(n_rel)]
        self_w, self_b = _init_linear(next(keys), in_f, out_f)
        gcn.append({
            "rel_w": jnp.stack([w for w, _ in rel]),   # (n_rel, in, out)
            "rel_b": jnp.stack([b for _, b in rel]),   # (n_rel, out)
            "self_w": self_w, "self_b": self_b,
        })
        in_f = out_f + node_dim                        # annotations concat nodes
    agg_in = gc_dims[-1] + node_dim
    i_w, i_b = _init_linear(next(keys), agg_in, aux_dim)
    j_w, j_b = _init_linear(next(keys), agg_in, aux_dim)
    dense, d_in = [], aux_dim
    for d_out in linear_dims:
        dense.append(_init_linear(next(keys), d_in, d_out))
        d_in = d_out
    out_w, out_b = _init_linear(next(keys), linear_dims[-1], 1)
    return {"gcn": gcn,
            "agg": {"i_w": i_w, "i_b": i_b, "j_w": j_w, "j_b": j_b},
            "dense": dense,
            "out": (out_w, out_b)}


def pack_discriminator_params(params, node_dim):
    """One-time weight re-layout (hoisted out of the forward pass).

    * Per-edge-type GCN linears AND the self linear are fused along the output
      axis -> one lane-dense MXU pass per layer produces all edge terms + self.
    * Each fused weight is split into its `h` rows and `nodes` rows so the
      kernel never concatenates annotations.
    * Aggregation sigmoid/tanh heads are fused into one 2*aux-wide head
      (split into h/nodes rows the same way).
    * All biases become (1, N) rows for direct VMEM broadcast.
    """
    packed = []
    for li, layer in enumerate(params["gcn"]):
        rel_w = layer["rel_w"]                         # (n_rel, in, out)
        n_rel = rel_w.shape[0]
        w_full = jnp.concatenate(
            [rel_w[e] for e in range(n_rel)] + [layer["self_w"]], axis=1)
        b_full = jnp.concatenate(
            [layer["rel_b"][e] for e in range(n_rel)]
            + [layer["self_b"]]).reshape(1, -1)
        if li == 0:
            packed += [w_full, b_full]
        else:
            h_in = w_full.shape[0] - node_dim
            packed += [w_full[:h_in], w_full[h_in:], b_full]
    agg = params["agg"]
    w_ij = jnp.concatenate([agg["i_w"], agg["j_w"]], axis=1)   # (agg_in, 2*aux)
    b_ij = jnp.concatenate([agg["i_b"], agg["j_b"]]).reshape(1, -1)
    h_in = w_ij.shape[0] - node_dim
    packed += [w_ij[:h_in], w_ij[h_in:], b_ij]
    for w, b in params["dense"]:
        packed += [w, b.reshape(1, -1)]
    out_w, out_b = params["out"]
    packed += [out_w, out_b.reshape(1, -1)]
    return packed


# ---------------------------------------------------------------------------
# Forward (wrapper around the single fused pallas_call)
# ---------------------------------------------------------------------------

def discriminator_forward(packed_params, adj, nodes, *, gc_dims, aux_dim,
                          linear_dims, node_dim, edge_dim):
    B, N, _, E = adj.shape
    assert E == edge_dim
    n_rel = edge_dim - 1
    b_pad = _round_up(max(B, 1), 8)        # sublane-aligned batch
    n_pad = _round_up(N, 8)                # sublane-aligned node count
    bn = b_pad * n_pad                     # 128 for the test config

    # Tiny layout prep (XLA side, once per call): drop channel 0, permute to
    # (B, E-1, N, N), zero-pad, then block-diagonalize per edge type so the
    # in-kernel message passing is a plain dense 2-D matmul.
    adj_ = jnp.transpose(adj[:, :, :, 1:], (0, 3, 1, 2)).astype(jnp.float32)
    adj_ = jnp.pad(adj_, ((0, b_pad - B), (0, 0),
                          (0, n_pad - N), (0, n_pad - N)))
    eye_b = jnp.eye(b_pad, dtype=jnp.float32)
    adj_bd = jnp.einsum('beij,bc->ebicj', adj_, eye_b).reshape(n_rel, bn, bn)

    nodes_p = jnp.pad(nodes.astype(jnp.float32),
                      ((0, b_pad - B), (0, n_pad - N), (0, 0)))
    nodes2d = nodes_p.reshape(bn, node_dim)

    # Selector matrix: sel[b, c*n_pad + i] = 1 iff c == b and node i is real.
    node_ok = (jnp.arange(n_pad) < N).astype(jnp.float32)
    sel = jnp.einsum('bc,i->bci', eye_b, node_ok).reshape(b_pad, bn)

    inputs = [adj_bd, nodes2d, sel] + list(packed_params)

    def full_spec(a):
        nd = a.ndim
        return pl.BlockSpec(a.shape, lambda i, _nd=nd: (0,) * _nd)

    kernel = functools.partial(
        _discriminator_kernel, gc_dims=tuple(gc_dims),
        linear_dims=tuple(linear_dims), aux_dim=aux_dim, n_rel=n_rel)

    logit, pen = pl.pallas_call(
        kernel,
        out_shape=(jax.ShapeDtypeStruct((b_pad, 1), jnp.float32),
                   jax.ShapeDtypeStruct((b_pad, linear_dims[-1]), jnp.float32)),
        grid=(1,),
        in_specs=[full_spec(a) for a in inputs],
        out_specs=(pl.BlockSpec((b_pad, 1), lambda i: (0, 0)),
                   pl.BlockSpec((b_pad, linear_dims[-1]), lambda i: (0, 0))),
        compiler_params=pltpu.CompilerParams(
            dimension_semantics=("arbitrary",)),
    )(*inputs)
    return logit[:B], pen[:B]


# Pure-JAX reference (eval mode) for verification.
def discriminator_forward_ref(params, adj, nodes):
    adj_ = jnp.transpose(adj[:, :, :, 1:], (0, 3, 1, 2))    # (B, E-1, N, N)
    h = None
    for layer in params["gcn"]:
        ann = nodes if h is None else jnp.concatenate([h, nodes], -1)
        h_e = (jnp.einsum('bnf,efo->beno', ann, layer["rel_w"])
               + layer["rel_b"][None, :, None, :])
        msg = jnp.einsum('benm,bemo->bno', adj_, h_e)
        h = jnp.tanh(msg + ann @ layer["self_w"] + layer["self_b"])
    ann = jnp.concatenate([h, nodes], -1)
    agg = params["agg"]
    i = jax.nn.sigmoid(ann @ agg["i_w"] + agg["i_b"])
    j = jnp.tanh(ann @ agg["j_w"] + agg["j_b"])
    h = jnp.tanh(jnp.sum(i * j, axis=1))
    for w, b in params["dense"]:
        h = jnp.tanh(h @ w + b)
    out_w, out_b = params["out"]
    return h @ out_w + out_b, h


# --------------------------------- Main --------------------------------------

if __name__ == "__main__":
    # MolGAN-style small config: dims = ((128, 64), 128, (128, 64))
    gc_dims = (128, 64)
    aux_dim = 128
    linear_dims = (128, 64)
    node_dim = 5
    edge_dim = 5
    num_nodes = 9
    batch = 2

    key = jax.random.PRNGKey(0)
    k_param, k_adj, k_nodes = jax.random.split(key, 3)
    params = init_discriminator_params(
        k_param, gc_dims=gc_dims, aux_dim=aux_dim, linear_dims=linear_dims,
        node_dim=node_dim, edge_dim=edge_dim)
    packed = pack_discriminator_params(params, node_dim)   # one-time re-layout

    # Soft one-hot-ish graph inputs (what a GAN generator would produce).
    adj_logits = jax.random.normal(
        k_adj, (batch, num_nodes, num_nodes, edge_dim), jnp.float32)
    adj_logits = 0.5 * (adj_logits + jnp.transpose(adj_logits, (0, 2, 1, 3)))
    adj = jax.nn.softmax(adj_logits, axis=-1)
    nodes = jax.nn.softmax(
        jax.random.normal(k_nodes, (batch, num_nodes, node_dim), jnp.float32),
        axis=-1)

    fwd = jax.jit(functools.partial(
        discriminator_forward, gc_dims=gc_dims, aux_dim=aux_dim,
        linear_dims=linear_dims, node_dim=node_dim, edge_dim=edge_dim))
    logit, pen = fwd(packed, adj, nodes)
    jax.block_until_ready((logit, pen))

    assert logit.shape == (batch, 1)
    assert pen.shape == (batch, linear_dims[-1])

    logit_ref, pen_ref = discriminator_forward_ref(params, adj, nodes)
    assert jnp.allclose(pen, pen_ref, atol=5e-3, rtol=5e-3), \
        float(jnp.max(jnp.abs(pen - pen_ref)))
    assert jnp.allclose(logit, logit_ref, atol=5e-3, rtol=5e-3), \
        float(jnp.max(jnp.abs(logit - logit_ref)))

    print("KERNEL_OK")
</pallas_src>

<mosaic_0001>
module attributes {stable_mosaic.version = 11 : i64} {
  func.func @_discriminator_kernel(%arg0: i32, %arg1: memref<4x128x128xf32, #tpu.memory_space<vmem>>, %arg2: memref<128x5xf32, #tpu.memory_space<vmem>>, %arg3: memref<8x128xf32, #tpu.memory_space<vmem>>, %arg4: memref<5x640xf32, #tpu.memory_space<vmem>>, %arg5: memref<1x640xf32, #tpu.memory_space<vmem>>, %arg6: memref<128x320xf32, #tpu.memory_space<vmem>>, %arg7: memref<5x320xf32, #tpu.memory_space<vmem>>, %arg8: memref<1x320xf32, #tpu.memory_space<vmem>>, %arg9: memref<64x256xf32, #tpu.memory_space<vmem>>, %arg10: memref<5x256xf32, #tpu.memory_space<vmem>>, %arg11: memref<1x256xf32, #tpu.memory_space<vmem>>, %arg12: memref<128x128xf32, #tpu.memory_space<vmem>>, %arg13: memref<1x128xf32, #tpu.memory_space<vmem>>, %arg14: memref<128x64xf32, #tpu.memory_space<vmem>>, %arg15: memref<1x64xf32, #tpu.memory_space<vmem>>, %arg16: memref<64x1xf32, #tpu.memory_space<vmem>>, %arg17: memref<1x1xf32, #tpu.memory_space<vmem>>, %arg18: memref<8x1xf32, #tpu.memory_space<vmem>>, %arg19: memref<8x64xf32, #tpu.memory_space<vmem>>) attributes {dimension_semantics = [#tpu.dimension_semantics<arbitrary>], iteration_bounds = array<i64: 1>, scalar_prefetch = 0 : i64, scratch_operands = 0 : i64, tpu.core_type = #tpu.core_type<tc>, window_params = [{pipeline_mode = #tpu.pipeline_mode<synchronous>, transform_indices = @transform_0, window_bounds = array<i64: 4, 128, 128>}, {pipeline_mode = #tpu.pipeline_mode<synchronous>, transform_indices = @transform_1, window_bounds = array<i64: 128, 5>}, {pipeline_mode = #tpu.pipeline_mode<synchronous>, transform_indices = @transform_2, window_bounds = array<i64: 8, 128>}, {pipeline_mode = #tpu.pipeline_mode<synchronous>, transform_indices = @transform_3, window_bounds = array<i64: 5, 640>}, {pipeline_mode = #tpu.pipeline_mode<synchronous>, transform_indices = @transform_4, window_bounds = array<i64: 1, 640>}, {pipeline_mode = #tpu.pipeline_mode<synchronous>, transform_indices = @transform_5, window_bounds = array<i64: 128, 320>}, {pipeline_mode = #tpu.pipeline_mode<synchronous>, transform_indices = @transform_6, window_bounds = array<i64: 5, 320>}, {pipeline_mode = #tpu.pipeline_mode<synchronous>, transform_indices = @transform_7, window_bounds = array<i64: 1, 320>}, {pipeline_mode = #tpu.pipeline_mode<synchronous>, transform_indices = @transform_8, window_bounds = array<i64: 64, 256>}, {pipeline_mode = #tpu.pipeline_mode<synchronous>, transform_indices = @transform_9, window_bounds = array<i64: 5, 256>}, {pipeline_mode = #tpu.pipeline_mode<synchronous>, transform_indices = @transform_10, window_bounds = array<i64: 1, 256>}, {pipeline_mode = #tpu.pipeline_mode<synchronous>, transform_indices = @transform_11, window_bounds = array<i64: 128, 128>}, {pipeline_mode = #tpu.pipeline_mode<synchronous>, transform_indices = @transform_12, window_bounds = array<i64: 1, 128>}, {pipeline_mode = #tpu.pipeline_mode<synchronous>, transform_indices = @transform_13, window_bounds = array<i64: 128, 64>}, {pipeline_mode = #tpu.pipeline_mode<synchronous>, transform_indices = @transform_14, window_bounds = array<i64: 1, 64>}, {pipeline_mode = #tpu.pipeline_mode<synchronous>, transform_indices = @transform_15, window_bounds = array<i64: 64, 1>}, {pipeline_mode = #tpu.pipeline_mode<synchronous>, transform_indices = @transform_16, window_bounds = array<i64: 1, 1>}, {pipeline_mode = #tpu.pipeline_mode<synchronous>, transform_indices = @transform_17, window_bounds = array<i64: 8, 1>}, {pipeline_mode = #tpu.pipeline_mode<synchronous>, transform_indices = @transform_18, window_bounds = array<i64: 8, 64>}]} {
    %c0 = arith.constant 0 : index
    %c0_0 = arith.constant 0 : index
    %0 = vector.load %arg2[%c0, %c0_0] : memref<128x5xf32, #tpu.memory_space<vmem>>, vector<128x5xf32>
    %c0_1 = arith.constant 0 : index
    %c0_2 = arith.constant 0 : index
    %1 = vector.load %arg4[%c0_1, %c0_2] : memref<5x640xf32, #tpu.memory_space<vmem>>, vector<5x640xf32>
    %c0_3 = arith.constant 0 : index
    %c0_4 = arith.constant 0 : index
    %2 = vector.load %arg5[%c0_3, %c0_4] : memref<1x640xf32, #tpu.memory_space<vmem>>, vector<1x640xf32>
    %cst = arith.constant dense<0.000000e+00> : vector<128x640xf32>
    %3 = tpu.matmul %0, %1, %cst {dimension_numbers = #tpu.dot_dimension_numbers<[1], [0], [0], [1], [0, 0, 1, 1], [], []>} : vector<128x5xf32>, vector<5x640xf32>, vector<128x640xf32> -> vector<128x640xf32>
    %4 = vector.broadcast %2 : vector<1x640xf32> to vector<128x640xf32>
    %5 = arith.addf %3, %4 : vector<128x640xf32>
    %6 = vector.extract_strided_slice %5 {offsets = [0, 0], sizes = [128, 128], strides = [1, 1]} : vector<128x640xf32> to vector<128x128xf32>
    %c0_5 = arith.constant 0 : index
    %c0_6 = arith.constant 0 : index
    %c0_7 = arith.constant 0 : index
    %7 = vector.load %arg1[%c0_5, %c0_6, %c0_7] : memref<4x128x128xf32, #tpu.memory_space<vmem>>, vector<1x128x128xf32>
    %8 = vector.shape_cast %7 : vector<1x128x128xf32> to vector<128x128xf32>
    %cst_8 = arith.constant dense<0.000000e+00> : vector<128x128xf32>
    %9 = tpu.matmul %8, %6, %cst_8 {dimension_numbers = #tpu.dot_dimension_numbers<[1], [0], [0], [1], [0, 0, 1, 1], [], []>} : vector<128x128xf32>, vector<128x128xf32>, vector<128x128xf32> -> vector<128x128xf32>
    %10 = vector.extract_strided_slice %5 {offsets = [0, 128], sizes = [128, 128], strides = [1, 1]} : vector<128x640xf32> to vector<128x128xf32>
    %c1 = arith.constant 1 : index
    %c0_9 = arith.constant 0 : index
    %c0_10 = arith.constant 0 : index
    %11 = vector.load %arg1[%c1, %c0_9, %c0_10] : memref<4x128x128xf32, #tpu.memory_space<vmem>>, vector<1x128x128xf32>
    %12 = vector.shape_cast %11 : vector<1x128x128xf32> to vector<128x128xf32>
    %cst_11 = arith.constant dense<0.000000e+00> : vector<128x128xf32>
    %13 = tpu.matmul %12, %10, %cst_11 {dimension_numbers = #tpu.dot_dimension_numbers<[1], [0], [0], [1], [0, 0, 1, 1], [], []>} : vector<128x128xf32>, vector<128x128xf32>, vector<128x128xf32> -> vector<128x128xf32>
    %14 = arith.addf %9, %13 : vector<128x128xf32>
    %15 = vector.extract_strided_slice %5 {offsets = [0, 256], sizes = [128, 128], strides = [1, 1]} : vector<128x640xf32> to vector<128x128xf32>
    %c2 = arith.constant 2 : index
    %c0_12 = arith.constant 0 : index
    %c0_13 = arith.constant 0 : index
    %16 = vector.load %arg1[%c2, %c0_12, %c0_13] : memref<4x128x128xf32, #tpu.memory_space<vmem>>, vector<1x128x128xf32>
    %17 = vector.shape_cast %16 : vector<1x128x128xf32> to vector<128x128xf32>
    %cst_14 = arith.constant dense<0.000000e+00> : vector<128x128xf32>
    %18 = tpu.matmul %17, %15, %cst_14 {dimension_numbers = #tpu.dot_dimension_numbers<[1], [0], [0], [1], [0, 0, 1, 1], [], []>} : vector<128x128xf32>, vector<128x128xf32>, vector<128x128xf32> -> vector<128x128xf32>
    %19 = arith.addf %14, %18 : vector<128x128xf32>
    %20 = vector.extract_strided_slice %5 {offsets = [0, 384], sizes = [128, 128], strides = [1, 1]} : vector<128x640xf32> to vector<128x128xf32>
    %c3 = arith.constant 3 : index
    %c0_15 = arith.constant 0 : index
    %c0_16 = arith.constant 0 : index
    %21 = vector.load %arg1[%c3, %c0_15, %c0_16] : memref<4x128x128xf32, #tpu.memory_space<vmem>>, vector<1x128x128xf32>
    %22 = vector.shape_cast %21 : vector<1x128x128xf32> to vector<128x128xf32>
    %cst_17 = arith.constant dense<0.000000e+00> : vector<128x128xf32>
    %23 = tpu.matmul %22, %20, %cst_17 {dimension_numbers = #tpu.dot_dimension_numbers<[1], [0], [0], [1], [0, 0, 1, 1], [], []>} : vector<128x128xf32>, vector<128x128xf32>, vector<128x128xf32> -> vector<128x128xf32>
    %24 = arith.addf %19, %23 : vector<128x128xf32>
    %25 = vector.extract_strided_slice %5 {offsets = [0, 512], sizes = [128, 128], strides = [1, 1]} : vector<128x640xf32> to vector<128x128xf32>
    %26 = arith.addf %24, %25 : vector<128x128xf32>
    %27 = math.tanh %26 : vector<128x128xf32>
    %c0_18 = arith.constant 0 : index
    %c0_19 = arith.constant 0 : index
    %28 = vector.load %arg6[%c0_18, %c0_19] : memref<128x320xf32, #tpu.memory_space<vmem>>, vector<128x320xf32>
    %c0_20 = arith.constant 0 : index
    %c0_21 = arith.constant 0 : index
    %29 = vector.load %arg7[%c0_20, %c0_21] : memref<5x320xf32, #tpu.memory_space<vmem>>, vector<5x320xf32>
    %c0_22 = arith.constant 0 : index
    %c0_23 = arith.constant 0 : index
    %30 = vector.load %arg8[%c0_22, %c0_23] : memref<1x320xf32, #tpu.memory_space<vmem>>, vector<1x320xf32>
    %cst_24 = arith.constant dense<0.000000e+00> : vector<128x320xf32>
    %31 = tpu.matmul %27, %28, %cst_24 {dimension_numbers = #tpu.dot_dimension_numbers<[1], [0], [0], [1], [0, 0, 1, 1], [], []>} : vector<128x128xf32>, vector<128x320xf32>, vector<128x320xf32> -> vector<128x320xf32>
    %cst_25 = arith.constant dense<0.000000e+00> : vector<128x320xf32>
    %32 = tpu.matmul %0, %29, %cst_25 {dimension_numbers = #tpu.dot_dimension_numbers<[1], [0], [0], [1], [0, 0, 1, 1], [], []>} : vector<128x5xf32>, vector<5x320xf32>, vector<128x320xf32> -> vector<128x320xf32>
    %33 = arith.addf %31, %32 : vector<128x320xf32>
    %34 = vector.broadcast %30 : vector<1x320xf32> to vector<128x320xf32>
    %35 = arith.addf %33, %34 : vector<128x320xf32>
    %36 = vector.extract_strided_slice %35 {offsets = [0, 0], sizes = [128, 64], strides = [1, 1]} : vector<128x320xf32> to vector<128x64xf32>
    %c0_26 = arith.constant 0 : index
    %c0_27 = arith.constant 0 : index
    %c0_28 = arith.constant 0 : index
    %37 = vector.load %arg1[%c0_26, %c0_27, %c0_28] : memref<4x128x128xf32, #tpu.memory_space<vmem>>, vector<1x128x128xf32>
    %38 = vector.shape_cast %37 : vector<1x128x128xf32> to vector<128x128xf32>
    %cst_29 = arith.constant dense<0.000000e+00> : vector<128x64xf32>
    %39 = tpu.matmul %38, %36, %cst_29 {dimension_numbers = #tpu.dot_dimension_numbers<[1], [0], [0], [1], [0, 0, 1, 1], [], []>} : vector<128x128xf32>, vector<128x64xf32>, vector<128x64xf32> -> vector<128x64xf32>
    %40 = vector.extract_strided_slice %35 {offsets = [0, 64], sizes = [128, 64], strides = [1, 1]} : vector<128x320xf32> to vector<128x64xf32>
    %c1_30 = arith.constant 1 : index
    %c0_31 = arith.constant 0 : index
    %c0_32 = arith.constant 0 : index
    %41 = vector.load %arg1[%c1_30, %c0_31, %c0_32] : memref<4x128x128xf32, #tpu.memory_space<vmem>>, vector<1x128x128xf32>
    %42 = vector.shape_cast %41 : vector<1x128x128xf32> to vector<128x128xf32>
    %cst_33 = arith.constant dense<0.000000e+00> : vector<128x64xf32>
    %43 = tpu.matmul %42, %40, %cst_33 {dimension_numbers = #tpu.dot_dimension_numbers<[1], [0], [0], [1], [0, 0, 1, 1], [], []>} : vector<128x128xf32>, vector<128x64xf32>, vector<128x64xf32> -> vector<128x64xf32>
    %44 = arith.addf %39, %43 : vector<128x64xf32>
    %45 = vector.extract_strided_slice %35 {offsets = [0, 128], sizes = [128, 64], strides = [1, 1]} : vector<128x320xf32> to vector<128x64xf32>
    %c2_34 = arith.constant 2 : index
    %c0_35 = arith.constant 0 : index
    %c0_36 = arith.constant 0 : index
    %46 = vector.load %arg1[%c2_34, %c0_35, %c0_36] : memref<4x128x128xf32, #tpu.memory_space<vmem>>, vector<1x128x128xf32>
    %47 = vector.shape_cast %46 : vector<1x128x128xf32> to vector<128x128xf32>
    %cst_37 = arith.constant dense<0.000000e+00> : vector<128x64xf32>
    %48 = tpu.matmul %47, %45, %cst_37 {dimension_numbers = #tpu.dot_dimension_numbers<[1], [0], [0], [1], [0, 0, 1, 1], [], []>} : vector<128x128xf32>, vector<128x64xf32>, vector<128x64xf32> -> vector<128x64xf32>
    %49 = arith.addf %44, %48 : vector<128x64xf32>
    %50 = vector.extract_strided_slice %35 {offsets = [0, 192], sizes = [128, 64], strides = [1, 1]} : vector<128x320xf32> to vector<128x64xf32>
    %c3_38 = arith.constant 3 : index
    %c0_39 = arith.constant 0 : index
    %c0_40 = arith.constant 0 : index
    %51 = vector.load %arg1[%c3_38, %c0_39, %c0_40] : memref<4x128x128xf32, #tpu.memory_space<vmem>>, vector<1x128x128xf32>
    %52 = vector.shape_cast %51 : vector<1x128x128xf32> to vector<128x128xf32>
    %cst_41 = arith.constant dense<0.000000e+00> : vector<128x64xf32>
    %53 = tpu.matmul %52, %50, %cst_41 {dimension_numbers = #tpu.dot_dimension_numbers<[1], [0], [0], [1], [0, 0, 1, 1], [], []>} : vector<128x128xf32>, vector<128x64xf32>, vector<128x64xf32> -> vector<128x64xf32>
    %54 = arith.addf %49, %53 : vector<128x64xf32>
    %55 = vector.extract_strided_slice %35 {offsets = [0, 256], sizes = [128, 64], strides = [1, 1]} : vector<128x320xf32> to vector<128x64xf32>
    %56 = arith.addf %54, %55 : vector<128x64xf32>
    %57 = math.tanh %56 : vector<128x64xf32>
    %c0_42 = arith.constant 0 : index
    %c0_43 = arith.constant 0 : index
    %58 = vector.load %arg9[%c0_42, %c0_43] : memref<64x256xf32, #tpu.memory_space<vmem>>, vector<64x256xf32>
    %c0_44 = arith.constant 0 : index
    %c0_45 = arith.constant 0 : index
    %59 = vector.load %arg10[%c0_44, %c0_45] : memref<5x256xf32, #tpu.memory_space<vmem>>, vector<5x256xf32>
    %c0_46 = arith.constant 0 : index
    %c0_47 = arith.constant 0 : index
    %60 = vector.load %arg11[%c0_46, %c0_47] : memref<1x256xf32, #tpu.memory_space<vmem>>, vector<1x256xf32>
    %cst_48 = arith.constant dense<0.000000e+00> : vector<128x256xf32>
    %61 = tpu.matmul %57, %58, %cst_48 {dimension_numbers = #tpu.dot_dimension_numbers<[1], [0], [0], [1], [0, 0, 1, 1], [], []>} : vector<128x64xf32>, vector<64x256xf32>, vector<128x256xf32> -> vector<128x256xf32>
    %cst_49 = arith.constant dense<0.000000e+00> : vector<128x256xf32>
    %62 = tpu.matmul %0, %59, %cst_49 {dimension_numbers = #tpu.dot_dimension_numbers<[1], [0], [0], [1], [0, 0, 1, 1], [], []>} : vector<128x5xf32>, vector<5x256xf32>, vector<128x256xf32> -> vector<128x256xf32>
    %63 = arith.addf %61, %62 : vector<128x256xf32>
    %64 = vector.broadcast %60 : vector<1x256xf32> to vector<128x256xf32>
    %65 = arith.addf %63, %64 : vector<128x256xf32>
    %66 = vector.extract_strided_slice %65 {offsets = [0, 0], sizes = [128, 128], strides = [1, 1]} : vector<128x256xf32> to vector<128x128xf32>
    %cst_50 = arith.constant 0.000000e+00 : f32
    %67 = vector.broadcast %cst_50 : f32 to vector<128x128xf32>
    %68 = arith.subf %67, %66 : vector<128x128xf32>
    %69 = math.exp %68 : vector<128x128xf32>
    %cst_51 = arith.constant 1.000000e+00 : f32
    %70 = vector.broadcast %cst_51 : f32 to vector<128x128xf32>
    %71 = arith.addf %70, %69 : vector<128x128xf32>
    %cst_52 = arith.constant 1.000000e+00 : f32
    %72 = vector.broadcast %cst_52 : f32 to vector<128x128xf32>
    %73 = arith.divf %72, %71 : vector<128x128xf32>
    %74 = vector.extract_strided_slice %65 {offsets = [0, 128], sizes = [128, 128], strides = [1, 1]} : vector<128x256xf32> to vector<128x128xf32>
    %75 = math.tanh %74 : vector<128x128xf32>
    %c0_53 = arith.constant 0 : index
    %c0_54 = arith.constant 0 : index
    %76 = vector.load %arg3[%c0_53, %c0_54] : memref<8x128xf32, #tpu.memory_space<vmem>>, vector<8x128xf32>
    %77 = arith.mulf %73, %75 : vector<128x128xf32>
    %cst_55 = arith.constant dense<0.000000e+00> : vector<8x128xf32>
    %78 = tpu.matmul %76, %77, %cst_55 {dimension_numbers = #tpu.dot_dimension_numbers<[1], [0], [0], [1], [0, 0, 1, 1], [], []>} : vector<8x128xf32>, vector<128x128xf32>, vector<8x128xf32> -> vector<8x128xf32>
    %79 = math.tanh %78 : vector<8x128xf32>
    %c0_56 = arith.constant 0 : index
    %c0_57 = arith.constant 0 : index
    %80 = vector.load %arg12[%c0_56, %c0_57] : memref<128x128xf32, #tpu.memory_space<vmem>>, vector<128x128xf32>
    %c0_58 = arith.constant 0 : index
    %c0_59 = arith.constant 0 : index
    %81 = vector.load %arg13[%c0_58, %c0_59] : memref<1x128xf32, #tpu.memory_space<vmem>>, vector<1x128xf32>
    %cst_60 = arith.constant dense<0.000000e+00> : vector<8x128xf32>
    %82 = tpu.matmul %79, %80, %cst_60 {dimension_numbers = #tpu.dot_dimension_numbers<[1], [0], [0], [1], [0, 0, 1, 1], [], []>} : vector<8x128xf32>, vector<128x128xf32>, vector<8x128xf32> -> vector<8x128xf32>
    %83 = vector.broadcast %81 : vector<1x128xf32> to vector<8x128xf32>
    %84 = arith.addf %82, %83 : vector<8x128xf32>
    %85 = math.tanh %84 : vector<8x128xf32>
    %c0_61 = arith.constant 0 : index
    %c0_62 = arith.constant 0 : index
    %86 = vector.load %arg14[%c0_61, %c0_62] : memref<128x64xf32, #tpu.memory_space<vmem>>, vector<128x64xf32>
    %c0_63 = arith.constant 0 : index
    %c0_64 = arith.constant 0 : index
    %87 = vector.load %arg15[%c0_63, %c0_64] : memref<1x64xf32, #tpu.memory_space<vmem>>, vector<1x64xf32>
    %cst_65 = arith.constant dense<0.000000e+00> : vector<8x64xf32>
    %88 = tpu.matmul %85, %86, %cst_65 {dimension_numbers = #tpu.dot_dimension_numbers<[1], [0], [0], [1], [0, 0, 1, 1], [], []>} : vector<8x128xf32>, vector<128x64xf32>, vector<8x64xf32> -> vector<8x64xf32>
    %89 = vector.broadcast %87 : vector<1x64xf32> to vector<8x64xf32>
    %90 = arith.addf %88, %89 : vector<8x64xf32>
    %91 = math.tanh %90 : vector<8x64xf32>
    %c0_66 = arith.constant 0 : index
    %c0_67 = arith.constant 0 : index
    %92 = vector.load %arg19[%c0_66, %c0_67] : memref<8x64xf32, #tpu.memory_space<vmem>>, vector<8x64xf32>
    tpu.vector_store %arg19[%c0_66, %c0_67], %91 {strides = array<i32>} : memref<8x64xf32, #tpu.memory_space<vmem>>, vector<8x64xf32>,
    %c0_68 = arith.constant 0 : index
    %c0_69 = arith.constant 0 : index
    %93 = vector.load %arg16[%c0_68, %c0_69] : memref<64x1xf32, #tpu.memory_space<vmem>>, vector<64x1xf32>
    %c0_70 = arith.constant 0 : index
    %c0_71 = arith.constant 0 : index
    %94 = vector.load %arg17[%c0_70, %c0_71] : memref<1x1xf32, #tpu.memory_space<vmem>>, vector<1x1xf32>
    %cst_72 = arith.constant dense<0.000000e+00> : vector<8x1xf32>
    %95 = tpu.matmul %91, %93, %cst_72 {dimension_numbers = #tpu.dot_dimension_numbers<[1], [0], [0], [1], [0, 0, 1, 1], [], []>} : vector<8x64xf32>, vector<64x1xf32>, vector<8x1xf32> -> vector<8x1xf32>
    %96 = vector.broadcast %94 : vector<1x1xf32> to vector<8x1xf32>
    %97 = arith.addf %95, %96 : vector<8x1xf32>
    %c0_73 = arith.constant 0 : index
    %c0_74 = arith.constant 0 : index
    %98 = vector.load %arg18[%c0_73, %c0_74] : memref<8x1xf32, #tpu.memory_space<vmem>>, vector<8x1xf32>
    tpu.vector_store %arg18[%c0_73, %c0_74], %97 {strides = array<i32>} : memref<8x1xf32, #tpu.memory_space<vmem>>, vector<8x1xf32>,
    return
  }
  func.func @transform_0(%arg0: i32) -> (i32, i32, i32) {
    %c0_i32 = arith.constant 0 : i32
    %c0_i32_0 = arith.constant 0 : i32
    %c0_i32_1 = arith.constant 0 : i32
    %c0_i32_2 = arith.constant 0 : i32
    return %c0_i32, %c0_i32_0, %c0_i32_1 : i32, i32, i32
  }
  func.func @transform_1(%arg0: i32) -> (i32, i32) {
    %c0_i32 = arith.constant 0 : i32
    %c0_i32_0 = arith.constant 0 : i32
    %c0_i32_1 = arith.constant 0 : i32
    return %c0_i32, %c0_i32_0 : i32, i32
  }
  func.func @transform_2(%arg0: i32) -> (i32, i32) {
    %c0_i32 = arith.constant 0 : i32
    %c0_i32_0 = arith.constant 0 : i32
    %c0_i32_1 = arith.constant 0 : i32
    return %c0_i32, %c0_i32_0 : i32, i32
  }
  func.func @transform_3(%arg0: i32) -> (i32, i32) {
    %c0_i32 = arith.constant 0 : i32
    %c0_i32_0 = arith.constant 0 : i32
    %c0_i32_1 = arith.constant 0 : i32
    return %c0_i32, %c0_i32_0 : i32, i32
  }
  func.func @transform_4(%arg0: i32) -> (i32, i32) {
    %c0_i32 = arith.constant 0 : i32
    %c0_i32_0 = arith.constant 0 : i32
    %c0_i32_1 = arith.constant 0 : i32
    return %c0_i32, %c0_i32_0 : i32, i32
  }
  func.func @transform_5(%arg0: i32) -> (i32, i32) {
    %c0_i32 = arith.constant 0 : i32
    %c0_i32_0 = arith.constant 0 : i32
    %c0_i32_1 = arith.constant 0 : i32
    return %c0_i32, %c0_i32_0 : i32, i32
  }
  func.func @transform_6(%arg0: i32) -> (i32, i32) {
    %c0_i32 = arith.constant 0 : i32
    %c0_i32_0 = arith.constant 0 : i32
    %c0_i32_1 = arith.constant 0 : i32
    return %c0_i32, %c0_i32_0 : i32, i32
  }
  func.func @transform_7(%arg0: i32) -> (i32, i32) {
    %c0_i32 = arith.constant 0 : i32
    %c0_i32_0 = arith.constant 0 : i32
    %c0_i32_1 = arith.constant 0 : i32
    return %c0_i32, %c0_i32_0 : i32, i32
  }
  func.func @transform_8(%arg0: i32) -> (i32, i32) {
    %c0_i32 = arith.constant 0 : i32
    %c0_i32_0 = arith.constant 0 : i32
    %c0_i32_1 = arith.constant 0 : i32
    return %c0_i32, %c0_i32_0 : i32, i32
  }
  func.func @transform_9(%arg0: i32) -> (i32, i32) {
    %c0_i32 = arith.constant 0 : i32
    %c0_i32_0 = arith.constant 0 : i32
    %c0_i32_1 = arith.constant 0 : i32
    return %c0_i32, %c0_i32_0 : i32, i32
  }
  func.func @transform_10(%arg0: i32) -> (i32, i32) {
    %c0_i32 = arith.constant 0 : i32
    %c0_i32_0 = arith.constant 0 : i32
    %c0_i32_1 = arith.constant 0 : i32
    return %c0_i32, %c0_i32_0 : i32, i32
  }
  func.func @transform_11(%arg0: i32) -> (i32, i32) {
    %c0_i32 = arith.constant 0 : i32
    %c0_i32_0 = arith.constant 0 : i32
    %c0_i32_1 = arith.constant 0 : i32
    return %c0_i32, %c0_i32_0 : i32, i32
  }
  func.func @transform_12(%arg0: i32) -> (i32, i32) {
    %c0_i32 = arith.constant 0 : i32
    %c0_i32_0 = arith.constant 0 : i32
    %c0_i32_1 = arith.constant 0 : i32
    return %c0_i32, %c0_i32_0 : i32, i32
  }
  func.func @transform_13(%arg0: i32) -> (i32, i32) {
    %c0_i32 = arith.constant 0 : i32
    %c0_i32_0 = arith.constant 0 : i32
    %c0_i32_1 = arith.constant 0 : i32
    return %c0_i32, %c0_i32_0 : i32, i32
  }
  func.func @transform_14(%arg0: i32) -> (i32, i32) {
    %c0_i32 = arith.constant 0 : i32
    %c0_i32_0 = arith.constant 0 : i32
    %c0_i32_1 = arith.constant 0 : i32
    return %c0_i32, %c0_i32_0 : i32, i32
  }
  func.func @transform_15(%arg0: i32) -> (i32, i32) {
    %c0_i32 = arith.constant 0 : i32
    %c0_i32_0 = arith.constant 0 : i32
    %c0_i32_1 = arith.constant 0 : i32
    return %c0_i32, %c0_i32_0 : i32, i32
  }
  func.func @transform_16(%arg0: i32) -> (i32, i32) {
    %c0_i32 = arith.constant 0 : i32
    %c0_i32_0 = arith.constant 0 : i32
    %c0_i32_1 = arith.constant 0 : i32
    return %c0_i32, %c0_i32_0 : i32, i32
  }
  func.func @transform_17(%arg0: i32) -> (i32, i32) {
    %c0_i32 = arith.constant 0 : i32
    %c0_i32_0 = arith.constant 0 : i32
    %c0_i32_1 = arith.constant 0 : i32
    return %c0_i32, %c0_i32_0 : i32, i32
  }
  func.func @transform_18(%arg0: i32) -> (i32, i32) {
    %c0_i32 = arith.constant 0 : i32
    %c0_i32_0 = arith.constant 0 : i32
    %c0_i32_1 = arith.constant 0 : i32
    return %c0_i32, %c0_i32_0 : i32, i32
  }
}

</mosaic_0001>

<bundles_post_ra>
// kernel: discriminator_forward.1
= control target key start
LH: loop header
LB: loop body
LE: loop exit
PB: predicated region body
PF: predicated region fallthrough
CT: control target
= control target key end

     0   :  { %vm157_vm0 = vcmask 1044480   ;;  %v6014_v2 = vmov 0.0   ;;  %vm108_vm1 = vcmask 39936   ;;  %v83_v23 = vlaneseq  ;;  %s7794_s3 = inlined_call_operand.vmem [shape: f32[5,640], index: 3, kind: input, shape index: {}]   ;;  %s7795_s1 = inlined_call_operand.vmem [shape: f32[128,5], index: 1, kind: input, shape index: {}]   ;;  %s7796_s0 = inlined_call_operand.vmem [shape: f32[4,128,128], index: 0, kind: input, shape index: {}]   ;;  %s7797_s4 = inlined_call_operand.vmem [shape: f32[1,640], index: 4, kind: input, shape index: {}]   ;;  %s7798_s6 = inlined_call_operand.vmem [shape: f32[5,320], index: 6, kind: input, shape index: {}]   ;;  %s7799_s5 = inlined_call_operand.vmem [shape: f32[128,320], index: 5, kind: input, shape index: {}]   ;;  %s7800_s7 = inlined_call_operand.vmem [shape: f32[1,320], index: 7, kind: input, shape index: {}]   ;;  %s7801_s9 = inlined_call_operand.vmem [shape: f32[5,256], index: 9, kind: input, shape index: {}]   ;;  %s7802_s8 = inlined_call_operand.vmem [shape: f32[64,256], index: 8, kind: input, shape index: {}]   ;;  %s7803_s10 = inlined_call_operand.vmem [shape: f32[1,256], index: 10, kind: input, shape index: {}]   ;;  %s7804_s11 = inlined_call_operand.vmem [shape: f32[128,128], index: 11, kind: input, shape index: {}]   ;;  %s7805_s2 = inlined_call_operand.vmem [shape: f32[8,128], index: 2, kind: input, shape index: {}]   ;;  %s7806_s13 = inlined_call_operand.vmem [shape: f32[128,64], index: 13, kind: input, shape index: {}]   ;;  %s7807_s15 = inlined_call_operand.vmem [shape: f32[64,1], index: 15, kind: input, shape index: {}]   ;;  %s7808_s12 = inlined_call_operand.vmem [shape: f32[1,128], index: 12, kind: input, shape index: {}]   ;;  %s7809_s16 = inlined_call_operand.<no memory space> [shape: f32[1,1], index: 16, kind: input, shape index: {}]   ;;  %s7810_s14 = inlined_call_operand.vmem [shape: f32[1,64], index: 14, kind: input, shape index: {}]   ;;  %s7811_s18 = inlined_call_operand.vmem [shape: f32[8,64], index: 18, kind: output, shape index: {1}]   ;;  %s7812_s17 = inlined_call_operand.vmem [shape: f32[8,1], index: 17, kind: output, shape index: {0}]  }
   0x1   :  { %7816 = sst [smem:[#allocation3_spill]] %s7794_s3  ;;  %237 = vmatprep.mubr.f32.mxu0 %v6014_v2  ;;  %321 = vmatprep.mubr.f32.mxu1 %v6014_v2  ;;  %v6356_v26 = vld [vmem:[%s7797_s4] sm:$0x1f]  ;;  %vm3046_vm2 = vcmask 523264   ;;  %vm6017_vm3 = vmmov 0   ;;  %vm3776_vm4 = vcmask 7168  }
   0x2   :  { %7817 = sst [smem:[#allocation4_spill]] %s7795_s1  ;;  %s7819_s29 = sld [smem:[#allocation3_spill]]  ;;  %v6348_v24 = vshrl.u32 %v83_v23, 7 }
   0x3   :  { %7818 = sst [smem:[#allocation5_spill]] %s7796_s0  ;;  %s7820_s20 = sld [smem:[#allocation4_spill]] }
   0x4   :  { %s7821_s3 = sld [smem:[#allocation5_spill]]  ;;  %v6351_v25 = vsub.s32 0, %v6348_v24  ;;  %v6359_v27 = vsub.s32 1, %v6348_v24  ;;  %v93_v39 = vsub.s32 2, %v6348_v24  ;;  %v97_v44 = vsub.s32 3, %v6348_v24 }
   0x6   :  { %v6363_v29 = vrot.slane %v6356_v26, %v6351_v25  ;;  %v6367_v31 = vrot.slane %v6356_v26, %v6359_v27  ;;  %v6386_v53 = vrot.slane %v6356_v26, %v93_v39  ;;  %v6391_v56 = vrot.slane %v6356_v26, %v97_v44 }
   0x8   :  { %v77_v0 = vld [vmem:[%s7819_s29 + $0x8] sm:$0x1f]  ;;  %v76_v1 = vld [vmem:[%s7819_s29] sm:$0x1f]  ;;  %v79_v7 = vld [vmem:[%s7819_s29 + $0x18] sm:$0x1f] }
   0x9   :  { %v6123_v3 = vld [vmem:[%s7820_s20] sm:$0xff]  ;;  %3786 = vmatprep.subr.msk.mxu0 %vm157_vm0, %v77_v0  ;;  %5442 = vmatprep.subr.msk.mxu1 %vm157_vm0, %v77_v0  ;;  %v6136_v4 = vld [vmem:[%s7820_s20 + $0x8] sm:$0xff]  ;;  %v6141_v5 = vld [vmem:[%s7820_s20 + $0x70] sm:$0xff] }
   0xa   :  { %3787 = vmatpush1.msk.msra.mxu0 %vm157_vm0, %v76_v1  ;;  %5443 = vmatpush1.msk.msra.mxu1 %vm157_vm0, %v76_v1  ;;  %v6148_v6 = vld [vmem:[%s7820_s20 + $0x78] sm:$0xff]  ;;  %v78_v8 = vld [vmem:[%s7819_s29 + $0x10] sm:$0x1f]  ;;  %v80_v9 = vld [vmem:[%s7819_s29 + $0x20] sm:$0x1f] }
   0xb   :  { %3788 = vmatmul.mubr.msk.f32.vlgmr.msra.gmra.mrb[0].mxu0 %vm108_vm1, %v6123_v3  ;;  %3802 = vmatmul.mubr.msk.f32.vlgmr.msra.gmra.mrb[0].mxu1 %vm108_vm1, %v6141_v5  ;;  %v6167_v10 = vld [vmem:[%s7820_s20 + $0x10] sm:$0xff]  ;;  %v6181_v11 = vld [vmem:[%s7820_s20 + $0x18] sm:$0xff]  ;;  %v6192_v12 = vld [vmem:[%s7820_s20 + $0x20] sm:$0xff] }
   0xc   :  { %243 = vmatprep.mubr.f32.mxu0 %v6014_v2  ;;  %327 = vmatprep.mubr.f32.mxu1 %v6014_v2  ;;  %v6203_v13 = vld [vmem:[%s7820_s20 + $0x28] sm:$0xff]  ;;  %v6214_v14 = vld [vmem:[%s7820_s20 + $0x30] sm:$0xff]  ;;  %v6225_v15 = vld [vmem:[%s7820_s20 + $0x38] sm:$0xff] }
   0xd   :  { %3804 = vmatprep.subr.msk.mxu1 %vm157_vm0, %v79_v7  ;;  %4342 = vmatprep.subr.msk.mxu0 %vm157_vm0, %v80_v9  ;;  %v6236_v16 = vld [vmem:[%s7820_s20 + $0x40] sm:$0xff]  ;;  %v6247_v17 = vld [vmem:[%s7820_s20 + $0x48] sm:$0xff]  ;;  %v6258_v18 = vld [vmem:[%s7820_s20 + $0x50] sm:$0xff] }
   0xe   :  { %3805 = vmatpush1.msk.msra.mxu1 %vm157_vm0, %v78_v8  ;;  %4343 = vmatpush3.msk.msra.mxu0 %vm157_vm0, %v80_v9  ;;  %v6269_v19 = vld [vmem:[%s7820_s20 + $0x58] sm:$0xff]  ;;  %v6280_v20 = vld [vmem:[%s7820_s20 + $0x60] sm:$0xff]  ;;  %v6291_v21 = vld [vmem:[%s7820_s20 + $0x68] sm:$0xff] }
   0xf   :  { %3789 = vmatmul.mubr.msk.f32.gmra.mrb[2].mxu0 %vm108_vm1, %v6136_v4  ;;  %3803 = vmatmul.mubr.msk.f32.gmra.mrb[2].mxu1 %vm108_vm1, %v6148_v6  ;;  %v3839_v22 = vld [vmem:[%s7821_s3 + $0x80] sm:$0xff] }
  0x10   :  { %249 = vmatprep.mubr.f32.mxu0 %v6014_v2  ;;  %398 = vmatprep.mubr.f32.mxu1 %v6014_v2 }
  0x13   :  { %3790 = vmatmul.mubr.msk.f32.gmra.mrb[4].mxu0 %vm108_vm1, %v6167_v10  ;;  %3806 = vmatmul.mubr.msk.f32.vlgmr.msra.gmra.mrb[4].mxu1 %vm108_vm1, %v6123_v3 }
  0x14   :  { %255 = vmatprep.mubr.f32.mxu0 %v6014_v2  ;;  %404 = vmatprep.mubr.f32.mxu1 %v6014_v2 }
  0x17   :  { %3791 = vmatmul.mubr.msk.f32.gmra.mrb[6].mxu0 %vm108_vm1, %v6181_v11  ;;  %3807 = vmatmul.mubr.msk.f32.gmra.mrb[6].mxu1 %vm108_vm1, %v6136_v4 }
  0x18   :  { %261 = vmatprep.mubr.f32.mxu0 %v6014_v2  ;;  %410 = vmatprep.mubr.f32.mxu1 %v6014_v2 }
  0x1b   :  { %3792 = vmatmul.mubr.msk.f32.gmra.mrb[8].mxu0 %vm108_vm1, %v6192_v12  ;;  %3808 = vmatmul.mubr.msk.f32.gmra.mrb[8].mxu1 %vm108_vm1, %v6167_v10 }
  0x1c   :  { %267 = vmatprep.mubr.f32.mxu0 %v6014_v2  ;;  %416 = vmatprep.mubr.f32.mxu1 %v6014_v2 }
  0x1f   :  { %3793 = vmatmul.mubr.msk.f32.gmra.mrb[10].mxu0 %vm108_vm1, %v6203_v13  ;;  %3809 = vmatmul.mubr.msk.f32.gmra.mrb[10].mxu1 %vm108_vm1, %v6181_v11 }
  0x20   :  { %273 = vmatprep.mubr.f32.mxu0 %v6014_v2  ;;  %422 = vmatprep.mubr.f32.mxu1 %v6014_v2 }
  0x23   :  { %3794 = vmatmul.mubr.msk.f32.gmra.mrb[12].mxu0 %vm108_vm1, %v6214_v14  ;;  %3810 = vmatmul.mubr.msk.f32.gmra.mrb[12].mxu1 %vm108_vm1, %v6192_v12 }
  0x24   :  { %279 = vmatprep.mubr.f32.mxu0 %v6014_v2  ;;  %428 = vmatprep.mubr.f32.mxu1 %v6014_v2 }
  0x27   :  { %3795 = vmatmul.mubr.msk.f32.gmra.mrb[14].mxu0 %vm108_vm1, %v6225_v15  ;;  %3811 = vmatmul.mubr.msk.f32.gmra.mrb[14].mxu1 %vm108_vm1, %v6203_v13 }
  0x28   :  { %285 = vmatprep.mubr.f32.mxu0 %v6014_v2  ;;  %434 = vmatprep.mubr.f32.mxu1 %v6014_v2 }
  0x2b   :  { %3796 = vmatmul.mubr.msk.f32.gmra.mrb[16].mxu0 %vm108_vm1, %v6236_v16  ;;  %3812 = vmatmul.mubr.msk.f32.gmra.mrb[16].mxu1 %vm108_vm1, %v6214_v14 }
  0x2c   :  { %291 = vmatprep.mubr.f32.mxu0 %v6014_v2  ;;  %440 = vmatprep.mubr.f32.mxu1 %v6014_v2 }
  0x2f   :  { %3797 = vmatmul.mubr.msk.f32.gmra.mrb[18].mxu0 %vm108_vm1, %v6247_v17  ;;  %3813 = vmatmul.mubr.msk.f32.gmra.mrb[18].mxu1 %vm108_vm1, %v6225_v15 }
  0x30   :  { %297 = vmatprep.mubr.f32.mxu0 %v6014_v2  ;;  %446 = vmatprep.mubr.f32.mxu1 %v6014_v2 }
  0x33   :  { %3798 = vmatmul.mubr.msk.f32.gmra.mrb[20].mxu0 %vm108_vm1, %v6258_v18  ;;  %3814 = vmatmul.mubr.msk.f32.gmra.mrb[20].mxu1 %vm108_vm1, %v6236_v16 }
  0x34   :  { %303 = vmatprep.mubr.f32.mxu0 %v6014_v2  ;;  %452 = vmatprep.mubr.f32.mxu1 %v6014_v2 }
  0x37   :  { %3799 = vmatmul.mubr.msk.f32.gmra.mrb[22].mxu0 %vm108_vm1, %v6269_v19  ;;  %3815 = vmatmul.mubr.msk.f32.gmra.mrb[22].mxu1 %vm108_vm1, %v6247_v17 }
  0x38   :  { %309 = vmatprep.mubr.f32.mxu0 %v6014_v2  ;;  %458 = vmatprep.mubr.f32.mxu1 %v6014_v2 }
  0x3b   :  { %3800 = vmatmul.mubr.msk.f32.gmra.mrb[24].mxu0 %vm108_vm1, %v6280_v20  ;;  %3816 = vmatmul.mubr.msk.f32.gmra.mrb[24].mxu1 %vm108_vm1, %v6258_v18 }
  0x3c   :  { %315 = vmatprep.mubr.f32.mxu0 %v6014_v2  ;;  %464 = vmatprep.mubr.f32.mxu1 %v6014_v2 }
  0x3f   :  { %3801 = vmatmul.mubr.msk.f32.gmra.mrb[26].mxu0 %vm108_vm1, %v6291_v21  ;;  %3817 = vmatmul.mubr.msk.f32.gmra.mrb[26].mxu1 %vm108_vm1, %v6269_v19 }
  0x40   :  { %4344 = vmatprep.mubr.msk.f32.mxu0 %vm108_vm1, %v6123_v3  ;;  %470 = vmatprep.mubr.f32.mxu1 %v6014_v2 }
  0x43   :  { %4345 = vmatmul.mubr.msk.f32.vlgmr.msra.gmra.mrb[28].mxu0 %vm108_vm1, %v6136_v4  ;;  %3818 = vmatmul.mubr.msk.f32.gmra.mrb[28].mxu1 %vm108_vm1, %v6280_v20 }
  0x44   :  { %4347 = vmatprep.mubr.msk.f32.mxu0 %vm108_vm1, %v6167_v10  ;;  %476 = vmatprep.mubr.f32.mxu1 %v6014_v2 }
  0x47   :  { %4348 = vmatmul.mubr.msk.f32.gmra.mrb[30].mxu0 %vm108_vm1, %v6181_v11  ;;  %3819 = vmatmul.mubr.msk.f32.gmra.mrb[30].mxu1 %vm108_vm1, %v6291_v21 }
  0x48   :  { %4350 = vmatprep.mubr.msk.f32.mxu0 %vm108_vm1, %v6192_v12  ;;  %482 = vmatprep.mubr.f32.mxu1 %v6014_v2 }
  0x4b   :  { %4351 = vmatmul.mubr.msk.f32.gmra.mrb[32].mxu0 %vm108_vm1, %v6203_v13  ;;  %3820 = vmatmul.mubr.msk.f32.gmra.mrb[32].mxu1 %vm108_vm1, %v6141_v5 }
  0x4c   :  { %4353 = vmatprep.mubr.msk.f32.mxu0 %vm108_vm1, %v6214_v14  ;;  %488 = vmatprep.mubr.f32.mxu1 %v6014_v2 }
  0x4f   :  { %4354 = vmatmul.mubr.msk.f32.gmra.mrb[34].mxu0 %vm108_vm1, %v6225_v15  ;;  %3821 = vmatmul.mubr.msk.f32.gmra.mrb[34].mxu1 %vm108_vm1, %v6148_v6 }
  0x50   :  { %4356 = vmatprep.mubr.msk.f32.mxu0 %vm108_vm1, %v6236_v16  ;;  %1476 = vmatprep.mubr.f32.mxu1 %v6014_v2 }
  0x53   :  { %4357 = vmatmul.mubr.msk.f32.gmra.mrb[36].mxu0 %vm108_vm1, %v6247_v17 }
  0x54   :  { %4359 = vmatprep.mubr.msk.f32.mxu0 %vm108_vm1, %v6258_v18 }
  0x57   :  { %4360 = vmatmul.mubr.msk.f32.gmra.mrb[38].mxu0 %vm108_vm1, %v6269_v19 }
  0x58   :  { %4362 = vmatprep.mubr.msk.f32.mxu0 %vm108_vm1, %v6280_v20 }
  0x5b   :  { %4363 = vmatmul.mubr.msk.f32.gmra.mrb[40].mxu0 %vm108_vm1, %v6291_v21 }
  0x5c   :  { %4365 = vmatprep.mubr.msk.f32.mxu0 %vm108_vm1, %v6141_v5 }
  0x5f   :  { %4366 = vmatmul.mubr.msk.f32.gmra.mrb[42].mxu0 %vm108_vm1, %v6148_v6 }
  0x60   :  { %4400 = vmatprep.mubr.f32.mxu0 %v3839_v22 }
  0xde   :  { %v239_v28 = vpop.f32.mrb[0].mxu0  ;;  %v323_v32 = vpop.f32.mrb[0].mxu1 }
  0xdf   :  { %v241_v30 = vpop.f32.mrb[1].mxu0  ;;  %v325_v33 = vpop.f32.mrb[1].mxu1  ;;  %v240_v35 = vadd.f32 %v239_v28, %v6363_v29  ;;  %v324_v38 = vadd.f32 %v323_v32, %v6363_v29 }
  0xe0   :  { %v242_v40 = vadd.f32 %v241_v30, %v6367_v31  ;;  %v326_v42 = vadd.f32 %v325_v33, %v6367_v31 }
  0xe2   :  { %v245_v34 = vpop.f32.mrb[2].mxu0  ;;  %v329_v43 = vpop.f32.mrb[2].mxu1 }
  0xe3   :  { %v246_v36 = vadd.f32 %v245_v34, %v6363_v29  ;;  %v247_v37 = vpop.f32.mrb[3].mxu0  ;;  %v330_v46 = vadd.f32 %v329_v43, %v6363_v29  ;;  %v331_v47 = vpop.f32.mrb[3].mxu1 }
  0xe4   :  { %v248_v41 = vadd.f32 %v247_v37, %v6367_v31  ;;  %v332_v50 = vadd.f32 %v331_v47, %v6367_v31 }
  0xe5   :  { %v6377_v45 = vpack.c.bf16 %v246_v36, %v240_v35  ;;  %v6381_v52 = vpack.c.bf16 %v330_v46, %v324_v38 }
  0xe6   :  { %v5022_v48 = vpack.c.bf16 %v248_v41, %v242_v40  ;;  %v251_v49 = vpop.f32.mrb[4].mxu0  ;;  %v6388_v54 = vpack.c.bf16 %v332_v50, %v326_v42  ;;  %v400_v55 = vpop.f32.mrb[4].mxu1 }
  0xe7   :  { %v253_v51 = vpop.f32.mrb[5].mxu0  ;;  %v402_v57 = vpop.f32.mrb[5].mxu1  ;;  %v252_v59 = vadd.f32 %v251_v49, %v6363_v29  ;;  %v401_v62 = vadd.f32 %v400_v55, %v6386_v53 }
  0xe8   :  { %5023 = vmatprep.subr.bf16.mxu0 %v5022_v48  ;;  %v254_v63 = vadd.f32 %v253_v51, %v6367_v31  ;;  %v403_v1 = vadd.f32 %v402_v57, %v6391_v56 }
  0xe9   :  { %5025 = vmatpush3.bf16.msra.mxu0 %v5022_v48 }
  0xea   :  { %v257_v58 = vpop.f32.mrb[6].mxu0  ;;  %v406_v7 = vpop.f32.mrb[6].mxu1 }
  0xeb   :  { %v258_v60 = vadd.f32 %v257_v58, %v6363_v29  ;;  %v259_v61 = vpop.f32.mrb[7].mxu0  ;;  %v407_v9 = vadd.f32 %v406_v7, %v6386_v53  ;;  %v408_v22 = vpop.f32.mrb[7].mxu1 }
  0xec   :  { %v260_v0 = vadd.f32 %v259_v61, %v6367_v31  ;;  %v409_v30 = vadd.f32 %v408_v22, %v6391_v56 }
  0xed   :  { %v6399_v8 = vpack.c.bf16 %v258_v60, %v252_v59  ;;  %v6403_v33 = vpack.c.bf16 %v407_v9, %v401_v62 }
  0xee   :  { %v5026_v23 = vpack.c.bf16 %v260_v0, %v254_v63  ;;  %v263_v28 = vpop.f32.mrb[8].mxu0  ;;  %v6405_v34 = vpack.c.bf16 %v409_v30, %v403_v1  ;;  %v412_v35 = vpop.f32.mrb[8].mxu1 }
  0xef   :  { %v265_v32 = vpop.f32.mrb[9].mxu0  ;;  %v414_v36 = vpop.f32.mrb[9].mxu1  ;;  %v264_v38 = vadd.f32 %v263_v28, %v6363_v29  ;;  %v413_v42 = vadd.f32 %v412_v35, %v6386_v53 }
  0xf0   :  { %5027 = vmatprep.subr.bf16.mxu0 %v5026_v23  ;;  %v266_v43 = vadd.f32 %v265_v32, %v6367_v31  ;;  %v415_v46 = vadd.f32 %v414_v36, %v6391_v56 }
  0xf1   :  { %5029 = vmatpush3.bf16.msra.mxu0 %v5026_v23 }
  0xf2   :  { %v269_v37 = vpop.f32.mrb[10].mxu0  ;;  %v418_v47 = vpop.f32.mrb[10].mxu1 }
  0xf3   :  { %v270_v40 = vadd.f32 %v269_v37, %v6363_v29  ;;  %v271_v41 = vpop.f32.mrb[11].mxu0  ;;  %v419_v49 = vadd.f32 %v418_v47, %v6386_v53  ;;  %v420_v50 = vpop.f32.mrb[11].mxu1 }
  0xf4   :  { %v272_v44 = vadd.f32 %v271_v41, %v6367_v31  ;;  %v421_v57 = vadd.f32 %v420_v50, %v6391_v56 }
  0xf5   :  { %v6413_v48 = vpack.c.bf16 %v270_v40, %v264_v38  ;;  %v6417_v59 = vpack.c.bf16 %v419_v49, %v413_v42 }
  0xf6   :  { %v5030_v51 = vpack.c.bf16 %v272_v44, %v266_v43  ;;  %v275_v55 = vpop.f32.mrb[12].mxu0  ;;  %v6419_v60 = vpack.c.bf16 %v421_v57, %v415_v46  ;;  %v424_v61 = vpop.f32.mrb[12].mxu1 }
  0xf7   :  { %v277_v58 = vpop.f32.mrb[13].mxu0  ;;  %v426_v62 = vpop.f32.mrb[13].mxu1  ;;  %v276_v0 = vadd.f32 %v275_v55, %v6363_v29  ;;  %v425_v9 = vadd.f32 %v424_v61, %v6386_v53 }
  0xf8   :  { %5031 = vmatprep.subr.bf16.mxu0 %v5030_v51  ;;  %v278_v22 = vadd.f32 %v277_v58, %v6367_v31  ;;  %v427_v28 = vadd.f32 %v426_v62, %v6391_v56 }
  0xf9   :  { %5033 = vmatpush3.bf16.msra.mxu0 %v5030_v51 }
  0xfa   :  { %v281_v63 = vpop.f32.mrb[14].mxu0  ;;  %v430_v30 = vpop.f32.mrb[14].mxu1 }
  0xfb   :  { %v282_v1 = vadd.f32 %v281_v63, %v6363_v29  ;;  %v283_v7 = vpop.f32.mrb[15].mxu0  ;;  %v431_v35 = vadd.f32 %v430_v30, %v6386_v53  ;;  %v432_v36 = vpop.f32.mrb[15].mxu1 }
  0xfc   :  { %v284_v23 = vadd.f32 %v283_v7, %v6367_v31  ;;  %v433_v40 = vadd.f32 %v432_v36, %v6391_v56 }
  0xfd   :  { %v6427_v32 = vpack.c.bf16 %v282_v1, %v276_v0  ;;  %v6431_v42 = vpack.c.bf16 %v431_v35, %v425_v9 }
  0xfe   :  { %v5034_v37 = vpack.c.bf16 %v284_v23, %v278_v22  ;;  %v287_v38 = vpop.f32.mrb[16].mxu0  ;;  %v6433_v43 = vpack.c.bf16 %v433_v40, %v427_v28  ;;  %v436_v44 = vpop.f32.mrb[16].mxu1 }
  0xff   :  { %v289_v41 = vpop.f32.mrb[17].mxu0  ;;  %v438_v46 = vpop.f32.mrb[17].mxu1  ;;  %v288_v49 = vadd.f32 %v287_v38, %v6363_v29  ;;  %v437_v55 = vadd.f32 %v436_v44, %v6386_v53 }
 0x100   :  { %5035 = vmatprep.subr.bf16.mxu0 %v5034_v37  ;;  %v290_v57 = vadd.f32 %v289_v41, %v6367_v31  ;;  %v439_v61 = vadd.f32 %v438_v46, %v6391_v56 }
 0x101   :  { %5037 = vmatpush3.bf16.msra.mxu0 %v5034_v37 }
 0x102   :  { %v293_v47 = vpop.f32.mrb[18].mxu0  ;;  %v442_v62 = vpop.f32.mrb[18].mxu1 }
 0x103   :  { %v294_v50 = vadd.f32 %v293_v47, %v6363_v29  ;;  %v295_v51 = vpop.f32.mrb[19].mxu0  ;;  %v443_v0 = vadd.f32 %v442_v62, %v6386_v53  ;;  %v444_v1 = vpop.f32.mrb[19].mxu1 }
 0x104   :  { %v296_v58 = vadd.f32 %v295_v51, %v6367_v31  ;;  %v445_v22 = vadd.f32 %v444_v1, %v6391_v56 }
 0x105   :  { %v6441_v63 = vpack.c.bf16 %v294_v50, %v288_v49  ;;  %v6445_v28 = vpack.c.bf16 %v443_v0, %v437_v55 }
 0x106   :  { %v5038_v7 = vpack.c.bf16 %v296_v58, %v290_v57  ;;  %v299_v9 = vpop.f32.mrb[20].mxu0  ;;  %v6447_v30 = vpack.c.bf16 %v445_v22, %v439_v61  ;;  %v448_v35 = vpop.f32.mrb[20].mxu1 }
 0x107   :  { %v301_v23 = vpop.f32.mrb[21].mxu0  ;;  %v450_v36 = vpop.f32.mrb[21].mxu1  ;;  %v300_v38 = vadd.f32 %v299_v9, %v6363_v29  ;;  %v449_v44 = vadd.f32 %v448_v35, %v6386_v53 }
 0x108   :  { %5039 = vmatprep.subr.bf16.mxu0 %v5038_v7  ;;  %v302_v46 = vadd.f32 %v301_v23, %v6367_v31  ;;  %v451_v49 = vadd.f32 %v450_v36, %v6391_v56 }
 0x109   :  { %5041 = vmatpush3.bf16.msra.mxu0 %v5038_v7 }
 0x10a   :  { %v305_v37 = vpop.f32.mrb[22].mxu0  ;;  %v454_v50 = vpop.f32.mrb[22].mxu1 }
 0x10b   :  { %v306_v40 = vadd.f32 %v305_v37, %v6363_v29  ;;  %v307_v41 = vpop.f32.mrb[23].mxu0  ;;  %v455_v55 = vadd.f32 %v454_v50, %v6386_v53  ;;  %v456_v57 = vpop.f32.mrb[23].mxu1 }
 0x10c   :  { %v308_v47 = vadd.f32 %v307_v41, %v6367_v31  ;;  %v457_v62 = vadd.f32 %v456_v57, %v6391_v56 }
 0x10d   :  { %v6455_v51 = vpack.c.bf16 %v306_v40, %v300_v38  ;;  %v6459_v1 = vpack.c.bf16 %v455_v55, %v449_v44 }
 0x10e   :  { %v5042_v58 = vpack.c.bf16 %v308_v47, %v302_v46  ;;  %v311_v61 = vpop.f32.mrb[24].mxu0  ;;  %v6461_v7 = vpack.c.bf16 %v457_v62, %v451_v49  ;;  %v460_v9 = vpop.f32.mrb[24].mxu1 }
 0x10f   :  { %v313_v0 = vpop.f32.mrb[25].mxu0  ;;  %v462_v22 = vpop.f32.mrb[25].mxu1  ;;  %v312_v35 = vadd.f32 %v311_v61, %v6363_v29  ;;  %v461_v38 = vadd.f32 %v460_v9, %v6386_v53 }
 0x110   :  { %5043 = vmatprep.subr.bf16.mxu0 %v5042_v58  ;;  %v314_v40 = vadd.f32 %v313_v0, %v6367_v31  ;;  %v463_v44 = vadd.f32 %v462_v22, %v6391_v56  ;;  %v3840_v22 = vld [vmem:[%s7821_s3 + $0x88] sm:$0xff] }
 0x111   :  { %5045 = vmatpush3.bf16.msra.mxu0 %v5042_v58 }
 0x112   :  { %v317_v23 = vpop.f32.mrb[26].mxu0  ;;  %v466_v46 = vpop.f32.mrb[26].mxu1 }
 0x113   :  { %v318_v36 = vadd.f32 %v317_v23, %v6363_v29  ;;  %v319_v37 = vpop.f32.mrb[27].mxu0  ;;  %v467_v49 = vadd.f32 %v466_v46, %v6386_v53  ;;  %v468_v50 = vpop.f32.mrb[27].mxu1  ;;  %v1401_v46 = vld [vmem:[%s7798_s6 + $0x10] sm:$0x1f] }
 0x114   :  { %v320_v41 = vadd.f32 %v319_v37, %v6367_v31  ;;  %v469_v57 = vadd.f32 %v468_v50, %v6391_v56  ;;  %v1399_v37 = vld [vmem:[%s7798_s6] sm:$0x1f] }
 0x115   :  { %v6469_v47 = vpack.c.bf16 %v318_v36, %v312_v35  ;;  %v6473_v58 = vpack.c.bf16 %v467_v49, %v461_v38  ;;  %v1400_v36 = vld [vmem:[%s7798_s6 + $0x8] sm:$0x1f]  ;;  %v1355_v50 = vld [vmem:[%s7799_s5 + $0x20] sm:$0xff] }
 0x116   :  { %v5046_v55 = vpack.c.bf16 %v320_v41, %v314_v40  ;;  %v6475_v29 = vpack.c.bf16 %v469_v57, %v463_v44  ;;  %v472_v61 = vpop.f32.mrb[28].mxu1  ;;  %3887 = vmatprep.subr.msk.mxu1 %vm157_vm0, %v1400_v36  ;;  %v1352_v49 = vld [vmem:[%s7799_s5 + $0x8] sm:$0xff] }
 0x117   :  { %v474_v62 = vpop.f32.mrb[29].mxu1  ;;  %v473_v31 = vadd.f32 %v472_v61, %v6386_v53  ;;  %3888 = vmatpush1.msk.msra.mxu1 %vm157_vm0, %v1399_v37  ;;  %v3843_v61 = vld [vmem:[%s7821_s3 + $0xa0] sm:$0xff] }
 0x118   :  { %5047 = vmatprep.subr.bf16.mxu0 %v5046_v55  ;;  %v475_v0 = vadd.f32 %v474_v62, %v6391_v56  ;;  %3889 = vmatmul.mubr.msk.f32.vlgmr.msra.gmra.mrb[36].mxu1 %vm108_vm1, %v6123_v3 }
 0x119   :  { %5049 = vmatpush3.bf16.msra.mxu0 %v5046_v55  ;;  %v3842_v55 = vld [vmem:[%s7821_s3 + $0x98] sm:$0xff]  ;;  %1482 = vmatprep.mubr.f32.mxu1 %v6014_v2 }
 0x11a   :  { %5051 = vmatprep.subr.bf16.mxu0 %v6388_v54  ;;  %v478_v9 = vpop.f32.mrb[30].mxu1  ;;  %4592 = vmatprep.subr.msk.mxu1 %vm157_vm0, %v1401_v46 }
 0x11b   :  { %v479_v23 = vadd.f32 %v478_v9, %v6386_v53  ;;  %v480_v35 = vpop.f32.mrb[31].mxu1  ;;  %v3844_v9 = vld [vmem:[%s7821_s3 + $0xa8] sm:$0xff]  ;;  %4593 = vmatpush3.msk.msra.mxu1 %vm157_vm0, %v1401_v46  ;;  %v640_v46 = vld [vmem:[%s7821_s3] sm:$0xff] }
 0x11c   :  { %v481_v38 = vadd.f32 %v480_v35, %v6391_v56  ;;  %3890 = vmatmul.mubr.msk.f32.gmra.mrb[38].mxu1 %vm108_vm1, %v6136_v4  ;;  %v3845_v35 = vld [vmem:[%s7821_s3 + $0xb0] sm:$0xff] }
 0x11d   :  { %5053 = vmatpush3.bf16.msra.mxu0 %v6388_v54  ;;  %v3841_v54 = vld [vmem:[%s7821_s3 + $0x90] sm:$0xff]  ;;  %v6497_v40 = vpack.c.bf16 %v479_v23, %v473_v31  ;;  %v5150_v31 = vpack.c.bf16 %v1355_v50, %v1352_v49  ;;  %1488 = vmatprep.mubr.f32.mxu1 %v6014_v2  ;;  %v644_v50 = vld [vmem:[%s7821_s3 + $0x20] sm:$0xff] }
 0x11e   :  { %5055 = vmatprep.subr.bf16.mxu0 %v6377_v45  ;;  %v6500_v41 = vpack.c.bf16 %v481_v38, %v475_v0  ;;  %v484_v44 = vpop.f32.mrb[32].mxu1  ;;  %v3851_v38 = vld [vmem:[%s7821_s3 + $0xe0] sm:$0xff]  ;;  %v642_v49 = vld [vmem:[%s7821_s3 + $0x10] sm:$0xff] }
 0x11f   :  { %v486_v57 = vpop.f32.mrb[33].mxu1  ;;  %v485_v62 = vadd.f32 %v484_v44, %v6386_v53  ;;  %5151 = vmatprep.subr.bf16.mxu1 %v5150_v31  ;;  %v3853_v44 = vld [vmem:[%s7821_s3 + $0xf0] sm:$0xff] }
 0x120   :  { %4401 = vmatmul.mubr.f32.vlgmr.msra.gmra.mrb[28].mxu0 %v3840_v22  ;;  %3891 = vmatmul.mubr.msk.f32.gmra.mrb[40].mxu1 %vm108_vm1, %v6167_v10  ;;  %v654_v31 = vld [vmem:[%s7821_s3 + $0x70] sm:$0xff] }
 0x121   :  { %5057 = vmatpush3.bf16.msra.mxu0 %v6377_v45  ;;  %4403 = vmatprep.mubr.f32.mxu0 %v3841_v54  ;;  %v487_v45 = vadd.f32 %v486_v57, %v6391_v56  ;;  %v3849_v54 = vld [vmem:[%s7821_s3 + $0xd0] sm:$0xff]  ;;  %v648_v57 = vld [vmem:[%s7821_s3 + $0x40] sm:$0xff] }
 0x122   :  { %5059 = vmatprep.subr.bf16.mxu0 %v6399_v8  ;;  %v490_v0 = vpop.f32.mrb[34].mxu1  ;;  %1494 = vmatprep.mubr.f32.mxu1 %v6014_v2 }
 0x123   :  { %v491_v22 = vadd.f32 %v490_v0, %v6386_v53  ;;  %v492_v23 = vpop.f32.mrb[35].mxu1  ;;  %v3846_v53 = vld [vmem:[%s7821_s3 + $0xb8] sm:$0xff]  ;;  %v1351_v0 = vld [vmem:[%s7799_s5] sm:$0xff] }
 0x124   :  { %4404 = vmatmul.mubr.f32.gmra.mrb[30].mxu0 %v3842_v55  ;;  %v493_v36 = vadd.f32 %v492_v23, %v6391_v56  ;;  %v3847_v56 = vld [vmem:[%s7821_s3 + $0xc0] sm:$0xff]  ;;  %3892 = vmatmul.mubr.msk.f32.gmra.mrb[42].mxu1 %vm108_vm1, %v6181_v11  ;;  %v646_v55 = vld [vmem:[%s7821_s3 + $0x30] sm:$0xff] }
 0x125   :  { %5061 = vmatpush3.bf16.msra.mxu0 %v6399_v8  ;;  %4406 = vmatprep.mubr.f32.mxu0 %v3843_v61  ;;  %v6538_v37 = vpack.c.bf16 %v491_v22, %v485_v62  ;;  %v650_v61 = vld [vmem:[%s7821_s3 + $0x50] sm:$0xff]  ;;  %v652_v62 = vld [vmem:[%s7821_s3 + $0x60] sm:$0xff]  ;;  %v3856_v22 = vld [vmem:[%s7821_s3 + $0x108] sm:$0xff] }
 0x126   :  { %5063 = vmatprep.subr.bf16.mxu0 %v6413_v48  ;;  %v6541_v8 = vpack.c.bf16 %v493_v36, %v487_v45  ;;  %1500 = vmatprep.mubr.f32.mxu1 %v6014_v2  ;;  %v3855_v45 = vld [vmem:[%s7821_s3 + $0x100] sm:$0xff]  ;;  %v1357_v36 = vld [vmem:[%s7799_s5 + $0x30] sm:$0xff] }
 0x128   :  { %4407 = vmatmul.mubr.f32.gmra.mrb[32].mxu0 %v3844_v9  ;;  %3893 = vmatmul.mubr.msk.f32.gmra.mrb[44].mxu1 %vm108_vm1, %v6192_v12  ;;  %v1361_v9 = vld [vmem:[%s7799_s5 + $0x50] sm:$0xff] }
 0x129   :  { %5065 = vmatpush3.bf16.msra.mxu0 %v6413_v48  ;;  %4409 = vmatprep.mubr.f32.mxu0 %v3845_v35  ;;  %v3848_v48 = vld [vmem:[%s7821_s3 + $0xc8] sm:$0xff] }
 0x12a   :  { %5067 = vmatprep.subr.bf16.mxu0 %v6427_v32  ;;  %1506 = vmatprep.mubr.f32.mxu1 %v6014_v2 }
 0x12c   :  { %4410 = vmatmul.mubr.f32.gmra.mrb[34].mxu0 %v3846_v53  ;;  %3894 = vmatmul.mubr.msk.f32.gmra.mrb[46].mxu1 %vm108_vm1, %v6203_v13  ;;  %v1364_v53 = vld [vmem:[%s7799_s5 + $0x68] sm:$0xff] }
 0x12d   :  { %5069 = vmatpush3.bf16.msra.mxu0 %v6427_v32  ;;  %4412 = vmatprep.mubr.f32.mxu0 %v3847_v56  ;;  %v3850_v32 = vld [vmem:[%s7821_s3 + $0xd8] sm:$0xff] }
 0x12e   :  { %5071 = vmatprep.subr.bf16.mxu0 %v6441_v63  ;;  %1512 = vmatprep.mubr.f32.mxu1 %v6014_v2  ;;  %v3858_v56 = vld [vmem:[%s7821_s3 + $0x118] sm:$0xff] }
 0x130   :  { %4413 = vmatmul.mubr.f32.gmra.mrb[36].mxu0 %v3848_v48  ;;  %3895 = vmatmul.mubr.msk.f32.gmra.mrb[48].mxu1 %vm108_vm1, %v6214_v14 }
 0x131   :  { %5073 = vmatpush3.bf16.msra.mxu0 %v6441_v63  ;;  %4415 = vmatprep.mubr.f32.mxu0 %v3849_v54  ;;  %v3852_v63 = vld [vmem:[%s7821_s3 + $0xe8] sm:$0xff] }
 0x132   :  { %5075 = vmatprep.subr.bf16.mxu0 %v6455_v51  ;;  %1518 = vmatprep.mubr.f32.mxu1 %v6014_v2 }
 0x134   :  { %4416 = vmatmul.mubr.f32.gmra.mrb[38].mxu0 %v3850_v32  ;;  %3896 = vmatmul.mubr.msk.f32.gmra.mrb[50].mxu1 %vm108_vm1, %v6225_v15  ;;  %v1366_v32 = vld [vmem:[%s7799_s5 + $0x78] sm:$0xff] }
 0x135   :  { %5077 = vmatpush3.bf16.msra.mxu0 %v6455_v51  ;;  %4418 = vmatprep.mubr.f32.mxu0 %v3851_v38  ;;  %v3854_v51 = vld [vmem:[%s7821_s3 + $0xf8] sm:$0xff] }
 0x136   :  { %5079 = vmatprep.subr.bf16.mxu0 %v6469_v47  ;;  %1524 = vmatprep.mubr.f32.mxu1 %v6014_v2  ;;  %v1370_v38 = vld [vmem:[%s7799_s5 + $0x98] sm:$0xff] }
 0x138   :  { %4419 = vmatmul.mubr.f32.gmra.mrb[40].mxu0 %v3852_v63  ;;  %3897 = vmatmul.mubr.msk.f32.gmra.mrb[52].mxu1 %vm108_vm1, %v6236_v16  ;;  %v3860_v63 = vld [vmem:[%s7821_s3 + $0x128] sm:$0xff] }
 0x139   :  { %5081 = vmatpush3.bf16.msra.mxu0 %v6469_v47  ;;  %4421 = vmatprep.mubr.f32.mxu0 %v3853_v44  ;;  %v641_v47 = vld [vmem:[%s7821_s3 + $0x8] sm:$0xff] }
 0x13a   :  { %5083 = vmatprep.subr.bf16.mxu0 %v6381_v52  ;;  %1530 = vmatprep.mubr.f32.mxu1 %v6014_v2 }
 0x13c   :  { %4422 = vmatmul.mubr.f32.gmra.mrb[42].mxu0 %v3854_v51  ;;  %3898 = vmatmul.mubr.msk.f32.gmra.mrb[54].mxu1 %vm108_vm1, %v6247_v17 }
 0x13d   :  { %5085 = vmatpush3.bf16.msra.mxu0 %v6381_v52  ;;  %4456 = vmatprep.mubr.f32.mxu0 %v640_v46  ;;  %v643_v52 = vld [vmem:[%s7821_s3 + $0x18] sm:$0xff]  ;;  %v1372_v46 = vld [vmem:[%s7799_s5 + $0xa8] sm:$0xff] }
 0x13e   :  { %5087 = vmatprep.subr.bf16.mxu0 %v6403_v33  ;;  %1536 = vmatprep.mubr.f32.mxu1 %v6014_v2 }
 0x140   :  { %4457 = vmatmul.mubr.f32.vlgmr.msra.gmra.mrb[28].mxu0 %v641_v47  ;;  %3899 = vmatmul.mubr.msk.f32.gmra.mrb[56].mxu1 %vm108_vm1, %v6258_v18  ;;  %v1376_v47 = vld [vmem:[%s7799_s5 + $0xc8] sm:$0xff] }
 0x141   :  { %5089 = vmatpush3.bf16.msra.mxu0 %v6403_v33  ;;  %4459 = vmatprep.mubr.f32.mxu0 %v642_v49  ;;  %v645_v33 = vld [vmem:[%s7821_s3 + $0x28] sm:$0xff]  ;;  %v3862_v49 = vld [vmem:[%s7821_s3 + $0x138] sm:$0xff] }
 0x142   :  { %5091 = vmatprep.subr.bf16.mxu0 %v6417_v59  ;;  %1542 = vmatprep.mubr.f32.mxu1 %v6014_v2 }
 0x144   :  { %4460 = vmatmul.mubr.f32.gmra.mrb[30].mxu0 %v643_v52  ;;  %3900 = vmatmul.mubr.msk.f32.gmra.mrb[58].mxu1 %vm108_vm1, %v6269_v19 }
 0x145   :  { %5093 = vmatpush3.bf16.msra.mxu0 %v6417_v59  ;;  %4462 = vmatprep.mubr.f32.mxu0 %v644_v50  ;;  %v647_v59 = vld [vmem:[%s7821_s3 + $0x38] sm:$0xff] }
 0x146   :  { %5095 = vmatprep.subr.bf16.mxu0 %v6431_v42  ;;  %1548 = vmatprep.mubr.f32.mxu1 %v6014_v2 }
 0x148   :  { %4463 = vmatmul.mubr.f32.gmra.mrb[32].mxu0 %v645_v33  ;;  %3901 = vmatmul.mubr.msk.f32.gmra.mrb[60].mxu1 %vm108_vm1, %v6280_v20  ;;  %v3865_v33 = vld [vmem:[%s7821_s3 + $0x150] sm:$0xff] }
 0x149   :  { %5097 = vmatpush3.bf16.msra.mxu0 %v6431_v42  ;;  %4465 = vmatprep.mubr.f32.mxu0 %v646_v55  ;;  %v649_v42 = vld [vmem:[%s7821_s3 + $0x48] sm:$0xff]  ;;  %v3877_v55 = vld [vmem:[%s7821_s3 + $0x1b0] sm:$0xff] }
 0x14a   :  { %5099 = vmatprep.subr.bf16.mxu0 %v6445_v28  ;;  %1554 = vmatprep.mubr.f32.mxu1 %v6014_v2 }
 0x14c   :  { %4466 = vmatmul.mubr.f32.gmra.mrb[34].mxu0 %v647_v59  ;;  %3902 = vmatmul.mubr.msk.f32.gmra.mrb[62].mxu1 %vm108_vm1, %v6291_v21  ;;  %v3878_v59 = vld [vmem:[%s7821_s3 + $0x1b8] sm:$0xff] }
 0x14d   :  { %5101 = vmatpush3.bf16.msra.mxu0 %v6445_v28  ;;  %4468 = vmatprep.mubr.f32.mxu0 %v648_v57  ;;  %v651_v28 = vld [vmem:[%s7821_s3 + $0x58] sm:$0xff]  ;;  %v3879_v57 = vld [vmem:[%s7821_s3 + $0x1c0] sm:$0xff] }
 0x14e   :  { %5103 = vmatprep.subr.bf16.mxu0 %v6459_v1  ;;  %1560 = vmatprep.mubr.f32.mxu1 %v6014_v2 }
 0x150   :  { %4469 = vmatmul.mubr.f32.gmra.mrb[36].mxu0 %v649_v42  ;;  %3903 = vmatmul.mubr.msk.f32.gmra.mrb[64].mxu1 %vm108_vm1, %v6141_v5  ;;  %v1354_v5 = vld [vmem:[%s7799_s5 + $0x18] sm:$0xff]  ;;  %v3880_v42 = vld [vmem:[%s7821_s3 + $0x1c8] sm:$0xff] }
 0x151   :  { %5105 = vmatpush3.bf16.msra.mxu0 %v6459_v1  ;;  %4471 = vmatprep.mubr.f32.mxu0 %v650_v61  ;;  %v653_v1 = vld [vmem:[%s7821_s3 + $0x68] sm:$0xff]  ;;  %v5152_v23 = vpack.c.bf16 %v1354_v5, %v1351_v0  ;;  %v3881_v61 = vld [vmem:[%s7821_s3 + $0x1d0] sm:$0xff]  ;;  %v1378_v0 = vld [vmem:[%s7799_s5 + $0xd8] sm:$0xff] }
 0x152   :  { %5107 = vmatprep.subr.bf16.mxu0 %v6473_v58  ;;  %1566 = vmatprep.mubr.f32.mxu1 %v6014_v2 }
 0x154   :  { %4472 = vmatmul.mubr.f32.gmra.mrb[38].mxu0 %v651_v28  ;;  %3904 = vmatmul.mubr.msk.f32.gmra.mrb[66].mxu1 %vm108_vm1, %v6148_v6  ;;  %v3857_v6 = vld [vmem:[%s7821_s3 + $0x110] sm:$0xff]  ;;  %v3882_v28 = vld [vmem:[%s7821_s3 + $0x1d8] sm:$0xff] }
 0x155   :  { %5109 = vmatpush3.bf16.msra.mxu0 %v6473_v58  ;;  %4474 = vmatprep.mubr.f32.mxu0 %v652_v62  ;;  %v655_v58 = vld [vmem:[%s7821_s3 + $0x78] sm:$0xff]  ;;  %v3883_v62 = vld [vmem:[%s7821_s3 + $0x1e0] sm:$0xff] }
 0x156   :  { %5111 = vmatprep.subr.bf16.mxu0 %v6497_v40  ;;  %4594 = vmatprep.mubr.msk.f32.mxu1 %vm108_vm1, %v6123_v3  ;;  %v1367_v3 = vld [vmem:[%s7799_s5 + $0x80] sm:$0xff] }
 0x157   :  { %v5158_v54 = vpack.c.bf16 %v1367_v3, %v1364_v53  ;;  %v1387_v3 = vld [vmem:[%s7799_s5 + $0x120] sm:$0xff] }
 0x158   :  { %4475 = vmatmul.mubr.f32.gmra.mrb[40].mxu0 %v653_v1  ;;  %4595 = vmatmul.mubr.msk.f32.vlgmr.msra.gmra.mrb[68].mxu1 %vm108_vm1, %v6136_v4  ;;  %v3859_v4 = vld [vmem:[%s7821_s3 + $0x120] sm:$0xff]  ;;  %v3884_v1 = vld [vmem:[%s7821_s3 + $0x1e8] sm:$0xff] }
 0x159   :  { %5113 = vmatpush3.bf16.msra.mxu0 %v6497_v40  ;;  %4477 = vmatprep.mubr.f32.mxu0 %v654_v31  ;;  %v1358_v40 = vld [vmem:[%s7799_s5 + $0x38] sm:$0xff]  ;;  %v3885_v31 = vld [vmem:[%s7821_s3 + $0x1f0] sm:$0xff] }
 0x15a   :  { %5115 = vmatprep.subr.bf16.mxu0 %v6538_v37  ;;  %v5154_v35 = vpack.c.bf16 %v1361_v9, %v1358_v40  ;;  %5153 = vmatpush1.bf16.msra.mxu1 %v5152_v23  ;;  %v1382_v40 = vld [vmem:[%s7799_s5 + $0xf8] sm:$0xff]  ;;  %v1385_v9 = vld [vmem:[%s7799_s5 + $0x110] sm:$0xff]  ;;  %v1384_v23 = vld [vmem:[%s7799_s5 + $0x108] sm:$0xff] }
 0x15b   :  { %4597 = vmatprep.mubr.msk.f32.mxu1 %vm108_vm1, %v6167_v10  ;;  %v1373_v10 = vld [vmem:[%s7799_s5 + $0xb0] sm:$0xff] }
 0x15c   :  { %4478 = vmatmul.mubr.f32.gmra.mrb[42].mxu0 %v655_v58  ;;  %5155 = vmatprep.subr.bf16.mxu1 %v5154_v35  ;;  %v5162_v51 = vpack.c.bf16 %v1373_v10, %v1370_v38  ;;  %v3886_v58 = vld [vmem:[%s7821_s3 + $0x1f8] sm:$0xff]  ;;  %v1396_v38 = vld [vmem:[%s7799_s5 + $0x168] sm:$0xff] }
 0x15d   :  { %5117 = vmatpush3.bf16.msra.mxu0 %v6538_v37  ;;  %4512 = vmatprep.mubr.f32.mxu0 %v3855_v45  ;;  %v1360_v37 = vld [vmem:[%s7799_s5 + $0x48] sm:$0xff]  ;;  %v1375_v45 = vld [vmem:[%s7799_s5 + $0xc0] sm:$0xff] }
 0x15e   :  { %5119 = vmatprep.subr.bf16.mxu0 %v6405_v34  ;;  %v5156_v48 = vpack.c.bf16 %v1360_v37, %v1357_v36  ;;  %4598 = vmatmul.mubr.msk.f32.gmra.mrb[70].mxu1 %vm108_vm1, %v6181_v11  ;;  %v3861_v11 = vld [vmem:[%s7821_s3 + $0x130] sm:$0xff]  ;;  %v5168_v5 = vpack.c.bf16 %v1378_v0, %v1375_v45  ;;  %v1388_v36 = vld [vmem:[%s7799_s5 + $0x128] sm:$0xff]  ;;  %v1391_v37 = vld [vmem:[%s7799_s5 + $0x140] sm:$0xff] }
 0x15f   :  { %4600 = vmatprep.mubr.msk.f32.mxu1 %vm108_vm1, %v6192_v12  ;;  %v1379_v12 = vld [vmem:[%s7799_s5 + $0xe0] sm:$0xff]  ;;  %v5174_v53 = vpack.c.bf16 %v1391_v37, %v1388_v36  ;;  %v1380_v45 = vld [vmem:[%s7799_s5 + $0xe8] sm:$0xff] }
 0x160   :  { %4513 = vmatmul.mubr.f32.vlgmr.msra.gmra.mrb[28].mxu0 %v3856_v22  ;;  %5157 = vmatpush1.bf16.msra.mxu1 %v5156_v48  ;;  %v5166_v50 = vpack.c.bf16 %v1379_v12, %v1376_v47  ;;  %v5170_v22 = vpack.c.bf16 %v1385_v9, %v1382_v40  ;;  %v1394_v48 = vld [vmem:[%s7799_s5 + $0x158] sm:$0xff] }
 0x161   :  { %5121 = vmatpush3.bf16.msra.mxu0 %v6405_v34  ;;  %4515 = vmatprep.mubr.f32.mxu0 %v3857_v6  ;;  %v1363_v34 = vld [vmem:[%s7799_s5 + $0x60] sm:$0xff]  ;;  %v1381_v6 = vld [vmem:[%s7799_s5 + $0xf0] sm:$0xff] }
 0x162   :  { %5123 = vmatprep.subr.bf16.mxu0 %v6419_v60  ;;  %v5160_v44 = vpack.c.bf16 %v1366_v32, %v1363_v34  ;;  %5159 = vmatprep.subr.bf16.mxu1 %v5158_v54  ;;  %v5172_v35 = vpack.c.bf16 %v1384_v23, %v1381_v6  ;;  %v1397_v54 = vld [vmem:[%s7799_s5 + $0x170] sm:$0xff]  ;;  %v1383_v6 = vld [vmem:[%s7799_s5 + $0x100] sm:$0xff]  ;;  %v1386_v23 = vld [vmem:[%s7799_s5 + $0x118] sm:$0xff] }
 0x163   :  { %4601 = vmatmul.mubr.msk.f32.gmra.mrb[72].mxu1 %vm108_vm1, %v6203_v13  ;;  %v3863_v13 = vld [vmem:[%s7821_s3 + $0x140] sm:$0xff]  ;;  %v5178_v34 = vpack.c.bf16 %v1397_v54, %v1394_v48  ;;  %v1393_v32 = vld [vmem:[%s7799_s5 + $0x150] sm:$0xff] }
 0x164   :  { %4516 = vmatmul.mubr.f32.gmra.mrb[30].mxu0 %v3858_v56  ;;  %5161 = vmatpush1.bf16.msra.mxu1 %v5160_v44  ;;  %v1390_v56 = vld [vmem:[%s7799_s5 + $0x138] sm:$0xff]  ;;  %v5180_v10 = vpack.c.bf16 %v1396_v38, %v1393_v32  ;;  %v1395_v32 = vld [vmem:[%s7799_s5 + $0x160] sm:$0xff] }
 0x165   :  { %5125 = vmatpush3.bf16.msra.mxu0 %v6419_v60  ;;  %4518 = vmatprep.mubr.f32.mxu0 %v3859_v4  ;;  %v1369_v60 = vld [vmem:[%s7799_s5 + $0x90] sm:$0xff]  ;;  %v5176_v4 = vpack.c.bf16 %v1390_v56, %v1387_v3  ;;  %v1398_v38 = vld [vmem:[%s7799_s5 + $0x178] sm:$0xff] }
 0x166   :  { %5127 = vmatprep.subr.bf16.mxu0 %v6433_v43  ;;  %v5164_v52 = vpack.c.bf16 %v1372_v46, %v1369_v60  ;;  %4603 = vmatprep.mubr.msk.f32.mxu1 %vm108_vm1, %v6214_v14  ;;  %v3866_v14 = vld [vmem:[%s7821_s3 + $0x158] sm:$0xff]  ;;  %v1389_v56 = vld [vmem:[%s7799_s5 + $0x130] sm:$0xff] }
 0x167   :  { %5163 = vmatprep.subr.bf16.mxu1 %v5162_v51  ;;  %4604 = vmatmul.mubr.msk.f32.gmra.mrb[74].mxu1 %vm108_vm1, %v6225_v15  ;;  %v3867_v15 = vld [vmem:[%s7821_s3 + $0x160] sm:$0xff]  ;;  %v101_v51 = vsub.s32 4, %v6348_v24 }
 0x168   :  { %4519 = vmatmul.mubr.f32.gmra.mrb[32].mxu0 %v3860_v63  ;;  %5165 = vmatpush1.bf16.msra.mxu1 %v5164_v52  ;;  %v1353_v63 = vld [vmem:[%s7799_s5 + $0x10] sm:$0xff] }
 0x169   :  { %5129 = vmatpush3.bf16.msra.mxu0 %v6433_v43  ;;  %4521 = vmatprep.mubr.f32.mxu0 %v3861_v11  ;;  %v3864_v43 = vld [vmem:[%s7821_s3 + $0x148] sm:$0xff]  ;;  %v6940_v60 = vrot.slane %v6356_v26, %v101_v51  ;;  %v1362_v26 = vld [vmem:[%s7799_s5 + $0x58] sm:$0xff] }
 0x16a   :  { %5131 = vmatprep.subr.bf16.mxu0 %v6447_v30  ;;  %4606 = vmatprep.mubr.msk.f32.mxu1 %vm108_vm1, %v6236_v16  ;;  %v3868_v16 = vld [vmem:[%s7821_s3 + $0x168] sm:$0xff] }
 0x16b   :  { %5167 = vmatprep.subr.bf16.mxu1 %v5166_v50  ;;  %4607 = vmatmul.mubr.msk.f32.gmra.mrb[76].mxu1 %vm108_vm1, %v6247_v17  ;;  %v3869_v17 = vld [vmem:[%s7821_s3 + $0x170] sm:$0xff]  ;;  %v1356_v11 = vld [vmem:[%s7799_s5 + $0x28] sm:$0xff] }
 0x16c   :  { %4522 = vmatmul.mubr.f32.gmra.mrb[34].mxu0 %v3862_v49  ;;  %4609 = vmatprep.mubr.msk.f32.mxu1 %vm108_vm1, %v6258_v18  ;;  %v3870_v18 = vld [vmem:[%s7821_s3 + $0x178] sm:$0xff]  ;;  %v5182_v44 = vpack.c.bf16 %v1356_v11, %v1353_v63  ;;  %v5210_v63 = vpack.c.bf16 %v1398_v38, %v1395_v32 }
 0x16d   :  { %5133 = vmatpush3.bf16.msra.mxu0 %v6447_v30  ;;  %4524 = vmatprep.mubr.f32.mxu0 %v3863_v13  ;;  %v3872_v30 = vld [vmem:[%s7821_s3 + $0x188] sm:$0xff] }
 0x16e   :  { %5135 = vmatprep.subr.bf16.mxu0 %v6461_v7  ;;  %5169 = vmatpush1.bf16.msra.mxu1 %v5168_v5 }
 0x16f   :  { %4610 = vmatmul.mubr.msk.f32.gmra.mrb[78].mxu1 %vm108_vm1, %v6269_v19  ;;  %v3871_v19 = vld [vmem:[%s7821_s3 + $0x180] sm:$0xff]  ;;  %5171 = vmatprep.subr.bf16.mxu1 %v5170_v22 }
 0x170   :  { %4525 = vmatmul.mubr.f32.gmra.mrb[36].mxu0 %v3864_v43  ;;  %4612 = vmatprep.mubr.msk.f32.mxu1 %vm108_vm1, %v6280_v20  ;;  %v6831_v20 = vld [vmem:[%s7820_s20 + $0x70] sm:$0xff] }
 0x171   :  { %5137 = vmatpush3.bf16.msra.mxu0 %v6461_v7  ;;  %4527 = vmatprep.mubr.f32.mxu0 %v3865_v33  ;;  %v3873_v7 = vld [vmem:[%s7821_s3 + $0x190] sm:$0xff] }
 0x172   :  { %5139 = vmatprep.subr.bf16.mxu0 %v6475_v29  ;;  %5173 = vmatpush1.bf16.msra.mxu1 %v5172_v35 }
 0x173   :  { %4613 = vmatmul.mubr.msk.f32.gmra.mrb[80].mxu1 %vm108_vm1, %v6291_v21  ;;  %v6838_v21 = vld [vmem:[%s7820_s20 + $0x78] sm:$0xff]  ;;  %5175 = vmatprep.subr.bf16.mxu1 %v5174_v53  ;;  %v5202_v53 = vpack.c.bf16 %v1386_v23, %v1383_v6 }
 0x174   :  { %4528 = vmatmul.mubr.f32.gmra.mrb[38].mxu0 %v3866_v14  ;;  %4615 = vmatprep.mubr.msk.f32.mxu1 %vm108_vm1, %v6831_v20  ;;  %v1359_v14 = vld [vmem:[%s7799_s5 + $0x40] sm:$0xff] }
 0x175   :  { %5141 = vmatpush3.bf16.msra.mxu0 %v6475_v29  ;;  %4530 = vmatprep.mubr.f32.mxu0 %v3867_v15  ;;  %v3874_v29 = vld [vmem:[%s7821_s3 + $0x198] sm:$0xff] }
 0x176   :  { %5143 = vmatprep.subr.bf16.mxu0 %v6500_v41  ;;  %5177 = vmatpush1.bf16.msra.mxu1 %v5176_v4  ;;  %v1392_v4 = vld [vmem:[%s7799_s5 + $0x148] sm:$0xff] }
 0x177   :  { %4616 = vmatmul.mubr.msk.f32.gmra.mrb[82].mxu1 %vm108_vm1, %v6838_v21  ;;  %5179 = vmatprep.subr.bf16.mxu1 %v5178_v34  ;;  %v5206_v54 = vpack.c.bf16 %v1392_v4, %v1389_v56 }
 0x178   :  { %4531 = vmatmul.mubr.f32.gmra.mrb[40].mxu0 %v3868_v16  ;;  %1782 = vmatprep.mubr.f32.mxu1 %v6014_v2 }
 0x179   :  { %5145 = vmatpush3.bf16.msra.mxu0 %v6500_v41  ;;  %4533 = vmatprep.mubr.f32.mxu0 %v3869_v17  ;;  %v3875_v41 = vld [vmem:[%s7821_s3 + $0x1a0] sm:$0xff] }
 0x17a   :  { %5147 = vmatprep.subr.bf16.mxu0 %v6541_v8  ;;  %5181 = vmatpush1.bf16.msra.mxu1 %v5180_v10 }
 0x17b   :  { %5183 = vmatprep.subr.bf16.mxu1 %v5182_v44 }
 0x17c   :  { %4534 = vmatmul.mubr.f32.gmra.mrb[42].mxu0 %v3870_v18  ;;  %v5186_v18 = vpack.c.bf16 %v1362_v26, %v1359_v14 }
 0x17d   :  { %5149 = vmatpush3.bf16.msra.mxu0 %v6541_v8  ;;  %4568 = vmatprep.mubr.f32.mxu0 %v3871_v19  ;;  %v3876_v8 = vld [vmem:[%s7821_s3 + $0x1a8] sm:$0xff] }
 0x180   :  { %4569 = vmatmul.mubr.f32.vlgmr.msra.gmra.mrb[28].mxu0 %v3872_v30  ;;  %v1365_v30 = vld [vmem:[%s7799_s5 + $0x70] sm:$0xff] }
 0x181   :  { %4571 = vmatprep.mubr.f32.mxu0 %v3873_v7  ;;  %v1368_v7 = vld [vmem:[%s7799_s5 + $0x88] sm:$0xff] }
 0x184   :  { %4572 = vmatmul.mubr.f32.gmra.mrb[30].mxu0 %v3874_v29 }
 0x185   :  { %4574 = vmatprep.mubr.f32.mxu0 %v3875_v41 }
 0x188   :  { %4575 = vmatmul.mubr.f32.gmra.mrb[32].mxu0 %v3876_v8 }
 0x189   :  { %4577 = vmatprep.mubr.f32.mxu0 %v3877_v55  ;;  %v5190_v55 = vpack.c.bf16 %v1368_v7, %v1365_v30 }
 0x18c   :  { %4578 = vmatmul.mubr.f32.gmra.mrb[34].mxu0 %v3878_v59 }
 0x18d   :  { %4580 = vmatprep.mubr.f32.mxu0 %v3879_v57  ;;  %v1371_v57 = vld [vmem:[%s7799_s5 + $0xa0] sm:$0xff] }
 0x190   :  { %4581 = vmatmul.mubr.f32.gmra.mrb[36].mxu0 %v3880_v42  ;;  %v1374_v42 = vld [vmem:[%s7799_s5 + $0xb8] sm:$0xff] }
 0x191   :  { %4583 = vmatprep.mubr.f32.mxu0 %v3881_v61 }
 0x194   :  { %4584 = vmatmul.mubr.f32.gmra.mrb[38].mxu0 %v3882_v28 }
 0x195   :  { %4586 = vmatprep.mubr.f32.mxu0 %v3883_v62 }
 0x198   :  { %4587 = vmatmul.mubr.f32.gmra.mrb[40].mxu0 %v3884_v1  ;;  %v5194_v1 = vpack.c.bf16 %v1374_v42, %v1371_v57 }
 0x199   :  { %4589 = vmatprep.mubr.f32.mxu0 %v3885_v31 }
 0x19c   :  { %4590 = vmatmul.mubr.f32.gmra.mrb[42].mxu0 %v3886_v58  ;;  %v1377_v58 = vld [vmem:[%s7799_s5 + $0xd0] sm:$0xff] }
 0x19d   :  { %2949 = vmatprep.mubr.f32.mxu0 %v6014_v2  ;;  %v5198_v9 = vpack.c.bf16 %v1380_v45, %v1377_v58 }
 0x253   :  { %v4570_v46 = vpop.f32.mrb[28].mxu0 }
 0x254   :  { %v1224_v47 = vpop.f32.mrb[29].mxu0  ;;  %v5444_v49 = vadd.f32 %v4570_v46, %v6940_v60 }
 0x255   :  { %v5445_v12 = vadd.f32 %v1224_v47, %v6940_v60 }
 0x257   :  { %5768 = vtanh.f32 %v5445_v12  ;;  %v4573_v13 = vpop.f32.mrb[30].mxu0 }
 0x258   :  { %v1234_v52 = vpop.f32.mrb[31].mxu0  ;;  %5770 = vtanh.f32 %v5444_v49  ;;  %v5446_v15 = vadd.f32 %v4573_v13, %v6940_v60 }
 0x259   :  { %v5447_v50 = vadd.f32 %v1234_v52, %v6940_v60 }
 0x25b   :  { %v4576_v43 = vpop.f32.mrb[32].mxu0  ;;  %5772 = vtanh.f32 %v5447_v50 }
 0x25c   :  { %v1244_v33 = vpop.f32.mrb[33].mxu0  ;;  %5774 = vtanh.f32 %v5446_v15  ;;  %v5448_v61 = vadd.f32 %v4576_v43, %v6940_v60 }
 0x25d   :  { %v5449_v29 = vadd.f32 %v1244_v33, %v6940_v60 }
 0x25f   :  { %v4579_v16 = vpop.f32.mrb[34].mxu0  ;;  %5776 = vtanh.f32 %v5449_v29 }
 0x260   :  { %v1254_v17 = vpop.f32.mrb[35].mxu0  ;;  %5778 = vtanh.f32 %v5448_v61  ;;  %v5450_v35 = vadd.f32 %v4579_v16, %v6940_v60 }
 0x261   :  { %v6952_v19 = vpop.eup %5768  ;;  %v5451_v0 = vadd.f32 %v1254_v17, %v6940_v60  ;;  %v7041_v17 = vld [vmem:[%s7800_s7] sm:$0x7]  ;;  %s6015_s7 = smov 64  }
 0x262   :  { %1783 = vmatmul.mubr.f32.vlgmr.msra.gmra.mrb[36].mxu1 %v6952_v19  ;;  %v6963_v59 = vpop.eup %5770  ;;  %v7049_v7 = vrot.slane %v7041_v17, %v6359_v27 }
 0x263   :  { %v4582_v41 = vpop.f32.mrb[36].mxu0  ;;  %1788 = vmatprep.mubr.f32.mxu1 %v6014_v2  ;;  %5185 = vmatpush3.bf16.msra.mxu1 %v5182_v44  ;;  %5780 = vtanh.f32 %v5451_v0 }
 0x264   :  { %v1264_v8 = vpop.f32.mrb[37].mxu0  ;;  %5187 = vmatprep.subr.bf16.mxu1 %v5186_v18  ;;  %5782 = vtanh.f32 %v5450_v35  ;;  %v5452_v10 = vadd.f32 %v4582_v41, %v6940_v60 }
 0x265   :  { %v6974_v31 = vpop.eup %5772  ;;  %v5453_v48 = vadd.f32 %v1264_v8, %v6940_v60 }
 0x266   :  { %1789 = vmatmul.mubr.f32.gmra.mrb[38].mxu1 %v6963_v59  ;;  %v6985_v22 = vpop.eup %5774 }
 0x267   :  { %v4585_v28 = vpop.f32.mrb[38].mxu0  ;;  %1794 = vmatprep.mubr.f32.mxu1 %v6014_v2  ;;  %5189 = vmatpush3.bf16.msra.mxu1 %v5186_v18  ;;  %5784 = vtanh.f32 %v5453_v48 }
 0x268   :  { %v1274_v62 = vpop.f32.mrb[39].mxu0  ;;  %5191 = vmatprep.subr.bf16.mxu1 %v5190_v55  ;;  %5786 = vtanh.f32 %v5452_v10  ;;  %v5454_v46 = vadd.f32 %v4585_v28, %v6940_v60 }
 0x269   :  { %v6996_v3 = vpop.eup %5776  ;;  %v5455_v44 = vadd.f32 %v1274_v62, %v6940_v60 }
 0x26a   :  { %1795 = vmatmul.mubr.f32.gmra.mrb[40].mxu1 %v6974_v31  ;;  %v5779_v34 = vpop.eup %5778 }
 0x26b   :  { %v4588_v5 = vpop.f32.mrb[40].mxu0  ;;  %1800 = vmatprep.mubr.f32.mxu1 %v6014_v2  ;;  %5193 = vmatpush3.bf16.msra.mxu1 %v5190_v55  ;;  %5788 = vtanh.f32 %v5455_v44 }
 0x26c   :  { %v1284_v40 = vpop.f32.mrb[41].mxu0  ;;  %5195 = vmatprep.subr.bf16.mxu1 %v5194_v1  ;;  %5790 = vtanh.f32 %v5454_v46  ;;  %v5456_v13 = vadd.f32 %v4588_v5, %v6940_v60 }
 0x26d   :  { %v5781_v11 = vpop.eup %5780  ;;  %v5457_v12 = vadd.f32 %v1284_v40, %v6940_v60 }
 0x26e   :  { %1801 = vmatmul.mubr.f32.gmra.mrb[42].mxu1 %v6985_v22  ;;  %v5783_v51 = vpop.eup %5782 }
 0x26f   :  { %v4591_v36 = vpop.f32.mrb[42].mxu0  ;;  %1806 = vmatprep.mubr.f32.mxu1 %v6014_v2  ;;  %5197 = vmatpush3.bf16.msra.mxu1 %v5194_v1  ;;  %5792 = vtanh.f32 %v5457_v12 }
 0x270   :  { %v1294_v37 = vpop.f32.mrb[43].mxu0  ;;  %5199 = vmatprep.subr.bf16.mxu1 %v5198_v9  ;;  %5794 = vtanh.f32 %v5456_v13  ;;  %v5458_v33 = vadd.f32 %v4591_v36, %v6940_v60 }
 0x271   :  { %v5785_v47 = vpop.eup %5784  ;;  %v5459_v50 = vadd.f32 %v1294_v37, %v6940_v60  ;;  %v5936_v60 = vld [vmem:[%s7821_s3 + $0x80] sm:$0xff] }
 0x272   :  { %1807 = vmatmul.mubr.f32.gmra.mrb[44].mxu1 %v6996_v3  ;;  %v5787_v49 = vpop.eup %5786 }
 0x273   :  { %1812 = vmatprep.mubr.f32.mxu1 %v6014_v2  ;;  %5201 = vmatpush3.bf16.msra.mxu1 %v5198_v9  ;;  %5796 = vtanh.f32 %v5459_v50 }
 0x274   :  { %5203 = vmatprep.subr.bf16.mxu1 %v5202_v53  ;;  %5798 = vtanh.f32 %v5458_v33 }
 0x275   :  { %v5789_v52 = vpop.eup %5788 }
 0x276   :  { %1813 = vmatmul.mubr.f32.gmra.mrb[46].mxu1 %v5779_v34  ;;  %v5791_v43 = vpop.eup %5790 }
 0x277   :  { %1818 = vmatprep.mubr.f32.mxu1 %v6014_v2  ;;  %5205 = vmatpush3.bf16.msra.mxu1 %v5202_v53 }
 0x278   :  { %5207 = vmatprep.subr.bf16.mxu1 %v5206_v54 }
 0x279   :  { %v5793_v14 = vpop.eup %5792 }
 0x27a   :  { %1819 = vmatmul.mubr.f32.gmra.mrb[48].mxu1 %v5781_v11  ;;  %v5795_v26 = vpop.eup %5794 }
 0x27b   :  { %1824 = vmatprep.mubr.f32.mxu1 %v6014_v2  ;;  %5209 = vmatpush3.bf16.msra.mxu1 %v5206_v54 }
 0x27c   :  { %5211 = vmatprep.subr.bf16.mxu1 %v5210_v63 }
 0x27d   :  { %v5797_v15 = vpop.eup %5796 }
 0x27e   :  { %1825 = vmatmul.mubr.f32.gmra.mrb[50].mxu1 %v5783_v51  ;;  %v5799_v16 = vpop.eup %5798 }
 0x27f   :  { %1830 = vmatprep.mubr.f32.mxu1 %v6014_v2  ;;  %5213 = vmatpush3.bf16.msra.mxu1 %v5210_v63 }
 0x282   :  { %1831 = vmatmul.mubr.f32.gmra.mrb[52].mxu1 %v5785_v47 }
 0x283   :  { %1836 = vmatprep.mubr.f32.mxu1 %v6014_v2 }
 0x286   :  { %1837 = vmatmul.mubr.f32.gmra.mrb[54].mxu1 %v5787_v49 }
 0x287   :  { %1842 = vmatprep.mubr.f32.mxu1 %v6014_v2 }
 0x28a   :  { %1843 = vmatmul.mubr.f32.gmra.mrb[56].mxu1 %v5789_v52 }
 0x28b   :  { %1848 = vmatprep.mubr.f32.mxu1 %v6014_v2 }
 0x28e   :  { %1849 = vmatmul.mubr.f32.gmra.mrb[58].mxu1 %v5791_v43 }
 0x28f   :  { %1854 = vmatprep.mubr.f32.mxu1 %v6014_v2 }
 0x292   :  { %1855 = vmatmul.mubr.f32.gmra.mrb[60].mxu1 %v5793_v14 }
 0x293   :  { %1860 = vmatprep.mubr.f32.mxu1 %v6014_v2 }
 0x296   :  { %1861 = vmatmul.mubr.f32.gmra.mrb[62].mxu1 %v5795_v26 }
 0x297   :  { %1866 = vmatprep.mubr.f32.mxu1 %v6014_v2 }
 0x29a   :  { %1867 = vmatmul.mubr.f32.gmra.mrb[64].mxu1 %v5797_v15 }
 0x29b   :  { %1872 = vmatprep.mubr.f32.mxu1 %v6014_v2 }
 0x29e   :  { %1873 = vmatmul.mubr.f32.gmra.mrb[66].mxu1 %v5799_v16 }
 0x29f   :  { %4650 = vmatprep.mubr.f32.mxu1 %v6952_v19  ;;  %v7045_v19 = vrot.slane %v7041_v17, %v6351_v25 }
 0x2a2   :  { %4651 = vmatmul.mubr.f32.vlgmr.msra.gmra.mrb[68].mxu1 %v6963_v59 }
 0x2a3   :  { %4653 = vmatprep.mubr.f32.mxu1 %v6974_v31 }
 0x2a6   :  { %4654 = vmatmul.mubr.f32.gmra.mrb[70].mxu1 %v6985_v22 }
 0x2a7   :  { %4656 = vmatprep.mubr.f32.mxu1 %v6996_v3 }
 0x2aa   :  { %4657 = vmatmul.mubr.f32.gmra.mrb[72].mxu1 %v5779_v34 }
 0x2ab   :  { %4659 = vmatprep.mubr.f32.mxu1 %v5781_v11 }
 0x2ae   :  { %4660 = vmatmul.mubr.f32.gmra.mrb[74].mxu1 %v5783_v51 }
 0x2af   :  { %4662 = vmatprep.mubr.f32.mxu1 %v5785_v47 }
 0x2b2   :  { %4663 = vmatmul.mubr.f32.gmra.mrb[76].mxu1 %v5787_v49 }
 0x2b3   :  { %4665 = vmatprep.mubr.f32.mxu1 %v5789_v52 }
 0x2b6   :  { %4666 = vmatmul.mubr.f32.gmra.mrb[78].mxu1 %v5791_v43 }
 0x2b7   :  { %4668 = vmatprep.mubr.f32.mxu1 %v5793_v14 }
 0x2ba   :  { %4669 = vmatmul.mubr.f32.gmra.mrb[80].mxu1 %v5795_v26 }
 0x2bb   :  { %4671 = vmatprep.mubr.f32.mxu1 %v5797_v15 }
 0x2be   :  { %4672 = vmatmul.mubr.f32.gmra.mrb[82].mxu1 %v5799_v16 }
 0x2bf   :  { %4706 = vmatprep.mubr.f32.mxu1 %v5936_v60 }
 0x335   :  { %v1784_v18 = vpop.f32.mrb[36].mxu1 }
 0x336   :  { %v1786_v30 = vpop.f32.mrb[37].mxu1  ;;  %v2040_v41 = vadd.f32 %v7045_v19, %v1784_v18 }
 0x337   :  { %v7054_v59 = vadd.f32 %v7049_v7, %v1786_v30 }
 0x339   :  { %v1790_v29 = vpop.f32.mrb[38].mxu1 }
 0x33a   :  { %v2043_v8 = vadd.f32 %v7045_v19, %v1790_v29  ;;  %v1792_v55 = vpop.f32.mrb[39].mxu1 }
 0x33b   :  { %v7057_v57 = vadd.f32 %v7049_v7, %v1792_v55 }
 0x33c   :  { %v7059_v42 = vpack.c.bf16 %v2043_v8, %v2040_v41  ;;  %v5688_v61 = vpack.i.bf16 %v2043_v8, %v2040_v41 }
 0x33d   :  { %v5728_v28 = vpack.i.bf16 %v7057_v57, %v7054_v59  ;;  %v7065_v62 = vpack.c.bf16 %v7057_v57, %v7054_v59  ;;  %v1796_v1 = vpop.f32.mrb[40].mxu1 }
 0x33e   :  { %5689 = vrot.lane.b32.xlu0 %v5688_v61, %s6015_s7  ;;  %v1798_v31 = vpop.f32.mrb[41].mxu1  ;;  %v2046_v45 = vadd.f32 %v7045_v19, %v1796_v1 }
 0x33f   :  { %v7071_v40 = vadd.f32 %v7049_v7, %v1798_v31 }
 0x341   :  { %v1802_v58 = vpop.f32.mrb[42].mxu1 }
 0x342   :  { %v2049_v0 = vadd.f32 %v7045_v19, %v1802_v58  ;;  %v1804_v5 = vpop.f32.mrb[43].mxu1 }
 0x343   :  { %v7074_v9 = vadd.f32 %v7049_v7, %v1804_v5 }
 0x344   :  { %v5693_v22 = vpack.i.bf16 %v2049_v0, %v2046_v45  ;;  %v7076_v6 = vpack.c.bf16 %v2049_v0, %v2046_v45 }
 0x345   :  { %v5733_v23 = vpack.i.bf16 %v7074_v9, %v7071_v40  ;;  %v7082_v35 = vpack.c.bf16 %v7074_v9, %v7071_v40  ;;  %v1808_v36 = vpop.f32.mrb[44].mxu1 }
 0x346   :  { %5694 = vrot.lane.b32.xlu0 %v5693_v22, %s6015_s7  ;;  %v1810_v37 = vpop.f32.mrb[45].mxu1  ;;  %v2052_v3 = vadd.f32 %v7045_v19, %v1808_v36 }
 0x347   :  { %v7088_v48 = vadd.f32 %v7049_v7, %v1810_v37 }
 0x349   :  { %v1814_v53 = vpop.f32.mrb[46].mxu1 }
 0x34a   :  { %v2055_v56 = vadd.f32 %v7045_v19, %v1814_v53  ;;  %v1816_v4 = vpop.f32.mrb[47].mxu1 }
 0x34b   :  { %v7091_v54 = vadd.f32 %v7049_v7, %v1816_v4 }
 0x34c   :  { %v7093_v34 = vpack.c.bf16 %v2055_v56, %v2052_v3  ;;  %v5698_v32 = vpack.i.bf16 %v2055_v56, %v2052_v3 }
 0x34d   :  { %v5738_v38 = vpack.i.bf16 %v7091_v54, %v7088_v48  ;;  %v7099_v10 = vpack.c.bf16 %v7091_v54, %v7088_v48  ;;  %v1820_v63 = vpop.f32.mrb[48].mxu1 }
 0x34e   :  { %5699 = vrot.lane.b32.xlu1 %v5698_v32, %s6015_s7  ;;  %v1822_v11 = vpop.f32.mrb[49].mxu1  ;;  %v2058_v51 = vadd.f32 %v7045_v19, %v1820_v63 }
 0x34f   :  { %v7105_v12 = vadd.f32 %v7049_v7, %v1822_v11 }
 0x351   :  { %v1826_v44 = vpop.f32.mrb[50].mxu1 }
 0x352   :  { %v2061_v46 = vadd.f32 %v7045_v19, %v1826_v44  ;;  %v1828_v47 = vpop.f32.mrb[51].mxu1 }
 0x353   :  { %v7108_v49 = vadd.f32 %v7049_v7, %v1828_v47 }
 0x354   :  { %v5703_v13 = vpack.i.bf16 %v2061_v46, %v2058_v51  ;;  %v7110_v52 = vpack.c.bf16 %v2061_v46, %v2058_v51 }
 0x355   :  { %v5743_v50 = vpack.i.bf16 %v7108_v49, %v7105_v12  ;;  %v7116_v43 = vpack.c.bf16 %v7108_v49, %v7105_v12  ;;  %v1832_v33 = vpop.f32.mrb[52].mxu1 }
 0x356   :  { %5704 = vrot.lane.b32.xlu1 %v5703_v13, %s6015_s7  ;;  %v1834_v14 = vpop.f32.mrb[53].mxu1  ;;  %v2064_v15 = vadd.f32 %v7045_v19, %v1832_v33 }
 0x357   :  { %v2065_v18 = vadd.f32 %v7049_v7, %v1834_v14 }
 0x359   :  { %v1838_v26 = vpop.f32.mrb[54].mxu1 }
 0x35a   :  { %v2067_v16 = vadd.f32 %v7045_v19, %v1838_v26  ;;  %v1840_v60 = vpop.f32.mrb[55].mxu1 }
 0x35b   :  { %v2068_v30 = vadd.f32 %v7049_v7, %v1840_v60 }
 0x35c   :  { %v5708_v29 = vpack.i.bf16 %v2067_v16, %v2064_v15  ;;  %v7123_v41 = vpack.c.bf16 %v2067_v16, %v2064_v15 }
 0x35d   :  { %v5748_v8 = vpack.i.bf16 %v2068_v30, %v2065_v18  ;;  %v7125_v55 = vpack.c.bf16 %v2068_v30, %v2065_v18  ;;  %v1844_v61 = vpop.f32.mrb[56].mxu1 }
 0x35e   :  { %5709 = vrot.lane.b32.xlu0 %v5708_v29, %s6015_s7  ;;  %v1846_v1 = vpop.f32.mrb[57].mxu1  ;;  %v2070_v58 = vadd.f32 %v7045_v19, %v1844_v61 }
 0x35f   :  { %v2071_v5 = vadd.f32 %v7049_v7, %v1846_v1 }
 0x361   :  { %v1850_v31 = vpop.f32.mrb[58].mxu1 }
 0x362   :  { %v2073_v45 = vadd.f32 %v7045_v19, %v1850_v31  ;;  %v1852_v0 = vpop.f32.mrb[59].mxu1 }
 0x363   :  { %v2074_v22 = vadd.f32 %v7049_v7, %v1852_v0 }
 0x364   :  { %v5713_v36 = vpack.i.bf16 %v2073_v45, %v2070_v58  ;;  %v7132_v37 = vpack.c.bf16 %v2073_v45, %v2070_v58 }
 0x365   :  { %v5753_v53 = vpack.i.bf16 %v2074_v22, %v2071_v5  ;;  %v7134_v3 = vpack.c.bf16 %v2074_v22, %v2071_v5  ;;  %v1856_v56 = vpop.f32.mrb[60].mxu1 }
 0x366   :  { %5714 = vrot.lane.b32.xlu1 %v5713_v36, %s6015_s7  ;;  %v1858_v4 = vpop.f32.mrb[61].mxu1  ;;  %v2076_v63 = vadd.f32 %v7045_v19, %v1856_v56 }
 0x367   :  { %v2077_v51 = vadd.f32 %v7049_v7, %v1858_v4 }
 0x369   :  { %v1862_v32 = vpop.f32.mrb[62].mxu1 }
 0x36a   :  { %v2079_v11 = vadd.f32 %v7045_v19, %v1862_v32  ;;  %v1864_v44 = vpop.f32.mrb[63].mxu1 }
 0x36b   :  { %v2080_v46 = vadd.f32 %v7049_v7, %v1864_v44 }
 0x36c   :  { %v5718_v47 = vpack.i.bf16 %v2079_v11, %v2076_v63  ;;  %v7141_v12 = vpack.c.bf16 %v2079_v11, %v2076_v63 }
 0x36d   :  { %v5758_v49 = vpack.i.bf16 %v2080_v46, %v2077_v51  ;;  %v7143_v13 = vpack.c.bf16 %v2080_v46, %v2077_v51  ;;  %v1868_v33 = vpop.f32.mrb[64].mxu1 }
 0x36e   :  { %5719 = vrot.lane.b32.xlu0 %v5718_v47, %s6015_s7  ;;  %v1870_v14 = vpop.f32.mrb[65].mxu1  ;;  %v2082_v15 = vadd.f32 %v7045_v19, %v1868_v33 }
 0x36f   :  { %v2083_v18 = vadd.f32 %v7049_v7, %v1870_v14 }
 0x371   :  { %v1874_v26 = vpop.f32.mrb[66].mxu1 }
 0x372   :  { %v2085_v16 = vadd.f32 %v7045_v19, %v1874_v26  ;;  %5729 = vrot.lane.b32.xlu0 %v5728_v28, %s6015_s7  ;;  %v1876_v60 = vpop.f32.mrb[67].mxu1  ;;  %v2876_v26 = vld [vmem:[%s7801_s9] sm:$0x1f] }
 0x373   :  { %v2086_v30 = vadd.f32 %v7049_v7, %v1876_v60  ;;  %v2863_v60 = vld [vmem:[%s7802_s8 + $0x18] sm:$0xff] }
 0x374   :  { %v5723_v29 = vpack.i.bf16 %v2085_v16, %v2082_v15  ;;  %v7154_v61 = vpack.c.bf16 %v2085_v16, %v2082_v15  ;;  %v2877_v15 = vld [vmem:[%s7801_s9 + $0x8] sm:$0x1f] }
 0x375   :  { %v5763_v1 = vpack.i.bf16 %v2086_v30, %v2083_v18  ;;  %v7156_v31 = vpack.c.bf16 %v2086_v30, %v2083_v18  ;;  %v2861_v16 = vld [vmem:[%s7802_s8 + $0x8] sm:$0xff]  ;;  %3922 = vmatprep.subr.msk.mxu0 %vm157_vm0, %v2877_v15  ;;  %v2860_v30 = vld [vmem:[%s7802_s8] sm:$0xff] }
 0x376   :  { %5739 = vrot.lane.b32.xlu0 %v5738_v38, %s6015_s7  ;;  %5724 = vrot.lane.b32.xlu1 %v5723_v29, %s6015_s7  ;;  %v5342_v18 = vpack.c.bf16 %v2863_v60, %v2861_v16  ;;  %v2862_v29 = vld [vmem:[%s7802_s8 + $0x10] sm:$0xff]  ;;  %v5967_v15 = vld [vmem:[%s7821_s3 + $0x28] sm:$0xff] }
 0x377   :  { %3923 = vmatpush1.msk.msra.mxu0 %vm157_vm0, %v2876_v26  ;;  %v5965_v26 = vld [vmem:[%s7820_s20 + $0x48] sm:$0xff]  ;;  %v5968_v16 = vld [vmem:[%s7820_s20 + $0x50] sm:$0xff]  ;;  %v5970_v60 = vld [vmem:[%s7821_s3 + $0x38] sm:$0xff] }
 0x378   :  { %5343 = vmatprep.subr.bf16.mxu0 %v5342_v18  ;;  %v5971_v18 = vld [vmem:[%s7820_s20 + $0x58] sm:$0xff] }
 0x37a   :  { %5749 = vrot.lane.b32.xlu0 %v5748_v8, %s6015_s7  ;;  %5734 = vrot.lane.b32.xlu1 %v5733_v23, %s6015_s7 }
 0x37e   :  { %5759 = vrot.lane.b32.xlu0 %v5758_v49, %s6015_s7  ;;  %5744 = vrot.lane.b32.xlu1 %v5743_v50, %s6015_s7 }
 0x382   :  { %5754 = vrot.lane.b32.xlu1 %v5753_v53, %s6015_s7 }
 0x386   :  { %5764 = vrot.lane.b32.xlu1 %v5763_v1, %s6015_s7  ;;  %v5937_v1 = vld [vmem:[%s7821_s3 + $0x88] sm:$0xff] }
 0x3b0   :  { %v5690_v19 = vpop.permute.xlu0 %5689 }
 0x3b1   :  { %v5692_v7 = vunpack.i.h.bf16 %v5690_v19  ;;  %v5691_v59 = vunpack.i.l.bf16 %v5690_v19  ;;  %v5938_v19 = vld [vmem:[%s7820_s20] sm:$0xff] }
 0x3b2   :  { %3924 = vmatmul.mubr.msk.f32.vlgmr.msra.gmra.mrb[44].mxu0 %vm108_vm1, %v5938_v19  ;;  %v5977_v19 = vld [vmem:[%s7820_s20 + $0x68] sm:$0xff] }
 0x3b3   :  { %v5214_v57 = vpack.c.bf16 %v5692_v7, %v5691_v59  ;;  %v2865_v7 = vld [vmem:[%s7802_s8 + $0x28] sm:$0xff]  ;;  %v2867_v59 = vld [vmem:[%s7802_s8 + $0x38] sm:$0xff]  ;;  %2955 = vmatprep.mubr.f32.mxu0 %v6014_v2 }
 0x3b5   :  { %5215 = vmatprep.subr.bf16.mxu1 %v5214_v57 }
 0x3b6   :  { %5217 = vmatpush3.bf16.msra.mxu1 %v5214_v57  ;;  %v5939_v57 = vld [vmem:[%s7821_s3 + $0x90] sm:$0xff] }
 0x3b8   :  { %v5695_v28 = vpop.permute.xlu0 %5694 }
 0x3b9   :  { %v5697_v48 = vunpack.i.h.bf16 %v5695_v28  ;;  %v5696_v54 = vunpack.i.l.bf16 %v5695_v28  ;;  %v5344_v28 = vpack.c.bf16 %v2862_v29, %v2860_v30  ;;  %v5973_v30 = vld [vmem:[%s7821_s3 + $0x48] sm:$0xff]  ;;  %v5974_v29 = vld [vmem:[%s7820_s20 + $0x60] sm:$0xff] }
 0x3bb   :  { %v5218_v38 = vpack.c.bf16 %v5697_v48, %v5696_v54  ;;  %v5346_v48 = vpack.c.bf16 %v2867_v59, %v2865_v7  ;;  %v5940_v54 = vld [vmem:[%s7821_s3 + $0x98] sm:$0xff]  ;;  %5345 = vmatpush1.bf16.msra.mxu0 %v5344_v28  ;;  %v5978_v7 = vld [vmem:[%s7821_s3 + $0x60] sm:$0xff]  ;;  %v5979_v28 = vld [vmem:[%s7821_s3 + $0x68] sm:$0xff] }
 0x3bd   :  { %5219 = vmatprep.subr.bf16.mxu1 %v5218_v38  ;;  %5347 = vmatprep.subr.bf16.mxu0 %v5346_v48  ;;  %v5980_v48 = vld [vmem:[%s7821_s3 + $0x70] sm:$0xff] }
 0x3be   :  { %5221 = vmatpush3.bf16.msra.mxu1 %v5218_v38  ;;  %v2864_v38 = vld [vmem:[%s7802_s8 + $0x20] sm:$0xff] }
 0x3c0   :  { %v5700_v40 = vpop.permute.xlu1 %5699 }
 0x3c1   :  { %v5702_v9 = vunpack.i.h.bf16 %v5700_v40  ;;  %v5701_v23 = vunpack.i.l.bf16 %v5700_v40  ;;  %v2866_v40 = vld [vmem:[%s7802_s8 + $0x30] sm:$0xff] }
 0x3c3   :  { %v5222_v50 = vpack.c.bf16 %v5702_v9, %v5701_v23  ;;  %v5942_v9 = vld [vmem:[%s7821_s3 + $0xa0] sm:$0xff]  ;;  %v5348_v23 = vpack.c.bf16 %v2866_v40, %v2864_v38  ;;  %v5981_v40 = vld [vmem:[%s7821_s3 + $0x78] sm:$0xff] }
 0x3c5   :  { %5223 = vmatprep.subr.bf16.mxu1 %v5222_v50  ;;  %5349 = vmatpush1.bf16.msra.mxu0 %v5348_v23 }
 0x3c6   :  { %5225 = vmatpush3.bf16.msra.mxu1 %v5222_v50  ;;  %v5943_v50 = vld [vmem:[%s7821_s3 + $0xa8] sm:$0xff] }
 0x3c8   :  { %v5705_v8 = vpop.permute.xlu1 %5704 }
 0x3c9   :  { %v5707_v58 = vunpack.i.h.bf16 %v5705_v8  ;;  %v5706_v45 = vunpack.i.l.bf16 %v5705_v8  ;;  %v2869_v8 = vld [vmem:[%s7802_s8 + $0x48] sm:$0xff] }
 0x3cb   :  { %v5226_v0 = vpack.c.bf16 %v5707_v58, %v5706_v45  ;;  %v2871_v58 = vld [vmem:[%s7802_s8 + $0x58] sm:$0xff]  ;;  %v5945_v45 = vld [vmem:[%s7821_s3 + $0xb0] sm:$0xff] }
 0x3cd   :  { %5227 = vmatprep.subr.bf16.mxu1 %v5226_v0 }
 0x3ce   :  { %5229 = vmatpush3.bf16.msra.mxu1 %v5226_v0  ;;  %v5350_v0 = vpack.c.bf16 %v2871_v58, %v2869_v8 }
 0x3d0   :  { %v5710_v5 = vpop.permute.xlu0 %5709  ;;  %5351 = vmatprep.subr.bf16.mxu0 %v5350_v0  ;;  %v5985_v0 = vld [vmem:[%s7821_s3 + $0x118] sm:$0xff] }
 0x3d1   :  { %v5712_v22 = vunpack.i.h.bf16 %v5710_v5  ;;  %v5711_v36 = vunpack.i.l.bf16 %v5710_v5  ;;  %v5946_v5 = vld [vmem:[%s7821_s3 + $0xb8] sm:$0xff] }
 0x3d3   :  { %v5230_v53 = vpack.c.bf16 %v5712_v22, %v5711_v36  ;;  %v2868_v22 = vld [vmem:[%s7802_s8 + $0x40] sm:$0xff]  ;;  %v2870_v36 = vld [vmem:[%s7802_s8 + $0x50] sm:$0xff] }
 0x3d5   :  { %5231 = vmatprep.subr.bf16.mxu1 %v5230_v53 }
 0x3d6   :  { %5233 = vmatpush3.bf16.msra.mxu1 %v5230_v53  ;;  %v5948_v53 = vld [vmem:[%s7821_s3 + $0xc0] sm:$0xff] }
 0x3d8   :  { %v5715_v56 = vpop.permute.xlu1 %5714 }
 0x3d9   :  { %v5717_v4 = vunpack.i.h.bf16 %v5715_v56  ;;  %v5716_v32 = vunpack.i.l.bf16 %v5715_v56  ;;  %v5352_v56 = vpack.c.bf16 %v2870_v36, %v2868_v22 }
 0x3db   :  { %v5234_v63 = vpack.c.bf16 %v5717_v4, %v5716_v32  ;;  %v5949_v4 = vld [vmem:[%s7821_s3 + $0xc8] sm:$0xff]  ;;  %v5951_v32 = vld [vmem:[%s7821_s3 + $0xd0] sm:$0xff]  ;;  %5353 = vmatpush1.bf16.msra.mxu0 %v5352_v56 }
 0x3dc   :  { %v5987_v56 = vld [vmem:[%s7821_s3 + $0x128] sm:$0xff] }
 0x3dd   :  { %5235 = vmatprep.subr.bf16.mxu1 %v5234_v63 }
 0x3de   :  { %5237 = vmatpush3.bf16.msra.mxu1 %v5234_v63  ;;  %v5952_v63 = vld [vmem:[%s7821_s3 + $0xd8] sm:$0xff] }
 0x3e0   :  { %v5720_v11 = vpop.permute.xlu0 %5719 }
 0x3e1   :  { %v5722_v44 = vunpack.i.h.bf16 %v5720_v11  ;;  %v5721_v51 = vunpack.i.l.bf16 %v5720_v11  ;;  %v5953_v11 = vld [vmem:[%s7820_s20 + $0x28] sm:$0xff] }
 0x3e3   :  { %v5238_v46 = vpack.c.bf16 %v5722_v44, %v5721_v51  ;;  %v5955_v44 = vld [vmem:[%s7821_s3 + $0xe8] sm:$0xff]  ;;  %v5956_v51 = vld [vmem:[%s7820_s20 + $0x30] sm:$0xff] }
 0x3e5   :  { %5239 = vmatprep.subr.bf16.mxu1 %v5238_v46 }
 0x3e6   :  { %5241 = vmatpush3.bf16.msra.mxu1 %v5238_v46  ;;  %v5958_v46 = vld [vmem:[%s7821_s3 + $0xf8] sm:$0xff] }
 0x3e8   :  { %v5725_v47 = vpop.permute.xlu1 %5724 }
 0x3e9   :  { %v5727_v49 = vunpack.i.h.bf16 %v5725_v47  ;;  %v5726_v33 = vunpack.i.l.bf16 %v5725_v47  ;;  %v5959_v47 = vld [vmem:[%s7820_s20 + $0x38] sm:$0xff] }
 0x3eb   :  { %v5242_v14 = vpack.c.bf16 %v5727_v49, %v5726_v33  ;;  %v5961_v49 = vld [vmem:[%s7821_s3 + $0x8] sm:$0xff]  ;;  %v5962_v33 = vld [vmem:[%s7820_s20 + $0x40] sm:$0xff] }
 0x3ed   :  { %5243 = vmatprep.subr.bf16.mxu1 %v5242_v14 }
 0x3ee   :  { %5245 = vmatpush3.bf16.msra.mxu1 %v5242_v14  ;;  %v5964_v14 = vld [vmem:[%s7821_s3 + $0x18] sm:$0xff] }
 0x3ef   :  { %5247 = vmatprep.subr.bf16.mxu1 %v7059_v42 }
 0x3f1   :  { %4707 = vmatmul.mubr.f32.vlgmr.msra.gmra.mrb[68].mxu1 %v5937_v1  ;;  %v5976_v1 = vld [vmem:[%s7821_s3 + $0x58] sm:$0xff] }
 0x3f2   :  { %5249 = vmatpush3.bf16.msra.mxu1 %v7059_v42  ;;  %4709 = vmatprep.mubr.f32.mxu1 %v5939_v57  ;;  %v5941_v42 = vld [vmem:[%s7820_s20 + $0x8] sm:$0xff] }
 0x3f3   :  { %5251 = vmatprep.subr.bf16.mxu1 %v7076_v6  ;;  %3925 = vmatmul.mubr.msk.f32.gmra.mrb[46].mxu0 %vm108_vm1, %v5941_v42 }
 0x3f4   :  { %2961 = vmatprep.mubr.f32.mxu0 %v6014_v2 }
 0x3f5   :  { %4710 = vmatmul.mubr.f32.gmra.mrb[70].mxu1 %v5940_v54 }
 0x3f6   :  { %5253 = vmatpush3.bf16.msra.mxu1 %v7076_v6  ;;  %4712 = vmatprep.mubr.f32.mxu1 %v5942_v9  ;;  %v5944_v6 = vld [vmem:[%s7820_s20 + $0x10] sm:$0xff] }
 0x3f7   :  { %5255 = vmatprep.subr.bf16.mxu1 %v7093_v34  ;;  %3926 = vmatmul.mubr.msk.f32.gmra.mrb[48].mxu0 %vm108_vm1, %v5944_v6  ;;  %v5983_v6 = vld [vmem:[%s7821_s3 + $0x108] sm:$0xff] }
 0x3f8   :  { %2967 = vmatprep.mubr.f32.mxu0 %v6014_v2 }
 0x3f9   :  { %4713 = vmatmul.mubr.f32.gmra.mrb[72].mxu1 %v5943_v50 }
 0x3fa   :  { %5257 = vmatpush3.bf16.msra.mxu1 %v7093_v34  ;;  %4715 = vmatprep.mubr.f32.mxu1 %v5945_v45  ;;  %v5947_v34 = vld [vmem:[%s7820_s20 + $0x18] sm:$0xff] }
 0x3fb   :  { %5259 = vmatprep.subr.bf16.mxu1 %v7110_v52  ;;  %3927 = vmatmul.mubr.msk.f32.gmra.mrb[50].mxu0 %vm108_vm1, %v5947_v34  ;;  %v5986_v34 = vld [vmem:[%s7821_s3 + $0x120] sm:$0xff] }
 0x3fc   :  { %2973 = vmatprep.mubr.f32.mxu0 %v6014_v2 }
 0x3fd   :  { %4716 = vmatmul.mubr.f32.gmra.mrb[74].mxu1 %v5946_v5 }
 0x3fe   :  { %5261 = vmatpush3.bf16.msra.mxu1 %v7110_v52  ;;  %4718 = vmatprep.mubr.f32.mxu1 %v5948_v53  ;;  %v5950_v52 = vld [vmem:[%s7820_s20 + $0x20] sm:$0xff] }
 0x3ff   :  { %5263 = vmatprep.subr.bf16.mxu1 %v7123_v41  ;;  %3928 = vmatmul.mubr.msk.f32.gmra.mrb[52].mxu0 %vm108_vm1, %v5950_v52  ;;  %v5988_v52 = vld [vmem:[%s7821_s3 + $0x130] sm:$0xff] }
 0x400   :  { %2979 = vmatprep.mubr.f32.mxu0 %v6014_v2 }
 0x401   :  { %4719 = vmatmul.mubr.f32.gmra.mrb[76].mxu1 %v5949_v4 }
 0x402   :  { %5265 = vmatpush3.bf16.msra.mxu1 %v7123_v41  ;;  %4721 = vmatprep.mubr.f32.mxu1 %v5951_v32  ;;  %v5954_v41 = vld [vmem:[%s7821_s3 + $0xe0] sm:$0xff] }
 0x403   :  { %5267 = vmatprep.subr.bf16.mxu1 %v7132_v37  ;;  %3929 = vmatmul.mubr.msk.f32.gmra.mrb[54].mxu0 %vm108_vm1, %v5953_v11 }
 0x404   :  { %2985 = vmatprep.mubr.f32.mxu0 %v6014_v2 }
 0x405   :  { %4722 = vmatmul.mubr.f32.gmra.mrb[78].mxu1 %v5952_v63 }
 0x406   :  { %5269 = vmatpush3.bf16.msra.mxu1 %v7132_v37  ;;  %4724 = vmatprep.mubr.f32.mxu1 %v5954_v41  ;;  %v5957_v37 = vld [vmem:[%s7821_s3 + $0xf0] sm:$0xff]  ;;  %v5989_v41 = vld [vmem:[%s7821_s3 + $0x138] sm:$0xff] }
 0x407   :  { %5271 = vmatprep.subr.bf16.mxu1 %v7141_v12  ;;  %3930 = vmatmul.mubr.msk.f32.gmra.mrb[56].mxu0 %vm108_vm1, %v5956_v51  ;;  %v5990_v51 = vld [vmem:[%s7821_s3 + $0x140] sm:$0xff] }
 0x408   :  { %2991 = vmatprep.mubr.f32.mxu0 %v6014_v2 }
 0x409   :  { %4725 = vmatmul.mubr.f32.gmra.mrb[80].mxu1 %v5955_v44 }
 0x40a   :  { %5273 = vmatpush3.bf16.msra.mxu1 %v7141_v12  ;;  %4727 = vmatprep.mubr.f32.mxu1 %v5957_v37  ;;  %v5960_v12 = vld [vmem:[%s7821_s3] sm:$0xff] }
 0x40b   :  { %5275 = vmatprep.subr.bf16.mxu1 %v7154_v61  ;;  %3931 = vmatmul.mubr.msk.f32.gmra.mrb[58].mxu0 %vm108_vm1, %v5959_v47 }
 0x40c   :  { %2997 = vmatprep.mubr.f32.mxu0 %v6014_v2 }
 0x40d   :  { %4728 = vmatmul.mubr.f32.gmra.mrb[82].mxu1 %v5958_v46 }
 0x40e   :  { %5277 = vmatpush3.bf16.msra.mxu1 %v7154_v61  ;;  %4762 = vmatprep.mubr.f32.mxu1 %v5960_v12  ;;  %v5963_v61 = vld [vmem:[%s7821_s3 + $0x10] sm:$0xff]  ;;  %v5991_v12 = vld [vmem:[%s7821_s3 + $0x148] sm:$0xff] }
 0x40f   :  { %5279 = vmatprep.subr.bf16.mxu1 %v7065_v62  ;;  %3932 = vmatmul.mubr.msk.f32.gmra.mrb[60].mxu0 %vm108_vm1, %v5962_v33  ;;  %v5992_v33 = vld [vmem:[%s7821_s3 + $0x150] sm:$0xff] }
 0x410   :  { %3003 = vmatprep.mubr.f32.mxu0 %v6014_v2 }
 0x411   :  { %4763 = vmatmul.mubr.f32.vlgmr.msra.gmra.mrb[68].mxu1 %v5961_v49 }
 0x412   :  { %5281 = vmatpush3.bf16.msra.mxu1 %v7065_v62  ;;  %4765 = vmatprep.mubr.f32.mxu1 %v5963_v61  ;;  %v5966_v62 = vld [vmem:[%s7821_s3 + $0x20] sm:$0xff] }
 0x413   :  { %5283 = vmatprep.subr.bf16.mxu1 %v7082_v35  ;;  %3933 = vmatmul.mubr.msk.f32.gmra.mrb[62].mxu0 %vm108_vm1, %v5965_v26 }
 0x414   :  { %3009 = vmatprep.mubr.f32.mxu0 %v6014_v2 }
 0x415   :  { %4766 = vmatmul.mubr.f32.gmra.mrb[70].mxu1 %v5964_v14 }
 0x416   :  { %5285 = vmatpush3.bf16.msra.mxu1 %v7082_v35  ;;  %4768 = vmatprep.mubr.f32.mxu1 %v5966_v62  ;;  %v5969_v35 = vld [vmem:[%s7821_s3 + $0x30] sm:$0xff]  ;;  %v5993_v62 = vld [vmem:[%s7821_s3 + $0x158] sm:$0xff] }
 0x417   :  { %5287 = vmatprep.subr.bf16.mxu1 %v7099_v10  ;;  %3934 = vmatmul.mubr.msk.f32.gmra.mrb[64].mxu0 %vm108_vm1, %v5968_v16 }
 0x418   :  { %3015 = vmatprep.mubr.f32.mxu0 %v6014_v2 }
 0x419   :  { %4769 = vmatmul.mubr.f32.gmra.mrb[72].mxu1 %v5967_v15  ;;  %v5994_v15 = vld [vmem:[%s7821_s3 + $0x160] sm:$0xff] }
 0x41a   :  { %5289 = vmatpush3.bf16.msra.mxu1 %v7099_v10  ;;  %4771 = vmatprep.mubr.f32.mxu1 %v5969_v35  ;;  %v5972_v10 = vld [vmem:[%s7821_s3 + $0x40] sm:$0xff]  ;;  %v5995_v35 = vld [vmem:[%s7821_s3 + $0x168] sm:$0xff] }
 0x41b   :  { %5291 = vmatprep.subr.bf16.mxu1 %v7116_v43  ;;  %3935 = vmatmul.mubr.msk.f32.gmra.mrb[66].mxu0 %vm108_vm1, %v5971_v18  ;;  %v5997_v18 = vld [vmem:[%s7821_s3 + $0x178] sm:$0xff] }
 0x41c   :  { %3021 = vmatprep.mubr.f32.mxu0 %v6014_v2 }
 0x41d   :  { %4772 = vmatmul.mubr.f32.gmra.mrb[74].mxu1 %v5970_v60  ;;  %v5996_v60 = vld [vmem:[%s7821_s3 + $0x170] sm:$0xff] }
 0x41e   :  { %5293 = vmatpush3.bf16.msra.mxu1 %v7116_v43  ;;  %4774 = vmatprep.mubr.f32.mxu1 %v5972_v10  ;;  %v5975_v43 = vld [vmem:[%s7821_s3 + $0x50] sm:$0xff]  ;;  %v5998_v10 = vld [vmem:[%s7821_s3 + $0x180] sm:$0xff] }
 0x41f   :  { %5295 = vmatprep.subr.bf16.mxu1 %v7125_v55  ;;  %3936 = vmatmul.mubr.msk.f32.gmra.mrb[68].mxu0 %vm108_vm1, %v5974_v29  ;;  %v6000_v29 = vld [vmem:[%s7821_s3 + $0x190] sm:$0xff] }
 0x420   :  { %3027 = vmatprep.mubr.f32.mxu0 %v6014_v2 }
 0x421   :  { %4775 = vmatmul.mubr.f32.gmra.mrb[76].mxu1 %v5973_v30  ;;  %v5999_v30 = vld [vmem:[%s7821_s3 + $0x188] sm:$0xff] }
 0x422   :  { %5297 = vmatpush3.bf16.msra.mxu1 %v7125_v55  ;;  %4777 = vmatprep.mubr.f32.mxu1 %v5975_v43  ;;  %v5730_v55 = vpop.permute.xlu0 %5729  ;;  %v6001_v43 = vld [vmem:[%s7821_s3 + $0x198] sm:$0xff] }
 0x423   :  { %5299 = vmatprep.subr.bf16.mxu1 %v7134_v3  ;;  %3937 = vmatmul.mubr.msk.f32.gmra.mrb[70].mxu0 %vm108_vm1, %v5977_v19  ;;  %v5732_v59 = vunpack.i.h.bf16 %v5730_v55  ;;  %v5731_v57 = vunpack.i.l.bf16 %v5730_v55  ;;  %v6003_v19 = vld [vmem:[%s7821_s3 + $0x1a8] sm:$0xff]  ;;  %v6004_v55 = vld [vmem:[%s7821_s3 + $0x1b0] sm:$0xff] }
 0x424   :  { %3033 = vmatprep.mubr.f32.mxu0 %v6014_v2 }
 0x425   :  { %4778 = vmatmul.mubr.f32.gmra.mrb[78].mxu1 %v5976_v1  ;;  %v5310_v54 = vpack.c.bf16 %v5732_v59, %v5731_v57  ;;  %v6002_v1 = vld [vmem:[%s7821_s3 + $0x1a0] sm:$0xff]  ;;  %v6007_v57 = vld [vmem:[%s7821_s3 + $0x1c8] sm:$0xff] }
 0x426   :  { %5301 = vmatpush3.bf16.msra.mxu1 %v7134_v3  ;;  %4780 = vmatprep.mubr.f32.mxu1 %v5978_v7  ;;  %v5735_v3 = vpop.permute.xlu1 %5734  ;;  %v6005_v7 = vld [vmem:[%s7821_s3 + $0x1b8] sm:$0xff]  ;;  %v6006_v59 = vld [vmem:[%s7821_s3 + $0x1c0] sm:$0xff] }
 0x427   :  { %5303 = vmatprep.subr.bf16.mxu1 %v7143_v13  ;;  %3938 = vmatmul.mubr.msk.f32.gmra.mrb[72].mxu0 %vm108_vm1, %v6831_v20  ;;  %v5737_v42 = vunpack.i.h.bf16 %v5735_v3  ;;  %v5736_v38 = vunpack.i.l.bf16 %v5735_v3  ;;  %v5740_v20 = vpop.permute.xlu0 %5739  ;;  %v6009_v3 = vld [vmem:[%s7821_s3 + $0x1d8] sm:$0xff] }
 0x428   :  { %3039 = vmatprep.mubr.f32.mxu0 %v6014_v2  ;;  %v5742_v9 = vunpack.i.h.bf16 %v5740_v20  ;;  %v5741_v23 = vunpack.i.l.bf16 %v5740_v20  ;;  %v2875_v20 = vld [vmem:[%s7802_s8 + $0x78] sm:$0xff] }
 0x429   :  { %4781 = vmatmul.mubr.f32.gmra.mrb[80].mxu1 %v5979_v28  ;;  %v5314_v50 = vpack.c.bf16 %v5737_v42, %v5736_v38  ;;  %v6008_v28 = vld [vmem:[%s7821_s3 + $0x1d0] sm:$0xff]  ;;  %v6013_v38 = vld [vmem:[%s7821_s3 + $0x1f8] sm:$0xff] }
 0x42a   :  { %5305 = vmatpush3.bf16.msra.mxu1 %v7143_v13  ;;  %4783 = vmatprep.mubr.f32.mxu1 %v5980_v48  ;;  %v5982_v13 = vld [vmem:[%s7821_s3 + $0x100] sm:$0xff]  ;;  %v5318_v8 = vpack.c.bf16 %v5742_v9, %v5741_v23  ;;  %v6012_v42 = vld [vmem:[%s7821_s3 + $0x1f0] sm:$0xff] }
 0x42b   :  { %5307 = vmatprep.subr.bf16.mxu1 %v7156_v31  ;;  %3939 = vmatmul.mubr.msk.f32.gmra.mrb[74].mxu0 %vm108_vm1, %v6838_v21  ;;  %v5745_v21 = vpop.permute.xlu1 %5744  ;;  %v5750_v5 = vpop.permute.xlu0 %5749  ;;  %v6010_v48 = vld [vmem:[%s7821_s3 + $0x1e0] sm:$0xff]  ;;  %v2874_v23 = vld [vmem:[%s7802_s8 + $0x70] sm:$0xff] }
 0x42c   :  { %3159 = vmatprep.mubr.f32.mxu0 %v6014_v2  ;;  %v5747_v58 = vunpack.i.h.bf16 %v5745_v21  ;;  %v5746_v45 = vunpack.i.l.bf16 %v5745_v21  ;;  %v5752_v22 = vunpack.i.h.bf16 %v5750_v5  ;;  %v5751_v36 = vunpack.i.l.bf16 %v5750_v5  ;;  %v2872_v9 = vld [vmem:[%s7802_s8 + $0x60] sm:$0xff] }
 0x42d   :  { %4784 = vmatmul.mubr.f32.gmra.mrb[82].mxu1 %v5981_v40  ;;  %v2873_v40 = vld [vmem:[%s7802_s8 + $0x68] sm:$0xff] }
 0x42e   :  { %5309 = vmatpush3.bf16.msra.mxu1 %v7156_v31  ;;  %4818 = vmatprep.mubr.f32.mxu1 %v5982_v13  ;;  %v5984_v31 = vld [vmem:[%s7821_s3 + $0x110] sm:$0xff]  ;;  %v5322_v53 = vpack.c.bf16 %v5747_v58, %v5746_v45  ;;  %v5326_v32 = vpack.c.bf16 %v5752_v22, %v5751_v36  ;;  %v5354_v13 = vpack.c.bf16 %v2875_v20, %v2873_v40 }
 0x42f   :  { %5311 = vmatprep.subr.bf16.mxu1 %v5310_v54  ;;  %v5755_v4 = vpop.permute.xlu1 %5754  ;;  %v5760_v44 = vpop.permute.xlu0 %5759 }
 0x430   :  { %v5757_v63 = vunpack.i.h.bf16 %v5755_v4  ;;  %v5756_v11 = vunpack.i.l.bf16 %v5755_v4  ;;  %v5762_v37 = vunpack.i.h.bf16 %v5760_v44  ;;  %v5761_v46 = vunpack.i.l.bf16 %v5760_v44  ;;  %5355 = vmatprep.subr.bf16.mxu0 %v5354_v13 }
 0x431   :  { %4819 = vmatmul.mubr.f32.vlgmr.msra.gmra.mrb[68].mxu1 %v5983_v6  ;;  %v7528_v6 = vrot.slane %v7041_v17, %v93_v39 }
 0x432   :  { %5313 = vmatpush3.bf16.msra.mxu1 %v5310_v54  ;;  %4821 = vmatprep.mubr.f32.mxu1 %v5984_v31  ;;  %v5330_v47 = vpack.c.bf16 %v5757_v63, %v5756_v11  ;;  %v5334_v61 = vpack.c.bf16 %v5762_v37, %v5761_v46  ;;  %v6011_v54 = vld [vmem:[%s7821_s3 + $0x1e8] sm:$0xff] }
 0x433   :  { %5315 = vmatprep.subr.bf16.mxu1 %v5314_v50  ;;  %v5765_v49 = vpop.permute.xlu1 %5764 }
 0x434   :  { %v5767_v14 = vunpack.i.h.bf16 %v5765_v49  ;;  %v5766_v26 = vunpack.i.l.bf16 %v5765_v49 }
 0x435   :  { %4822 = vmatmul.mubr.f32.gmra.mrb[70].mxu1 %v5985_v0 }
 0x436   :  { %5317 = vmatpush3.bf16.msra.mxu1 %v5314_v50  ;;  %4824 = vmatprep.mubr.f32.mxu1 %v5986_v34  ;;  %v5338_v16 = vpack.c.bf16 %v5767_v14, %v5766_v26  ;;  %v5356_v50 = vpack.c.bf16 %v2874_v23, %v2872_v9 }
 0x437   :  { %5319 = vmatprep.subr.bf16.mxu1 %v5318_v8 }
 0x438   :  { %5357 = vmatpush1.bf16.msra.mxu0 %v5356_v50 }
 0x439   :  { %4825 = vmatmul.mubr.f32.gmra.mrb[72].mxu1 %v5987_v56 }
 0x43a   :  { %5321 = vmatpush3.bf16.msra.mxu1 %v5318_v8  ;;  %4827 = vmatprep.mubr.f32.mxu1 %v5988_v52 }
 0x43b   :  { %5323 = vmatprep.subr.bf16.mxu1 %v5322_v53 }
 0x43d   :  { %4828 = vmatmul.mubr.f32.gmra.mrb[74].mxu1 %v5989_v41 }
 0x43e   :  { %5325 = vmatpush3.bf16.msra.mxu1 %v5322_v53  ;;  %4830 = vmatprep.mubr.f32.mxu1 %v5990_v51 }
 0x43f   :  { %5327 = vmatprep.subr.bf16.mxu1 %v5326_v32 }
 0x441   :  { %4831 = vmatmul.mubr.f32.gmra.mrb[76].mxu1 %v5991_v12 }
 0x442   :  { %5329 = vmatpush3.bf16.msra.mxu1 %v5326_v32  ;;  %4833 = vmatprep.mubr.f32.mxu1 %v5992_v33 }
 0x443   :  { %5331 = vmatprep.subr.bf16.mxu1 %v5330_v47 }
 0x445   :  { %4834 = vmatmul.mubr.f32.gmra.mrb[78].mxu1 %v5993_v62 }
 0x446   :  { %5333 = vmatpush3.bf16.msra.mxu1 %v5330_v47  ;;  %4836 = vmatprep.mubr.f32.mxu1 %v5994_v15 }
 0x447   :  { %5335 = vmatprep.subr.bf16.mxu1 %v5334_v61 }
 0x449   :  { %4837 = vmatmul.mubr.f32.gmra.mrb[80].mxu1 %v5995_v35 }
 0x44a   :  { %5337 = vmatpush3.bf16.msra.mxu1 %v5334_v61  ;;  %4839 = vmatprep.mubr.f32.mxu1 %v5996_v60 }
 0x44b   :  { %5339 = vmatprep.subr.bf16.mxu1 %v5338_v16 }
 0x44d   :  { %4840 = vmatmul.mubr.f32.gmra.mrb[82].mxu1 %v5997_v18 }
 0x44e   :  { %5341 = vmatpush3.bf16.msra.mxu1 %v5338_v16  ;;  %4874 = vmatprep.mubr.f32.mxu1 %v5998_v10 }
 0x451   :  { %4875 = vmatmul.mubr.f32.vlgmr.msra.gmra.mrb[68].mxu1 %v5999_v30 }
 0x452   :  { %4877 = vmatprep.mubr.f32.mxu1 %v6000_v29 }
 0x455   :  { %4878 = vmatmul.mubr.f32.gmra.mrb[70].mxu1 %v6001_v43 }
 0x456   :  { %4880 = vmatprep.mubr.f32.mxu1 %v6002_v1 }
 0x459   :  { %4881 = vmatmul.mubr.f32.gmra.mrb[72].mxu1 %v6003_v19 }
 0x45a   :  { %4883 = vmatprep.mubr.f32.mxu1 %v6004_v55 }
 0x45d   :  { %4884 = vmatmul.mubr.f32.gmra.mrb[74].mxu1 %v6005_v7 }
 0x45e   :  { %4886 = vmatprep.mubr.f32.mxu1 %v6006_v59 }
 0x461   :  { %4887 = vmatmul.mubr.f32.gmra.mrb[76].mxu1 %v6007_v57 }
 0x462   :  { %4889 = vmatprep.mubr.f32.mxu1 %v6008_v28  ;;  %v6016_v28 = vmov 0.0|0.0  }
 0x463   :  { %5358 = vmatprep.subr.bf16.mxu0 %v6016_v28  ;;  %5406 = vmatprep.subr.bf16.mxu1 %v6016_v28 }
 0x465   :  { %4890 = vmatmul.mubr.f32.gmra.mrb[78].mxu1 %v6009_v3  ;;  %v2878_v3 = vld [vmem:[%s7803_s10] sm:$0x3] }
 0x466   :  { %4892 = vmatprep.mubr.f32.mxu1 %v6010_v48  ;;  %v7587_v48 = vrot.slane %v2878_v3, %v6351_v25  ;;  %v7593_v25 = vrot.slane %v2878_v3, %v6359_v27 }
 0x469   :  { %4893 = vmatmul.mubr.f32.gmra.mrb[80].mxu1 %v6011_v54 }
 0x46a   :  { %4895 = vmatprep.mubr.f32.mxu1 %v6012_v42 }
 0x46d   :  { %4896 = vmatmul.mubr.f32.gmra.mrb[82].mxu1 %v6013_v38 }
 0x46e   :  { %5000 = vmatprep.mubr.msk.f32.mxu1 %vm6017_vm3, %v6014_v2 }
 0x524   :  { %v4876_v21 = vpop.f32.mrb[68].mxu1 }
 0x525   :  { %v2733_v31 = vpop.f32.mrb[69].mxu1  ;;  %v5460_v58 = vadd.f32 %v4876_v21, %v7528_v6 }
 0x526   :  { %v5461_v8 = vadd.f32 %v2733_v31, %v7528_v6 }
 0x528   :  { %5800 = vtanh.f32 %v5461_v8  ;;  %v4879_v45 = vpop.f32.mrb[70].mxu1 }
 0x529   :  { %v2743_v0 = vpop.f32.mrb[71].mxu1  ;;  %5802 = vtanh.f32 %v5460_v58  ;;  %v5462_v36 = vadd.f32 %v4879_v45, %v7528_v6 }
 0x52a   :  { %v5463_v5 = vadd.f32 %v2743_v0, %v7528_v6 }
 0x52c   :  { %v4882_v34 = vpop.f32.mrb[72].mxu1  ;;  %5804 = vtanh.f32 %v5463_v5 }
 0x52d   :  { %v2753_v22 = vpop.f32.mrb[73].mxu1  ;;  %5806 = vtanh.f32 %v5462_v36  ;;  %v5464_v32 = vadd.f32 %v4882_v34, %v7528_v6 }
 0x52e   :  { %v5465_v53 = vadd.f32 %v2753_v22, %v7528_v6 }
 0x530   :  { %v4885_v24 = vpop.f32.mrb[74].mxu1  ;;  %5808 = vtanh.f32 %v5465_v53 }
 0x531   :  { %v2763_v39 = vpop.f32.mrb[75].mxu1  ;;  %5810 = vtanh.f32 %v5464_v32  ;;  %v5466_v47 = vadd.f32 %v4885_v24, %v7528_v6 }
 0x532   :  { %v5801_v17 = vpop.eup %5800  ;;  %v5467_v44 = vadd.f32 %v2763_v39, %v7528_v6 }
 0x533   :  { %3940 = vmatmul.mubr.msk.f32.vlgmr.msra.gmra.mrb[44].mxu0 %vm3046_vm2, %v5801_v17  ;;  %v5803_v52 = vpop.eup %5802 }
 0x534   :  { %v4888_v56 = vpop.f32.mrb[76].mxu1  ;;  %3165 = vmatprep.mubr.f32.mxu0 %v6014_v2  ;;  %5812 = vtanh.f32 %v5467_v44 }
 0x535   :  { %v2773_v4 = vpop.f32.mrb[77].mxu1  ;;  %5814 = vtanh.f32 %v5466_v47  ;;  %v5468_v26 = vadd.f32 %v4888_v56, %v7528_v6 }
 0x536   :  { %v5805_v41 = vpop.eup %5804  ;;  %v5469_v61 = vadd.f32 %v2773_v4, %v7528_v6 }
 0x537   :  { %3941 = vmatmul.mubr.msk.f32.gmra.mrb[46].mxu0 %vm3046_vm2, %v5803_v52  ;;  %v5807_v46 = vpop.eup %5806 }
 0x538   :  { %v4891_v63 = vpop.f32.mrb[78].mxu1  ;;  %3171 = vmatprep.mubr.f32.mxu0 %v6014_v2  ;;  %5816 = vtanh.f32 %v5469_v61 }
 0x539   :  { %v2783_v11 = vpop.f32.mrb[79].mxu1  ;;  %5818 = vtanh.f32 %v5468_v26  ;;  %v5470_v35 = vadd.f32 %v4891_v63, %v7528_v6 }
 0x53a   :  { %v5809_v33 = vpop.eup %5808  ;;  %v5471_v15 = vadd.f32 %v2783_v11, %v7528_v6 }
 0x53b   :  { %3942 = vmatmul.mubr.msk.f32.gmra.mrb[48].mxu0 %vm3046_vm2, %v5805_v41  ;;  %v5811_v14 = vpop.eup %5810 }
 0x53c   :  { %v4894_v51 = vpop.f32.mrb[80].mxu1  ;;  %3177 = vmatprep.mubr.f32.mxu0 %v6014_v2  ;;  %5820 = vtanh.f32 %v5471_v15 }
 0x53d   :  { %v2793_v37 = vpop.f32.mrb[81].mxu1  ;;  %5822 = vtanh.f32 %v5470_v35  ;;  %v5472_v30 = vadd.f32 %v4894_v51, %v7528_v6 }
 0x53e   :  { %v5813_v62 = vpop.eup %5812  ;;  %v5473_v18 = vadd.f32 %v2793_v37, %v7528_v6 }
 0x53f   :  { %3943 = vmatmul.mubr.msk.f32.gmra.mrb[50].mxu0 %vm3046_vm2, %v5807_v46  ;;  %v5815_v16 = vpop.eup %5814 }
 0x540   :  { %v4897_v12 = vpop.f32.mrb[82].mxu1  ;;  %3183 = vmatprep.mubr.f32.mxu0 %v6014_v2  ;;  %5824 = vtanh.f32 %v5473_v18 }
 0x541   :  { %v2803_v49 = vpop.f32.mrb[83].mxu1  ;;  %5826 = vtanh.f32 %v5472_v30  ;;  %v5474_v19 = vadd.f32 %v4897_v12, %v7528_v6 }
 0x542   :  { %v5817_v60 = vpop.eup %5816  ;;  %v5475_v43 = vadd.f32 %v2803_v49, %v7528_v6 }
 0x543   :  { %3944 = vmatmul.mubr.msk.f32.gmra.mrb[52].mxu0 %vm3046_vm2, %v5809_v33  ;;  %v5819_v10 = vpop.eup %5818 }
 0x544   :  { %3189 = vmatprep.mubr.f32.mxu0 %v6014_v2  ;;  %5828 = vtanh.f32 %v5475_v43 }
 0x545   :  { %5830 = vtanh.f32 %v5474_v19 }
 0x546   :  { %v5821_v29 = vpop.eup %5820 }
 0x547   :  { %3945 = vmatmul.mubr.msk.f32.gmra.mrb[54].mxu0 %vm3046_vm2, %v5811_v14  ;;  %v5823_v1 = vpop.eup %5822 }
 0x548   :  { %3195 = vmatprep.mubr.f32.mxu0 %v6014_v2 }
 0x54a   :  { %v5825_v55 = vpop.eup %5824 }
 0x54b   :  { %3946 = vmatmul.mubr.msk.f32.gmra.mrb[56].mxu0 %vm3046_vm2, %v5813_v62  ;;  %v5827_v7 = vpop.eup %5826 }
 0x54c   :  { %3201 = vmatprep.mubr.f32.mxu0 %v6014_v2 }
 0x54e   :  { %v5829_v59 = vpop.eup %5828 }
 0x54f   :  { %3947 = vmatmul.mubr.msk.f32.gmra.mrb[58].mxu0 %vm3046_vm2, %v5815_v16  ;;  %v5831_v57 = vpop.eup %5830 }
 0x550   :  { %3207 = vmatprep.mubr.f32.mxu0 %v6014_v2 }
 0x553   :  { %3948 = vmatmul.mubr.msk.f32.gmra.mrb[60].mxu0 %vm3046_vm2, %v5817_v60 }
 0x554   :  { %3213 = vmatprep.mubr.f32.mxu0 %v6014_v2 }
 0x557   :  { %3949 = vmatmul.mubr.msk.f32.gmra.mrb[62].mxu0 %vm3046_vm2, %v5819_v10 }
 0x558   :  { %3219 = vmatprep.mubr.f32.mxu0 %v6014_v2 }
 0x55b   :  { %3950 = vmatmul.mubr.msk.f32.gmra.mrb[64].mxu0 %vm3046_vm2, %v5821_v29 }
 0x55c   :  { %3225 = vmatprep.mubr.f32.mxu0 %v6014_v2 }
 0x55f   :  { %3951 = vmatmul.mubr.msk.f32.gmra.mrb[66].mxu0 %vm3046_vm2, %v5823_v1 }
 0x560   :  { %3231 = vmatprep.mubr.f32.mxu0 %v6014_v2 }
 0x563   :  { %3952 = vmatmul.mubr.msk.f32.gmra.mrb[68].mxu0 %vm3046_vm2, %v5825_v55 }
 0x564   :  { %3237 = vmatprep.mubr.f32.mxu0 %v6014_v2 }
 0x567   :  { %3953 = vmatmul.mubr.msk.f32.gmra.mrb[70].mxu0 %vm3046_vm2, %v5827_v7 }
 0x568   :  { %3243 = vmatprep.mubr.f32.mxu0 %v6014_v2 }
 0x56b   :  { %3954 = vmatmul.mubr.msk.f32.gmra.mrb[72].mxu0 %vm3046_vm2, %v5829_v59 }
 0x56c   :  { %3249 = vmatprep.mubr.f32.mxu0 %v6014_v2 }
 0x56f   :  { %3955 = vmatmul.mubr.msk.f32.gmra.mrb[74].mxu0 %vm3046_vm2, %v5831_v57 }
 0x570   :  { %4930 = vmatprep.mubr.msk.f32.mxu0 %vm6017_vm3, %v6014_v2 }
 0x606   :  { %v3161_v54 = vpop.f32.mrb[44].mxu0 }
 0x607   :  { %v3267_v42 = vadd.f32 %v7587_v48, %v3161_v54  ;;  %v3163_v38 = vpop.f32.mrb[45].mxu0 }
 0x608   :  { %v3268_v22 = vadd.f32 %v7593_v25, %v3163_v38 }
 0x609   :  { %v3299_v40 = vsub.f32 0.0, %v3267_v42 }
 0x60a   :  { %v3167_v20 = vpop.f32.mrb[46].mxu0 }
 0x60b   :  { %v3315_v13 = vmul.f32 1.442695, %v3299_v40  ;;  %v3269_v9 = vadd.f32 %v7587_v48, %v3167_v20  ;;  %v3169_v23 = vpop.f32.mrb[47].mxu0 }
 0x60c   :  { %v3270_v27 = vadd.f32 %v7593_v25, %v3169_v23 }
 0x60d   :  { %5832 = vpow2.f32 %v3315_v13  ;;  %v3300_v50 = vsub.f32 0.0, %v3269_v9 }
 0x60e   :  { %v3173_v6 = vpop.f32.mrb[48].mxu0 }
 0x60f   :  { %v3317_v21 = vmul.f32 1.442695, %v3300_v50  ;;  %v3271_v31 = vadd.f32 %v7587_v48, %v3173_v6  ;;  %v3175_v8 = vpop.f32.mrb[49].mxu0 }
 0x610   :  { %v3272_v37 = vadd.f32 %v7593_v25, %v3175_v8 }
 0x611   :  { %5834 = vpow2.f32 %v3317_v21  ;;  %v3301_v58 = vsub.f32 0.0, %v3271_v31 }
 0x612   :  { %v3179_v45 = vpop.f32.mrb[50].mxu0 }
 0x613   :  { %v3319_v0 = vmul.f32 1.442695, %v3301_v58  ;;  %v3273_v5 = vadd.f32 %v7587_v48, %v3179_v45  ;;  %v3181_v34 = vpop.f32.mrb[51].mxu0 }
 0x614   :  { %v3274_v26 = vadd.f32 %v7593_v25, %v3181_v34 }
 0x615   :  { %5836 = vpow2.f32 %v3319_v0  ;;  %v3302_v36 = vsub.f32 0.0, %v3273_v5 }
 0x616   :  { %v3185_v24 = vpop.f32.mrb[52].mxu0  ;;  %5838 = vtanh.f32 %v3268_v22 }
 0x617   :  { %v5833_v39 = vpop.eup %5832  ;;  %v3321_v17 = vmul.f32 1.442695, %v3302_v36  ;;  %v3275_v53 = vadd.f32 %v7587_v48, %v3185_v24  ;;  %v3187_v56 = vpop.f32.mrb[53].mxu0 }
 0x618   :  { %v3347_v4 = vadd.f32 1.0, %v5833_v39  ;;  %v3276_v43 = vadd.f32 %v7593_v25, %v3187_v56 }
 0x619   :  { %5840 = vpow2.f32 %v3321_v17  ;;  %v3303_v52 = vsub.f32 0.0, %v3275_v53 }
 0x61a   :  { %5842 = vrcp.f32 %v3347_v4  ;;  %v3191_v32 = vpop.f32.mrb[54].mxu0 }
 0x61b   :  { %v5835_v63 = vpop.eup %5834  ;;  %v3323_v11 = vmul.f32 1.442695, %v3303_v52  ;;  %v3277_v41 = vadd.f32 %v7587_v48, %v3191_v32  ;;  %v3193_v44 = vpop.f32.mrb[55].mxu0  ;;  %5844 = vtanh.f32 %v3270_v27 }
 0x61c   :  { %v3348_v51 = vadd.f32 1.0, %v5835_v63  ;;  %v3278_v40 = vadd.f32 %v7593_v25, %v3193_v44 }
 0x61d   :  { %5846 = vpow2.f32 %v3323_v11  ;;  %v3304_v46 = vsub.f32 0.0, %v3277_v41 }
 0x61e   :  { %5848 = vrcp.f32 %v3348_v51  ;;  %v3197_v47 = vpop.f32.mrb[56].mxu0 }
 0x61f   :  { %v5837_v12 = vpop.eup %5836  ;;  %v3325_v49 = vmul.f32 1.442695, %v3304_v46  ;;  %v3279_v33 = vadd.f32 %v7587_v48, %v3197_v47  ;;  %v3199_v61 = vpop.f32.mrb[57].mxu0  ;;  %5850 = vtanh.f32 %v3272_v37 }
 0x620   :  { %v3349_v14 = vadd.f32 1.0, %v5837_v12  ;;  %v5839_v15 = vpop.eup %5838  ;;  %v3280_v0 = vadd.f32 %v7593_v25, %v3199_v61 }
 0x621   :  { %5852 = vpow2.f32 %v3325_v49  ;;  %v3305_v62 = vsub.f32 0.0, %v3279_v33 }
 0x622   :  { %5854 = vrcp.f32 %v3349_v14  ;;  %v3203_v16 = vpop.f32.mrb[58].mxu0 }
 0x623   :  { %v5841_v35 = vpop.eup %5840  ;;  %v3327_v60 = vmul.f32 1.442695, %v3305_v62  ;;  %v3281_v18 = vadd.f32 %v7587_v48, %v3203_v16  ;;  %v3205_v10 = vpop.f32.mrb[59].mxu0  ;;  %5856 = vtanh.f32 %v3274_v26 }
 0x624   :  { %v5843_v30 = vpop.eup %5842  ;;  %v3350_v29 = vadd.f32 1.0, %v5841_v35  ;;  %v3282_v27 = vadd.f32 %v7593_v25, %v3205_v10 }
 0x625   :  { %5858 = vpow2.f32 %v3327_v60  ;;  %v3306_v1 = vsub.f32 0.0, %v3281_v18  ;;  %v3412_v19 = vmul.f32 %v5843_v30, %v5839_v15  ;;  %v5845_v55 = vpop.eup %5844 }
 0x626   :  { %5860 = vrcp.f32 %v3350_v29  ;;  %v3209_v7 = vpop.f32.mrb[60].mxu0 }
 0x627   :  { %v5847_v59 = vpop.eup %5846  ;;  %v3329_v57 = vmul.f32 1.442695, %v3306_v1  ;;  %v3283_v3 = vadd.f32 %v7587_v48, %v3209_v7  ;;  %v3211_v54 = vpop.f32.mrb[61].mxu0  ;;  %5862 = vtanh.f32 %v3276_v43 }
 0x628   :  { %v5849_v42 = vpop.eup %5848  ;;  %v3351_v38 = vadd.f32 1.0, %v5847_v59  ;;  %v3284_v49 = vadd.f32 %v7593_v25, %v3211_v54 }
 0x629   :  { %5864 = vpow2.f32 %v3329_v57  ;;  %v3307_v20 = vsub.f32 0.0, %v3283_v3  ;;  %v3413_v13 = vmul.f32 %v5849_v42, %v5845_v55  ;;  %v5851_v9 = vpop.eup %5850 }
 0x62a   :  { %5866 = vrcp.f32 %v3351_v38  ;;  %v3215_v23 = vpop.f32.mrb[62].mxu0 }
 0x62b   :  { %v5853_v50 = vpop.eup %5852  ;;  %v3331_v6 = vmul.f32 1.442695, %v3307_v20  ;;  %v3285_v21 = vadd.f32 %v7587_v48, %v3215_v23  ;;  %v3217_v31 = vpop.f32.mrb[63].mxu0  ;;  %v5359_v8 = vpack.c.bf16 %v3413_v13, %v3412_v19  ;;  %5868 = vtanh.f32 %v3278_v40 }
 0x62c   :  { %v5855_v58 = vpop.eup %5854  ;;  %v3352_v45 = vadd.f32 1.0, %v5853_v50  ;;  %v3286_v10 = vadd.f32 %v7593_v25, %v3217_v31 }
 0x62d   :  { %5870 = vpow2.f32 %v3331_v6  ;;  %v3308_v5 = vsub.f32 0.0, %v3285_v21  ;;  %5360 = vmatpush3.bf16.msra.mxu0 %v5359_v8  ;;  %v3414_v34 = vmul.f32 %v5855_v58, %v5851_v9  ;;  %v5857_v22 = vpop.eup %5856 }
 0x62e   :  { %5872 = vrcp.f32 %v3352_v45  ;;  %v3221_v36 = vpop.f32.mrb[64].mxu0  ;;  %5361 = vmatprep.subr.bf16.mxu0 %v6016_v28 }
 0x62f   :  { %v5859_v24 = vpop.eup %5858  ;;  %v3333_v39 = vmul.f32 1.442695, %v3308_v5  ;;  %v3287_v17 = vadd.f32 %v7587_v48, %v3221_v36  ;;  %v3223_v53 = vpop.f32.mrb[65].mxu0  ;;  %5874 = vtanh.f32 %v3280_v0 }
 0x630   :  { %v5861_v56 = vpop.eup %5860  ;;  %v3353_v4 = vadd.f32 1.0, %v5859_v24  ;;  %v3288_v42 = vadd.f32 %v7593_v25, %v3223_v53 }
 0x631   :  { %5876 = vpow2.f32 %v3333_v39  ;;  %v3309_v52 = vsub.f32 0.0, %v3287_v17  ;;  %v3415_v32 = vmul.f32 %v5861_v56, %v5857_v22  ;;  %v5863_v63 = vpop.eup %5862 }
 0x632   :  { %5878 = vrcp.f32 %v3353_v4  ;;  %v3227_v11 = vpop.f32.mrb[66].mxu0 }
 0x633   :  { %v5865_v41 = vpop.eup %5864  ;;  %v3335_v44 = vmul.f32 1.442695, %v3309_v52  ;;  %v3289_v51 = vadd.f32 %v7587_v48, %v3227_v11  ;;  %v3229_v37 = vpop.f32.mrb[67].mxu0  ;;  %v5362_v46 = vpack.c.bf16 %v3415_v32, %v3414_v34  ;;  %5880 = vtanh.f32 %v3282_v27 }
 0x634   :  { %v5867_v47 = vpop.eup %5866  ;;  %v3354_v12 = vadd.f32 1.0, %v5865_v41  ;;  %v3290_v8 = vadd.f32 %v7593_v25, %v3229_v37 }
 0x635   :  { %5882 = vpow2.f32 %v3335_v44  ;;  %v3310_v33 = vsub.f32 0.0, %v3289_v51  ;;  %5363 = vmatpush3.bf16.msra.mxu0 %v5362_v46  ;;  %v3416_v61 = vmul.f32 %v5867_v47, %v5863_v63  ;;  %v5869_v14 = vpop.eup %5868 }
 0x636   :  { %5884 = vrcp.f32 %v3354_v12  ;;  %v3233_v26 = vpop.f32.mrb[68].mxu0  ;;  %5364 = vmatprep.subr.bf16.mxu0 %v6016_v28 }
 0x637   :  { %v5871_v62 = vpop.eup %5870  ;;  %v3337_v15 = vmul.f32 1.442695, %v3310_v33  ;;  %v3291_v16 = vadd.f32 %v7587_v48, %v3233_v26  ;;  %v3235_v35 = vpop.f32.mrb[69].mxu0  ;;  %5886 = vtanh.f32 %v3284_v49 }
 0x638   :  { %v5873_v60 = vpop.eup %5872  ;;  %v3355_v18 = vadd.f32 1.0, %v5871_v62  ;;  %v3292_v56 = vadd.f32 %v7593_v25, %v3235_v35 }
 0x639   :  { %5888 = vpow2.f32 %v3337_v15  ;;  %v3311_v30 = vsub.f32 0.0, %v3291_v16  ;;  %v3417_v29 = vmul.f32 %v5873_v60, %v5869_v14  ;;  %v5875_v43 = vpop.eup %5874 }
 0x63a   :  { %5890 = vrcp.f32 %v3355_v18  ;;  %v3239_v1 = vpop.f32.mrb[70].mxu0 }
 0x63b   :  { %v5877_v19 = vpop.eup %5876  ;;  %v3339_v55 = vmul.f32 1.442695, %v3311_v30  ;;  %v3293_v7 = vadd.f32 %v7587_v48, %v3239_v1  ;;  %v3241_v59 = vpop.f32.mrb[71].mxu0  ;;  %v5365_v57 = vpack.c.bf16 %v3417_v29, %v3416_v61  ;;  %5892 = vtanh.f32 %v3286_v10 }
 0x63c   :  { %v5879_v3 = vpop.eup %5878  ;;  %v3356_v54 = vadd.f32 1.0, %v5877_v19 }
 0x63d   :  { %5894 = vpow2.f32 %v3339_v55  ;;  %v3312_v38 = vsub.f32 0.0, %v3293_v7  ;;  %5366 = vmatpush3.bf16.msra.mxu0 %v5365_v57  ;;  %v3418_v40 = vmul.f32 %v5879_v3, %v5875_v43  ;;  %v5881_v20 = vpop.eup %5880 }
 0x63e   :  { %5896 = vrcp.f32 %v3356_v54  ;;  %v3245_v13 = vpop.f32.mrb[72].mxu0  ;;  %5367 = vmatprep.subr.bf16.mxu0 %v6016_v28 }
 0x63f   :  { %v5883_v9 = vpop.eup %5882  ;;  %v3341_v23 = vmul.f32 1.442695, %v3312_v38  ;;  %v3295_v50 = vadd.f32 %v7587_v48, %v3245_v13  ;;  %v3247_v6 = vpop.f32.mrb[73].mxu0  ;;  %5898 = vtanh.f32 %v3288_v42  ;;  %v3499_v42 = vld [vmem:[%s7804_s11] sm:$0xff]  ;;  %v3500_v38 = vld [vmem:[%s7804_s11 + $0x8] sm:$0xff] }
 0x640   :  { %v5885_v21 = vpop.eup %5884  ;;  %v3357_v31 = vadd.f32 1.0, %v5883_v9  ;;  %v3296_v49 = vadd.f32 %v7593_v25, %v3247_v6  ;;  %v5383_v13 = vpack.c.bf16 %v3500_v38, %v3499_v42  ;;  %v3501_v9 = vld [vmem:[%s7804_s11 + $0x10] sm:$0xff]  ;;  %v3503_v6 = vld [vmem:[%s7804_s11 + $0x20] sm:$0xff] }
 0x641   :  { %5900 = vpow2.f32 %v3341_v23  ;;  %v3313_v58 = vsub.f32 0.0, %v3295_v50  ;;  %v3419_v45 = vmul.f32 %v5885_v21, %v5881_v20  ;;  %v5887_v0 = vpop.eup %5886  ;;  %v3411_v20 = vld [vmem:[%s7805_s2] sm:$0xff]  ;;  %v3502_v23 = vld [vmem:[%s7804_s11 + $0x18] sm:$0xff]  ;;  %v3504_v21 = vld [vmem:[%s7804_s11 + $0x28] sm:$0xff] }
 0x642   :  { %5902 = vrcp.f32 %v3357_v31  ;;  %v3251_v5 = vpop.f32.mrb[74].mxu0  ;;  %v5386_v50 = vpack.c.bf16 %v3502_v23, %v3501_v9  ;;  %v5389_v31 = vpack.c.bf16 %v3504_v21, %v3503_v6  ;;  %v3692_v38 = vld [vmem:[%s7807_s15 + $0x20] sm:$0xff]  ;;  %v3695_v9 = vld [vmem:[%s7807_s15 + $0x38] sm:$0xff] }
 0x643   :  { %v5889_v34 = vpop.eup %5888  ;;  %v3343_v22 = vmul.f32 1.442695, %v3313_v58  ;;  %v3297_v36 = vadd.f32 %v7587_v48, %v3251_v5  ;;  %v3253_v24 = vpop.f32.mrb[75].mxu0  ;;  %v5368_v39 = vpack.c.bf16 %v3419_v45, %v3418_v40  ;;  %5904 = vtanh.f32 %v3290_v8  ;;  %v3505_v8 = vld [vmem:[%s7804_s11 + $0x30] sm:$0xff]  ;;  %v3506_v58 = vld [vmem:[%s7804_s11 + $0x38] sm:$0xff]  ;;  %v3508_v5 = vld [vmem:[%s7804_s11 + $0x48] sm:$0xff] }
 0x644   :  { %v5891_v17 = vpop.eup %5890  ;;  %v3358_v53 = vadd.f32 1.0, %v5889_v34  ;;  %v3294_v48 = vadd.f32 %v7593_v25, %v3241_v59  ;;  %v3298_v15 = vadd.f32 %v7593_v25, %v3253_v24  ;;  %v5392_v45 = vpack.c.bf16 %v3506_v58, %v3505_v8  ;;  %v3957_v6 = vld [vmem:[%s7810_s14] ss:$0 sm:$0xff] }
 0x645   :  { %5906 = vpow2.f32 %v3343_v22  ;;  %v3314_v4 = vsub.f32 0.0, %v3297_v36  ;;  %5369 = vmatpush3.bf16.msra.mxu0 %v5368_v39  ;;  %v3420_v27 = vmul.f32 %v5891_v17, %v5887_v0  ;;  %v5893_v52 = vpop.eup %5892  ;;  %v3507_v0 = vld [vmem:[%s7804_s11 + $0x40] sm:$0xff]  ;;  %v3509_v22 = vld [vmem:[%s7804_s11 + $0x50] sm:$0xff]  ;;  %v3510_v36 = vld [vmem:[%s7804_s11 + $0x58] sm:$0xff] }
 0x646   :  { %5908 = vrcp.f32 %v3358_v53  ;;  %5370 = vmatprep.subr.bf16.mxu0 %v6016_v28  ;;  %v5395_v34 = vpack.c.bf16 %v3508_v5, %v3507_v0  ;;  %v5398_v24 = vpack.c.bf16 %v3510_v36, %v3509_v22  ;;  %v3511_v39 = vld [vmem:[%s7804_s11 + $0x60] sm:$0xff]  ;;  %v3512_v17 = vld [vmem:[%s7804_s11 + $0x68] sm:$0xff] }
 0x647   :  { %v5895_v32 = vpop.eup %5894  ;;  %v3345_v63 = vmul.f32 1.442695, %v3314_v4  ;;  %5910 = vtanh.f32 %v3292_v56  ;;  %v5401_v53 = vpack.c.bf16 %v3512_v17, %v3511_v39  ;;  %v3513_v56 = vld [vmem:[%s7804_s11 + $0x70] sm:$0xff]  ;;  %v3514_v4 = vld [vmem:[%s7804_s11 + $0x78] sm:$0xff] }
 0x648   :  { %v5897_v11 = vpop.eup %5896  ;;  %v3359_v41 = vadd.f32 1.0, %v5895_v32  ;;  %v3594_v32 = vld [vmem:[%s7806_s13 + $0x8] sm:$0xff] }
 0x649   :  { %5912 = vpow2.f32 %v3345_v63  ;;  %v3421_v44 = vmul.f32 %v5897_v11, %v5893_v52  ;;  %v5899_v51 = vpop.eup %5898  ;;  %v3593_v52 = vld [vmem:[%s7806_s13] sm:$0xff]  ;;  %v3595_v63 = vld [vmem:[%s7806_s13 + $0x10] sm:$0xff] }
 0x64a   :  { %5914 = vrcp.f32 %v3359_v41  ;;  %v5407_v11 = vpack.c.bf16 %v3594_v32, %v3593_v52  ;;  %v3596_v41 = vld [vmem:[%s7806_s13 + $0x18] sm:$0xff] }
 0x64b   :  { %v5901_v37 = vpop.eup %5900  ;;  %v5371_v46 = vpack.c.bf16 %v3421_v44, %v3420_v27  ;;  %5916 = vtanh.f32 %v3294_v48  ;;  %v5404_v27 = vpack.c.bf16 %v3514_v4, %v3513_v56  ;;  %v5410_v48 = vpack.c.bf16 %v3596_v41, %v3595_v63  ;;  %v3597_v44 = vld [vmem:[%s7806_s13 + $0x20] sm:$0xff] }
 0x64c   :  { %v5903_v47 = vpop.eup %5902  ;;  %v3360_v12 = vadd.f32 1.0, %v5901_v37  ;;  %5408 = vmatpush3.bf16.msra.mxu1 %v5407_v11 }
 0x64d   :  { %5372 = vmatpush3.bf16.msra.mxu0 %v5371_v46  ;;  %v3422_v33 = vmul.f32 %v5903_v47, %v5899_v51  ;;  %v5905_v61 = vpop.eup %5904  ;;  %5409 = vmatprep.subr.bf16.mxu1 %v6016_v28  ;;  %v3598_v51 = vld [vmem:[%s7806_s13 + $0x28] sm:$0xff]  ;;  %v3599_v46 = vld [vmem:[%s7806_s13 + $0x30] sm:$0xff]  ;;  %v3600_v47 = vld [vmem:[%s7806_s13 + $0x38] sm:$0xff] }
 0x64e   :  { %5918 = vrcp.f32 %v3360_v12  ;;  %5373 = vmatprep.subr.bf16.mxu0 %v6016_v28  ;;  %v5413_v37 = vpack.c.bf16 %v3598_v51, %v3597_v44  ;;  %v5416_v12 = vpack.c.bf16 %v3600_v47, %v3599_v46 }
 0x64f   :  { %v5907_v14 = vpop.eup %5906  ;;  %5920 = vtanh.f32 %v3296_v49  ;;  %v3601_v49 = vld [vmem:[%s7806_s13 + $0x40] sm:$0xff] }
 0x650   :  { %v5909_v26 = vpop.eup %5908  ;;  %v3361_v62 = vadd.f32 1.0, %v5907_v14  ;;  %5411 = vmatpush3.bf16.msra.mxu1 %v5410_v48 }
 0x651   :  { %v3423_v16 = vmul.f32 %v5909_v26, %v5905_v61  ;;  %v5911_v35 = vpop.eup %5910  ;;  %5412 = vmatprep.subr.bf16.mxu1 %v6016_v28 }
 0x652   :  { %5922 = vrcp.f32 %v3361_v62 }
 0x653   :  { %v5913_v60 = vpop.eup %5912  ;;  %v5374_v18 = vpack.c.bf16 %v3423_v16, %v3422_v33  ;;  %5924 = vtanh.f32 %v3298_v15  ;;  %v3602_v33 = vld [vmem:[%s7806_s13 + $0x48] sm:$0xff]  ;;  %v3603_v15 = vld [vmem:[%s7806_s13 + $0x50] sm:$0xff]  ;;  %v3604_v16 = vld [vmem:[%s7806_s13 + $0x58] sm:$0xff] }
 0x654   :  { %v5915_v10 = vpop.eup %5914  ;;  %v3362_v30 = vadd.f32 1.0, %v5913_v60  ;;  %5414 = vmatpush3.bf16.msra.mxu1 %v5413_v37  ;;  %v5419_v61 = vpack.c.bf16 %v3602_v33, %v3601_v49  ;;  %v3605_v60 = vld [vmem:[%s7806_s13 + $0x60] sm:$0xff] }
 0x655   :  { %5375 = vmatpush3.bf16.msra.mxu0 %v5374_v18  ;;  %v3424_v29 = vmul.f32 %v5915_v10, %v5911_v35  ;;  %v5917_v43 = vpop.eup %5916  ;;  %5415 = vmatprep.subr.bf16.mxu1 %v6016_v28  ;;  %v5422_v35 = vpack.c.bf16 %v3604_v16, %v3603_v15  ;;  %v3606_v18 = vld [vmem:[%s7806_s13 + $0x68] sm:$0xff] }
 0x656   :  { %5926 = vrcp.f32 %v3362_v30  ;;  %5376 = vmatprep.subr.bf16.mxu0 %v6016_v28  ;;  %v5425_v10 = vpack.c.bf16 %v3606_v18, %v3605_v60  ;;  %v3608_v30 = vld [vmem:[%s7806_s13 + $0x78] sm:$0xff] }
 0x658   :  { %v5919_v1 = vpop.eup %5918  ;;  %5417 = vmatpush3.bf16.msra.mxu1 %v5416_v12 }
 0x659   :  { %v3425_v19 = vmul.f32 %v5919_v1, %v5917_v43  ;;  %v5921_v55 = vpop.eup %5920  ;;  %5418 = vmatprep.subr.bf16.mxu1 %v6016_v28  ;;  %v3688_v43 = vld [vmem:[%s7807_s15] sm:$0xff]  ;;  %v3689_v1 = vld [vmem:[%s7807_s15 + $0x8] sm:$0xff] }
 0x65b   :  { %v5377_v7 = vpack.c.bf16 %v3425_v19, %v3424_v29  ;;  %v5431_v19 = vpack.c.bf16 %v3689_v1, %v3688_v43 }
 0x65c   :  { %v5923_v59 = vpop.eup %5922  ;;  %5420 = vmatpush3.bf16.msra.mxu1 %v5419_v61 }
 0x65d   :  { %5378 = vmatpush3.bf16.msra.mxu0 %v5377_v7  ;;  %v3426_v25 = vmul.f32 %v5923_v59, %v5921_v55  ;;  %v5925_v57 = vpop.eup %5924  ;;  %5421 = vmatprep.subr.bf16.mxu1 %v6016_v28  ;;  %v3956_v55 = vld [vmem:[%s7808_s12] ss:$0 sm:$0xff] }
 0x65e   :  { %5379 = vmatprep.subr.bf16.mxu0 %v6016_v28 }
 0x660   :  { %v5927_v3 = vpop.eup %5926  ;;  %5423 = vmatpush3.bf16.msra.mxu1 %v5422_v35 }
 0x661   :  { %v3427_v54 = vmul.f32 %v5927_v3, %v5925_v57  ;;  %5424 = vmatprep.subr.bf16.mxu1 %v6016_v28  ;;  %v3690_v3 = vld [vmem:[%s7807_s15 + $0x10] sm:$0xff] }
 0x663   :  { %v5380_v40 = vpack.c.bf16 %v3427_v54, %v3426_v25  ;;  %v3691_v54 = vld [vmem:[%s7807_s15 + $0x18] sm:$0xff] }
 0x664   :  { %5426 = vmatpush3.bf16.msra.mxu1 %v5425_v10  ;;  %v5434_v42 = vpack.c.bf16 %v3691_v54, %v3690_v3 }
 0x665   :  { %5381 = vmatpush3.bf16.msra.mxu0 %v5380_v40  ;;  %5427 = vmatprep.subr.bf16.mxu1 %v6016_v28  ;;  %v3693_v40 = vld [vmem:[%s7807_s15 + $0x28] sm:$0xff] }
 0x666   :  { %5382 = vmatprep.subr.bf16.mxu0 %v6016_v28 }
 0x668   :  { %4931 = vmatmul.mubr.f32.vlgmr.msra.gmra.mrb[76].mxu0 %v3411_v20  ;;  %v5437_v20 = vpack.c.bf16 %v3693_v40, %v3692_v38 }
 0x669   :  { %5384 = vmatpush3.bf16.msra.mxu0 %v5383_v13  ;;  %4965 = vmatprep.mubr.msk.f32.mxu0 %vm6017_vm3, %v6014_v2  ;;  %v3694_v13 = vld [vmem:[%s7807_s15 + $0x30] sm:$0xff] }
 0x66a   :  { %5385 = vmatprep.subr.bf16.mxu0 %v6016_v28  ;;  %v5440_v23 = vpack.c.bf16 %v3695_v9, %v3694_v13 }
 0x66d   :  { %5387 = vmatpush3.bf16.msra.mxu0 %v5386_v50  ;;  %v24_v50 = vstv %s7809_s16 }
 0x66e   :  { %5388 = vmatprep.subr.bf16.mxu0 %v6016_v28  ;;  %25 = vst [vmem:[#allocation2] sm:$0x1] %v24_v50 }
 0x671   :  { %5390 = vmatpush3.bf16.msra.mxu0 %v5389_v31 }
 0x672   :  { %5391 = vmatprep.subr.bf16.mxu0 %v6016_v28 }
 0x675   :  { %5393 = vmatpush3.bf16.msra.mxu0 %v5392_v45  ;;  %v3958_v58 = vld [vmem:[#allocation2] ss:$0 sm:$0xff] }
 0x676   :  { %5394 = vmatprep.subr.bf16.mxu0 %v6016_v28 }
 0x679   :  { %5396 = vmatpush3.bf16.msra.mxu0 %v5395_v34 }
 0x67a   :  { %5397 = vmatprep.subr.bf16.mxu0 %v6016_v28 }
 0x67d   :  { %5399 = vmatpush3.bf16.msra.mxu0 %v5398_v24 }
 0x67e   :  { %5400 = vmatprep.subr.bf16.mxu0 %v6016_v28 }
 0x681   :  { %5402 = vmatpush3.bf16.msra.mxu0 %v5401_v53 }
 0x682   :  { %5403 = vmatprep.subr.bf16.mxu0 %v6016_v28 }
 0x685   :  { %5405 = vmatpush3.bf16.msra.mxu0 %v5404_v27 }
 0x686   :  { %5430 = vmatprep.subr.bf16.mxu0 %v6016_v28 }
 0x73b   :  { %v3494_v14 = vpop.f32.mrb[76].mxu0 }
 0x73c   :  { %5928 = vtanh.f32 %v3494_v14  ;;  %v4932_v26 = vpop.f32.mrb[77].mxu0 }
 0x746   :  { %v5929_v62 = vpop.eup %5928 }
 0x747   :  { %4966 = vmatmul.mubr.f32.vlgmr.msra.gmra.mrb[78].mxu0 %v5929_v62 }
 0x748   :  { %5019 = vmatprep.mubr.msk.f32.mxu0 %vm6017_vm3, %v6014_v2  ;;  %v3607_v2 = vld [vmem:[%s7806_s13 + $0x70] sm:$0xff]  ;;  %5432 = vmatpush3.bf16.msra.mxu0 %v5431_v19 }
 0x749   :  { %v5428_v29 = vpack.c.bf16 %v3608_v30, %v3607_v2  ;;  %5433 = vmatprep.subr.bf16.mxu0 %v6016_v28 }
 0x74b   :  { %5429 = vmatpush3.bf16.msra.mxu1 %v5428_v29 }
 0x74c   :  { %5435 = vmatpush3.bf16.msra.mxu0 %v5434_v42 }
 0x74d   :  { %5436 = vmatprep.subr.bf16.mxu0 %v6016_v28 }
 0x750   :  { %5438 = vmatpush3.bf16.msra.mxu0 %v5437_v20 }
 0x751   :  { %5439 = vmatprep.subr.bf16.mxu0 %v6016_v28 }
 0x754   :  { %5441 = vmatpush3.bf16.msra.mxu0 %v5440_v23 }
 0x81a   :  { %v3588_v7 = vpop.f32.mrb[78].mxu0 }
 0x81b   :  { %v3589_v59 = vadd.f32 %v3956_v55, %v3588_v7  ;;  %v4967_v25 = vpop.f32.mrb[79].mxu0 }
 0x81d   :  { %5930 = vtanh.f32 %v3589_v59 }
 0x827   :  { %v5931_v57 = vpop.eup %5930 }
 0x828   :  { %5001 = vmatmul.mubr.f32.vlgmr.msra.gmra.mrb[84].mxu1 %v5931_v57 }
 0x8fb   :  { %v3682_v28 = vpop.f32.mrb[84].mxu1 }
 0x8fc   :  { %v3683_v21 = vadd.f32 %v3957_v6, %v3682_v28  ;;  %v5002_v31 = vpop.f32.mrb[85].mxu1 }
 0x8fe   :  { %5932 = vtanh.f32 %v3683_v21 }
 0x908   :  { %v5933_v8 = vpop.eup %5932 }
 0x909   :  { %3687 = vst.msk [vmem:[%s7811_s18] sm:$0xff] %vm3046_vm2, %v5933_v8  ;;  %5020 = vmatmul.mubr.msk.f32.vlgmr.msra.gmra.mrb[80].mxu0 %vm3046_vm2, %v5933_v8 }
 0x9dc   :  { %v3772_v45 = vpop.f32.mrb[80].mxu0 }
 0x9dd   :  { %v3773_v0 = vadd.f32 %v3958_v58, %v3772_v45  ;;  %v5021_v5 = vpop.f32.mrb[81].mxu0 }
 0x9df   :  { %3777 = vst.msk [vmem:[%s7812_s17] sm:$0xff] %vm3776_vm4, %v3773_v0 }

</bundles_post_ra>
